<compile_context>
chip_gen: v7x
topology: tpu7x:2x2x1
jax: 0.10.0
libtpu: 0.0.40
codegen_flags: <defaults>
</compile_context>

<pallas_src>
import functools
import math

import jax
import jax.numpy as jnp
from jax.experimental import pallas as pl
from jax.experimental.pallas import tpu as pltpu


# ----------------------------- in-kernel helpers ---------------------------- #

def _layer_norm(h, g, b, eps=1e-5):
    mu = jnp.mean(h, axis=-1, keepdims=True)
    var = jnp.mean((h - mu) ** 2, axis=-1, keepdims=True)
    return (h - mu) * jax.lax.rsqrt(var + eps) * g + b


def _linear(x, w_ref, b_ref, relu=False):
    y = jnp.dot(x, w_ref[...], preferred_element_type=jnp.float32) + b_ref[...]
    if relu:
        y = jnp.maximum(y, 0.0)
    return y


def _softmax_rows(s):
    s = s - jnp.max(s, axis=-1, keepdims=True)
    p = jnp.exp(s)
    return p * pl.reciprocal(jnp.sum(p, axis=-1, keepdims=True), approx=True)


def _mha_core(buf, out_w_ref, out_b_ref, tq, tk, n_head, hd, d):
    """Attention over projections staged in `buf`: Q in [:, :d], K in [:, d:2d], V in [:, 2d:3d].

    The attention scale is pre-folded into the Q projection weights, so Q is read as-is.
    """
    acc = None
    for h in range(n_head):
        lo, hi = h * hd, (h + 1) * hd
        qh = buf[0:tq, lo:hi]                         # (tq, hd), already scaled
        kh = buf[0:tk, d + lo:d + hi]                 # (tk, hd)
        vh = buf[0:tk, 2 * d + lo:2 * d + hi]         # (tk, hd)
        # q @ k^T without an explicit transpose (contract last dims).
        s = jax.lax.dot_general(qh, kh, (((1,), (1,)), ((), ())),
                                preferred_element_type=jnp.float32)
        p = _softmax_rows(s)
        oh = jnp.dot(p, vh, preferred_element_type=jnp.float32)       # (tq, hd)
        # Fold the output projection into the head loop: no head concat needed.
        contrib = jnp.dot(oh, out_w_ref[lo:hi, :],
                          preferred_element_type=jnp.float32)         # (tq, d)
        acc = contrib if acc is None else acc + contrib
    return acc + out_b_ref[...]


def _self_attention(x, p, buf, n_head):
    t, d = x.shape
    hd = d // n_head
    # Single fused QKV matmul, staged in VMEM scratch.
    buf[0:t, :] = (jnp.dot(x, p["qkv_w"][...], preferred_element_type=jnp.float32)
                   + p["qkv_b"][...])
    return _mha_core(buf, p["out_w"], p["out_b"], t, t, n_head, hd, d)


def _cross_attention(tgt, mem, p, buf, n_head):
    q, d = tgt.shape
    t = mem.shape[0]
    hd = d // n_head
    buf[0:q, 0:d] = (jnp.dot(tgt, p["q_w"][...], preferred_element_type=jnp.float32)
                     + p["q_b"][...])
    buf[0:t, d:3 * d] = (jnp.dot(mem, p["kv_w"][...], preferred_element_type=jnp.float32)
                         + p["kv_b"][...])
    return _mha_core(buf, p["out_w"], p["out_b"], q, t, n_head, hd, d)


def _encoder_layer(x, p, buf, n_head):
    a = _self_attention(x, p["sa"], buf, n_head)
    x = _layer_norm(x + a, p["ln1_g"][...], p["ln1_b"][...])
    h = _linear(x, p["ff1_w"], p["ff1_b"], relu=True)
    h = _linear(h, p["ff2_w"], p["ff2_b"])
    return _layer_norm(x + h, p["ln2_g"][...], p["ln2_b"][...])


def _decoder_layer(tgt, mem, p, buf, n_head):
    a = _self_attention(tgt, p["sa"], buf, n_head)
    tgt = _layer_norm(tgt + a, p["ln1_g"][...], p["ln1_b"][...])
    a = _cross_attention(tgt, mem, p["ca"], buf, n_head)
    tgt = _layer_norm(tgt + a, p["ln2_g"][...], p["ln2_b"][...])
    h = _linear(tgt, p["ff1_w"], p["ff1_b"], relu=True)
    h = _linear(h, p["ff2_w"], p["ff2_b"])
    return _layer_norm(tgt + h, p["ln3_g"][...], p["ln3_b"][...])


# ------------------------------ fused forward ------------------------------- #

def gdlt_forward(params, x, *, n_head):
    B, T, C = x.shape
    Q, D = params["proto"].shape
    assert D % n_head == 0

    flat, treedef = jax.tree_util.tree_flatten(params)
    n_leaves = len(flat)

    def kernel(*refs):
        x_ref = refs[0]
        p = jax.tree_util.tree_unflatten(treedef, refs[1:1 + n_leaves])
        out_ref, embed_ref, s_ref = refs[1 + n_leaves:4 + n_leaves]
        buf = refs[4 + n_leaves]

        # in_proj: Conv1d(k=1)+BN (folded) + ReLU + Conv1d(k=1)+BN (folded)
        h = _linear(x_ref[...], p["inproj1_w"], p["inproj1_b"], relu=True)
        h = _linear(h, p["inproj2_w"], p["inproj2_b"])                 # (T, D)

        # Transformer encoder (+ final nn.Transformer encoder LayerNorm)
        for lp in p["encoder_layers"]:
            h = _encoder_layer(h, lp, buf, n_head)
        mem = _layer_norm(h, p["enc_norm_g"][...], p["enc_norm_b"][...])

        # Transformer decoder over learned prototypes (+ final decoder LayerNorm)
        tgt = p["proto"][...]                                          # (Q, D)
        for lp in p["decoder_layers"]:
            tgt = _decoder_layer(tgt, mem, lp, buf, n_head)
        q1 = _layer_norm(tgt, p["dec_norm_g"][...], p["dec_norm_b"][...])

        # Regressor: full (Q, Q) slab output.
        s1 = (jnp.dot(q1, p["reg_wt"][...], preferred_element_type=jnp.float32)
              + p["reg_b_row"][...])

        # Head: diagonal via row-wise dot, sigmoid, normalize, weighted sum.
        diag = (jnp.sum(q1 * p["reg_w"][...], axis=-1, keepdims=True)
                + p["reg_b_col"][...])                                 # (Q, 1)
        ns = 1.0 / (1.0 + jnp.exp(-diag))
        ns = ns / jnp.sum(ns, axis=0, keepdims=True)
        out = jnp.sum(p["weight_col"][...] * ns, axis=0, keepdims=True)  # (1, 1)

        out_ref[...] = out
        embed_ref[...] = q1
        s_ref[...] = s1

    def _const_spec(shape):
        nd = len(shape)
        return pl.BlockSpec(shape, lambda b, _nd=nd: (0,) * _nd)

    in_specs = [pl.BlockSpec((None, T, C), lambda b: (b, 0, 0))]
    in_specs += [_const_spec(tuple(leaf.shape)) for leaf in flat]

    out_shape = (
        jax.ShapeDtypeStruct((B, 1, 1), jnp.float32),
        jax.ShapeDtypeStruct((B, Q, D), jnp.float32),
        jax.ShapeDtypeStruct((B, Q, Q), jnp.float32),
    )
    out_specs = (
        pl.BlockSpec((None, 1, 1), lambda b: (b, 0, 0)),
        pl.BlockSpec((None, Q, D), lambda b: (b, 0, 0)),
        pl.BlockSpec((None, Q, Q), lambda b: (b, 0, 0)),
    )

    out, embed, s1 = pl.pallas_call(
        kernel,
        grid=(B,),
        in_specs=in_specs,
        out_specs=out_specs,
        out_shape=out_shape,
        scratch_shapes=[pltpu.VMEM((max(T, Q), 3 * D), jnp.float32)],
        compiler_params=pltpu.CompilerParams(
            dimension_semantics=("parallel",)),
    )(x, *flat)

    return {"output": out.reshape(B), "embed": embed, "s": s1}


# --------------------------- deterministic params --------------------------- #

def init_params(key, in_dim, hidden_dim, n_head, n_encoder, n_decoder, n_query):
    keys = iter(jax.random.split(key, 512))

    def nrm(shape, scale=0.05):
        return scale * jax.random.normal(next(keys), shape, dtype=jnp.float32)

    mid = in_dim // 2
    D = hidden_dim
    dff = 3 * hidden_dim
    attn_scale = 1.0 / math.sqrt(D // n_head)   # folded into Q projections below

    def fold_bn(w, b, gamma, beta, mean, var, eps=1e-5):
        # w: torch Conv1d(k=1) weight (Dout, Din) -> folded (Din, Dout), (1, Dout)
        s = gamma / jnp.sqrt(var + eps)
        return (w * s[:, None]).T, (s * (b - mean) + beta)[None, :]

    w1, b1 = nrm((mid, in_dim)), nrm((mid,))
    g1, be1 = 1.0 + nrm((mid,)), nrm((mid,))
    rm1, rv1 = nrm((mid,)), 1.0 + jnp.abs(nrm((mid,)))
    inproj1_w, inproj1_b = fold_bn(w1, b1, g1, be1, rm1, rv1)

    w2, b2 = nrm((D, mid)), nrm((D,))
    g2, be2 = 1.0 + nrm((D,)), nrm((D,))
    rm2, rv2 = nrm((D,)), 1.0 + jnp.abs(nrm((D,)))
    inproj2_w, inproj2_b = fold_bn(w2, b2, g2, be2, rm2, rv2)

    def self_attn_p():
        w_in, b_in = nrm((3 * D, D)), nrm((3 * D,))
        w_o, b_o = nrm((D, D)), nrm((D,))
        wt = w_in.T                         # (D, 3D): [Wq^T | Wk^T | Wv^T]
        bt = b_in[None, :]
        # Fold attention scale into the Q projection (once, at init).
        wt = wt.at[:, :D].multiply(attn_scale)
        bt = bt.at[:, :D].multiply(attn_scale)
        return {"qkv_w": wt, "qkv_b": bt,
                "out_w": w_o.T, "out_b": b_o[None, :]}

    def cross_attn_p():
        w_in, b_in = nrm((3 * D, D)), nrm((3 * D,))
        w_o, b_o = nrm((D, D)), nrm((D,))
        wt = w_in.T                         # (D, 3D)
        q_w = wt[:, :D] * attn_scale
        q_b = b_in[None, :D] * attn_scale
        return {"q_w": q_w, "q_b": q_b,
                "kv_w": wt[:, D:], "kv_b": b_in[None, D:],
                "out_w": w_o.T, "out_b": b_o[None, :]}

    def ln_p():
        return 1.0 + nrm((1, D)), nrm((1, D))

    def ffn_p():
        wa, ba = nrm((dff, D)), nrm((dff,))
        wb, bb = nrm((D, dff)), nrm((D,))
        return {"ff1_w": wa.T, "ff1_b": ba[None, :],
                "ff2_w": wb.T, "ff2_b": bb[None, :]}

    def enc_p():
        g1_, b1_ = ln_p()
        g2_, b2_ = ln_p()
        d = {"sa": self_attn_p(),
             "ln1_g": g1_, "ln1_b": b1_, "ln2_g": g2_, "ln2_b": b2_}
        d.update(ffn_p())
        return d

    def dec_p():
        g1_, b1_ = ln_p()
        g2_, b2_ = ln_p()
        g3_, b3_ = ln_p()
        d = {"sa": self_attn_p(), "ca": cross_attn_p(),
             "ln1_g": g1_, "ln1_b": b1_, "ln2_g": g2_, "ln2_b": b2_,
             "ln3_g": g3_, "ln3_b": b3_}
        d.update(ffn_p())
        return d

    enc_g, enc_b = ln_p()
    dec_g, dec_b = ln_p()

    reg_w, reg_b = nrm((n_query, D)), nrm((n_query,))

    return {
        "inproj1_w": inproj1_w, "inproj1_b": inproj1_b,
        "inproj2_w": inproj2_w, "inproj2_b": inproj2_b,
        "encoder_layers": [enc_p() for _ in range(n_encoder)],
        "decoder_layers": [dec_p() for _ in range(n_decoder)],
        "enc_norm_g": enc_g, "enc_norm_b": enc_b,
        "dec_norm_g": dec_g, "dec_norm_b": dec_b,
        "proto": nrm((n_query, D), scale=1.0),
        "reg_w": reg_w, "reg_wt": reg_w.T,
        "reg_b_row": reg_b[None, :], "reg_b_col": reg_b[:, None],
        "weight_col": jnp.linspace(0.0, 1.0, n_query, dtype=jnp.float32)[:, None],
    }


# ----------------------------------- main ----------------------------------- #

if __name__ == "__main__":
    B, T = 2, 8
    in_dim, hidden_dim = 16, 32
    n_head, n_encoder, n_decoder, n_query = 4, 1, 1, 4

    key = jax.random.PRNGKey(0)
    k_param, k_x = jax.random.split(key)
    params = init_params(k_param, in_dim, hidden_dim, n_head,
                         n_encoder, n_decoder, n_query)
    x = jax.random.normal(k_x, (B, T, in_dim), dtype=jnp.float32)

    fwd = jax.jit(functools.partial(gdlt_forward, n_head=n_head))
    out = fwd(params, x)
    jax.block_until_ready(out["output"])
    jax.block_until_ready(out["embed"])
    jax.block_until_ready(out["s"])

    assert out["output"].shape == (B,)
    assert out["embed"].shape == (B, n_query, hidden_dim)
    assert out["s"].shape == (B, n_query, n_query)
    assert bool(jnp.all(jnp.isfinite(out["output"])))
    assert bool(jnp.all(jnp.isfinite(out["embed"])))
    assert bool(jnp.all(jnp.isfinite(out["s"])))
    print("KERNEL_OK")
</pallas_src>

<mosaic_0001>
module attributes {stable_mosaic.version = 11 : i64} {
  func.func @kernel(%arg0: i32, %arg1: memref<1x8x16xf32, #tpu.memory_space<vmem>>, %arg2: memref<1x32xf32, #tpu.memory_space<vmem>>, %arg3: memref<1x32xf32, #tpu.memory_space<vmem>>, %arg4: memref<1x64xf32, #tpu.memory_space<vmem>>, %arg5: memref<32x64xf32, #tpu.memory_space<vmem>>, %arg6: memref<1x32xf32, #tpu.memory_space<vmem>>, %arg7: memref<32x32xf32, #tpu.memory_space<vmem>>, %arg8: memref<1x32xf32, #tpu.memory_space<vmem>>, %arg9: memref<32x32xf32, #tpu.memory_space<vmem>>, %arg10: memref<1x96xf32, #tpu.memory_space<vmem>>, %arg11: memref<32x96xf32, #tpu.memory_space<vmem>>, %arg12: memref<1x32xf32, #tpu.memory_space<vmem>>, %arg13: memref<96x32xf32, #tpu.memory_space<vmem>>, %arg14: memref<1x32xf32, #tpu.memory_space<vmem>>, %arg15: memref<1x32xf32, #tpu.memory_space<vmem>>, %arg16: memref<1x32xf32, #tpu.memory_space<vmem>>, %arg17: memref<1x32xf32, #tpu.memory_space<vmem>>, %arg18: memref<1x32xf32, #tpu.memory_space<vmem>>, %arg19: memref<1x32xf32, #tpu.memory_space<vmem>>, %arg20: memref<1x32xf32, #tpu.memory_space<vmem>>, %arg21: memref<32x32xf32, #tpu.memory_space<vmem>>, %arg22: memref<1x96xf32, #tpu.memory_space<vmem>>, %arg23: memref<32x96xf32, #tpu.memory_space<vmem>>, %arg24: memref<1x32xf32, #tpu.memory_space<vmem>>, %arg25: memref<1x32xf32, #tpu.memory_space<vmem>>, %arg26: memref<1x96xf32, #tpu.memory_space<vmem>>, %arg27: memref<32x96xf32, #tpu.memory_space<vmem>>, %arg28: memref<1x32xf32, #tpu.memory_space<vmem>>, %arg29: memref<96x32xf32, #tpu.memory_space<vmem>>, %arg30: memref<1x32xf32, #tpu.memory_space<vmem>>, %arg31: memref<1x32xf32, #tpu.memory_space<vmem>>, %arg32: memref<1x32xf32, #tpu.memory_space<vmem>>, %arg33: memref<1x32xf32, #tpu.memory_space<vmem>>, %arg34: memref<1x32xf32, #tpu.memory_space<vmem>>, %arg35: memref<32x32xf32, #tpu.memory_space<vmem>>, %arg36: memref<1x96xf32, #tpu.memory_space<vmem>>, %arg37: memref<32x96xf32, #tpu.memory_space<vmem>>, %arg38: memref<1x8xf32, #tpu.memory_space<vmem>>, %arg39: memref<16x8xf32, #tpu.memory_space<vmem>>, %arg40: memref<1x32xf32, #tpu.memory_space<vmem>>, %arg41: memref<8x32xf32, #tpu.memory_space<vmem>>, %arg42: memref<4x32xf32, #tpu.memory_space<vmem>>, %arg43: memref<4x1xf32, #tpu.memory_space<vmem>>, %arg44: memref<1x4xf32, #tpu.memory_space<vmem>>, %arg45: memref<4x32xf32, #tpu.memory_space<vmem>>, %arg46: memref<32x4xf32, #tpu.memory_space<vmem>>, %arg47: memref<4x1xf32, #tpu.memory_space<vmem>>, %arg48: memref<1x1x1xf32, #tpu.memory_space<vmem>>, %arg49: memref<1x4x32xf32, #tpu.memory_space<vmem>>, %arg50: memref<1x4x4xf32, #tpu.memory_space<vmem>>, %arg51: memref<8x96xf32, #tpu.memory_space<vmem>>) attributes {dimension_semantics = [#tpu.dimension_semantics<parallel>], iteration_bounds = array<i64: 2>, scalar_prefetch = 0 : i64, scratch_operands = 1 : i64, tpu.core_type = #tpu.core_type<tc>, window_params = [{transform_indices = @transform_0, window_bounds = array<i64: 1, 8, 16>}, {pipeline_mode = #tpu.pipeline_mode<synchronous>, transform_indices = @transform_1, window_bounds = array<i64: 1, 32>}, {pipeline_mode = #tpu.pipeline_mode<synchronous>, transform_indices = @transform_2, window_bounds = array<i64: 1, 32>}, {pipeline_mode = #tpu.pipeline_mode<synchronous>, transform_indices = @transform_3, window_bounds = array<i64: 1, 64>}, {pipeline_mode = #tpu.pipeline_mode<synchronous>, transform_indices = @transform_4, window_bounds = array<i64: 32, 64>}, {pipeline_mode = #tpu.pipeline_mode<synchronous>, transform_indices = @transform_5, window_bounds = array<i64: 1, 32>}, {pipeline_mode = #tpu.pipeline_mode<synchronous>, transform_indices = @transform_6, window_bounds = array<i64: 32, 32>}, {pipeline_mode = #tpu.pipeline_mode<synchronous>, transform_indices = @transform_7, window_bounds = array<i64: 1, 32>}, {pipeline_mode = #tpu.pipeline_mode<synchronous>, transform_indices = @transform_8, window_bounds = array<i64: 32, 32>}, {pipeline_mode = #tpu.pipeline_mode<synchronous>, transform_indices = @transform_9, window_bounds = array<i64: 1, 96>}, {pipeline_mode = #tpu.pipeline_mode<synchronous>, transform_indices = @transform_10, window_bounds = array<i64: 32, 96>}, {pipeline_mode = #tpu.pipeline_mode<synchronous>, transform_indices = @transform_11, window_bounds = array<i64: 1, 32>}, {pipeline_mode = #tpu.pipeline_mode<synchronous>, transform_indices = @transform_12, window_bounds = array<i64: 96, 32>}, {pipeline_mode = #tpu.pipeline_mode<synchronous>, transform_indices = @transform_13, window_bounds = array<i64: 1, 32>}, {pipeline_mode = #tpu.pipeline_mode<synchronous>, transform_indices = @transform_14, window_bounds = array<i64: 1, 32>}, {pipeline_mode = #tpu.pipeline_mode<synchronous>, transform_indices = @transform_15, window_bounds = array<i64: 1, 32>}, {pipeline_mode = #tpu.pipeline_mode<synchronous>, transform_indices = @transform_16, window_bounds = array<i64: 1, 32>}, {pipeline_mode = #tpu.pipeline_mode<synchronous>, transform_indices = @transform_17, window_bounds = array<i64: 1, 32>}, {pipeline_mode = #tpu.pipeline_mode<synchronous>, transform_indices = @transform_18, window_bounds = array<i64: 1, 32>}, {pipeline_mode = #tpu.pipeline_mode<synchronous>, transform_indices = @transform_19, window_bounds = array<i64: 1, 32>}, {pipeline_mode = #tpu.pipeline_mode<synchronous>, transform_indices = @transform_20, window_bounds = array<i64: 32, 32>}, {pipeline_mode = #tpu.pipeline_mode<synchronous>, transform_indices = @transform_21, window_bounds = array<i64: 1, 96>}, {pipeline_mode = #tpu.pipeline_mode<synchronous>, transform_indices = @transform_22, window_bounds = array<i64: 32, 96>}, {pipeline_mode = #tpu.pipeline_mode<synchronous>, transform_indices = @transform_23, window_bounds = array<i64: 1, 32>}, {pipeline_mode = #tpu.pipeline_mode<synchronous>, transform_indices = @transform_24, window_bounds = array<i64: 1, 32>}, {pipeline_mode = #tpu.pipeline_mode<synchronous>, transform_indices = @transform_25, window_bounds = array<i64: 1, 96>}, {pipeline_mode = #tpu.pipeline_mode<synchronous>, transform_indices = @transform_26, window_bounds = array<i64: 32, 96>}, {pipeline_mode = #tpu.pipeline_mode<synchronous>, transform_indices = @transform_27, window_bounds = array<i64: 1, 32>}, {pipeline_mode = #tpu.pipeline_mode<synchronous>, transform_indices = @transform_28, window_bounds = array<i64: 96, 32>}, {pipeline_mode = #tpu.pipeline_mode<synchronous>, transform_indices = @transform_29, window_bounds = array<i64: 1, 32>}, {pipeline_mode = #tpu.pipeline_mode<synchronous>, transform_indices = @transform_30, window_bounds = array<i64: 1, 32>}, {pipeline_mode = #tpu.pipeline_mode<synchronous>, transform_indices = @transform_31, window_bounds = array<i64: 1, 32>}, {pipeline_mode = #tpu.pipeline_mode<synchronous>, transform_indices = @transform_32, window_bounds = array<i64: 1, 32>}, {pipeline_mode = #tpu.pipeline_mode<synchronous>, transform_indices = @transform_33, window_bounds = array<i64: 1, 32>}, {pipeline_mode = #tpu.pipeline_mode<synchronous>, transform_indices = @transform_34, window_bounds = array<i64: 32, 32>}, {pipeline_mode = #tpu.pipeline_mode<synchronous>, transform_indices = @transform_35, window_bounds = array<i64: 1, 96>}, {pipeline_mode = #tpu.pipeline_mode<synchronous>, transform_indices = @transform_36, window_bounds = array<i64: 32, 96>}, {pipeline_mode = #tpu.pipeline_mode<synchronous>, transform_indices = @transform_37, window_bounds = array<i64: 1, 8>}, {pipeline_mode = #tpu.pipeline_mode<synchronous>, transform_indices = @transform_38, window_bounds = array<i64: 16, 8>}, {pipeline_mode = #tpu.pipeline_mode<synchronous>, transform_indices = @transform_39, window_bounds = array<i64: 1, 32>}, {pipeline_mode = #tpu.pipeline_mode<synchronous>, transform_indices = @transform_40, window_bounds = array<i64: 8, 32>}, {pipeline_mode = #tpu.pipeline_mode<synchronous>, transform_indices = @transform_41, window_bounds = array<i64: 4, 32>}, {pipeline_mode = #tpu.pipeline_mode<synchronous>, transform_indices = @transform_42, window_bounds = array<i64: 4, 1>}, {pipeline_mode = #tpu.pipeline_mode<synchronous>, transform_indices = @transform_43, window_bounds = array<i64: 1, 4>}, {pipeline_mode = #tpu.pipeline_mode<synchronous>, transform_indices = @transform_44, window_bounds = array<i64: 4, 32>}, {pipeline_mode = #tpu.pipeline_mode<synchronous>, transform_indices = @transform_45, window_bounds = array<i64: 32, 4>}, {pipeline_mode = #tpu.pipeline_mode<synchronous>, transform_indices = @transform_46, window_bounds = array<i64: 4, 1>}, {transform_indices = @transform_47, window_bounds = array<i64: 1, 1, 1>}, {transform_indices = @transform_48, window_bounds = array<i64: 1, 4, 32>}, {transform_indices = @transform_49, window_bounds = array<i64: 1, 4, 4>}]} {
    %c0 = arith.constant 0 : index
    %c0_0 = arith.constant 0 : index
    %c0_1 = arith.constant 0 : index
    %0 = vector.load %arg1[%c0, %c0_0, %c0_1] : memref<1x8x16xf32, #tpu.memory_space<vmem>>, vector<1x8x16xf32>
    %1 = vector.shape_cast %0 : vector<1x8x16xf32> to vector<8x16xf32>
    %c0_2 = arith.constant 0 : index
    %c0_3 = arith.constant 0 : index
    %2 = vector.load %arg39[%c0_2, %c0_3] : memref<16x8xf32, #tpu.memory_space<vmem>>, vector<16x8xf32>
    %cst = arith.constant dense<0.000000e+00> : vector<8x8xf32>
    %3 = tpu.matmul %1, %2, %cst {dimension_numbers = #tpu.dot_dimension_numbers<[1], [0], [0], [1], [0, 0, 1, 1], [], []>} : vector<8x16xf32>, vector<16x8xf32>, vector<8x8xf32> -> vector<8x8xf32>
    %c0_4 = arith.constant 0 : index
    %c0_5 = arith.constant 0 : index
    %4 = vector.load %arg38[%c0_4, %c0_5] : memref<1x8xf32, #tpu.memory_space<vmem>>, vector<1x8xf32>
    %5 = vector.broadcast %4 : vector<1x8xf32> to vector<8x8xf32>
    %6 = arith.addf %3, %5 : vector<8x8xf32>
    %cst_6 = arith.constant 0.000000e+00 : f32
    %7 = vector.broadcast %cst_6 : f32 to vector<8x8xf32>
    %8 = arith.maximumf %6, %7 : vector<8x8xf32>
    %c0_7 = arith.constant 0 : index
    %c0_8 = arith.constant 0 : index
    %9 = vector.load %arg41[%c0_7, %c0_8] : memref<8x32xf32, #tpu.memory_space<vmem>>, vector<8x32xf32>
    %cst_9 = arith.constant dense<0.000000e+00> : vector<8x32xf32>
    %10 = tpu.matmul %8, %9, %cst_9 {dimension_numbers = #tpu.dot_dimension_numbers<[1], [0], [0], [1], [0, 0, 1, 1], [], []>} : vector<8x8xf32>, vector<8x32xf32>, vector<8x32xf32> -> vector<8x32xf32>
    %c0_10 = arith.constant 0 : index
    %c0_11 = arith.constant 0 : index
    %11 = vector.load %arg40[%c0_10, %c0_11] : memref<1x32xf32, #tpu.memory_space<vmem>>, vector<1x32xf32>
    %12 = vector.broadcast %11 : vector<1x32xf32> to vector<8x32xf32>
    %13 = arith.addf %10, %12 : vector<8x32xf32>
    %c0_12 = arith.constant 0 : index
    %c0_13 = arith.constant 0 : index
    %14 = vector.load %arg37[%c0_12, %c0_13] : memref<32x96xf32, #tpu.memory_space<vmem>>, vector<32x96xf32>
    %cst_14 = arith.constant dense<0.000000e+00> : vector<8x96xf32>
    %15 = tpu.matmul %13, %14, %cst_14 {dimension_numbers = #tpu.dot_dimension_numbers<[1], [0], [0], [1], [0, 0, 1, 1], [], []>} : vector<8x32xf32>, vector<32x96xf32>, vector<8x96xf32> -> vector<8x96xf32>
    %c0_15 = arith.constant 0 : index
    %c0_16 = arith.constant 0 : index
    %16 = vector.load %arg36[%c0_15, %c0_16] : memref<1x96xf32, #tpu.memory_space<vmem>>, vector<1x96xf32>
    %17 = vector.broadcast %16 : vector<1x96xf32> to vector<8x96xf32>
    %18 = arith.addf %15, %17 : vector<8x96xf32>
    %c0_17 = arith.constant 0 : index
    %c0_18 = arith.constant 0 : index
    %19 = vector.load %arg51[%c0_17, %c0_18] : memref<8x96xf32, #tpu.memory_space<vmem>>, vector<8x96xf32>
    tpu.vector_store %arg51[%c0_17, %c0_18], %18 {strides = array<i32>} : memref<8x96xf32, #tpu.memory_space<vmem>>, vector<8x96xf32>,
    %c0_19 = arith.constant 0 : index
    %c0_20 = arith.constant 0 : index
    %20 = vector.load %arg51[%c0_19, %c0_20] : memref<8x96xf32, #tpu.memory_space<vmem>>, vector<8x8xf32>
    %c0_21 = arith.constant 0 : index
    %c32 = arith.constant 32 : index
    %21 = vector.load %arg51[%c0_21, %c32] : memref<8x96xf32, #tpu.memory_space<vmem>>, vector<8x8xf32>
    %c0_22 = arith.constant 0 : index
    %c64 = arith.constant 64 : index
    %22 = vector.load %arg51[%c0_22, %c64] : memref<8x96xf32, #tpu.memory_space<vmem>>, vector<8x8xf32>
    %cst_23 = arith.constant dense<0.000000e+00> : vector<8x8xf32>
    %23 = tpu.matmul %20, %21, %cst_23 {dimension_numbers = #tpu.dot_dimension_numbers<[1], [1], [0], [0], [0, 0, 1, 0], [], []>} : vector<8x8xf32>, vector<8x8xf32>, vector<8x8xf32> -> vector<8x8xf32>
    %cst_24 = arith.constant dense<0xFF800000> : vector<8xf32>
    %24 = vector.multi_reduction <maximumf>, %23, %cst_24 [1] : vector<8x8xf32> to vector<8xf32>
    %25 = vector.shape_cast %24 : vector<8xf32> to vector<8x1xf32>
    %26 = vector.broadcast %25 : vector<8x1xf32> to vector<8x8xf32>
    %27 = arith.subf %23, %26 : vector<8x8xf32>
    %28 = math.exp %27 : vector<8x8xf32>
    %cst_25 = arith.constant dense<0.000000e+00> : vector<8xf32>
    %29 = vector.multi_reduction <add>, %28, %cst_25 [1] : vector<8x8xf32> to vector<8xf32>
    %30 = vector.shape_cast %29 : vector<8xf32> to vector<8x1xf32>
    %31 = tpu.reciprocal %30 {approx = true} : vector<8x1xf32> -> vector<8x1xf32>
    %32 = vector.broadcast %31 : vector<8x1xf32> to vector<8x8xf32>
    %33 = arith.mulf %28, %32 : vector<8x8xf32>
    %cst_26 = arith.constant dense<0.000000e+00> : vector<8x8xf32>
    %34 = tpu.matmul %33, %22, %cst_26 {dimension_numbers = #tpu.dot_dimension_numbers<[1], [0], [0], [1], [0, 0, 1, 1], [], []>} : vector<8x8xf32>, vector<8x8xf32>, vector<8x8xf32> -> vector<8x8xf32>
    %c0_27 = arith.constant 0 : index
    %c0_28 = arith.constant 0 : index
    %35 = vector.load %arg35[%c0_27, %c0_28] : memref<32x32xf32, #tpu.memory_space<vmem>>, vector<8x32xf32>
    %cst_29 = arith.constant dense<0.000000e+00> : vector<8x32xf32>
    %36 = tpu.matmul %34, %35, %cst_29 {dimension_numbers = #tpu.dot_dimension_numbers<[1], [0], [0], [1], [0, 0, 1, 1], [], []>} : vector<8x8xf32>, vector<8x32xf32>, vector<8x32xf32> -> vector<8x32xf32>
    %c0_30 = arith.constant 0 : index
    %c8 = arith.constant 8 : index
    %37 = vector.load %arg51[%c0_30, %c8] : memref<8x96xf32, #tpu.memory_space<vmem>>, vector<8x8xf32>
    %c0_31 = arith.constant 0 : index
    %c40 = arith.constant 40 : index
    %38 = vector.load %arg51[%c0_31, %c40] : memref<8x96xf32, #tpu.memory_space<vmem>>, vector<8x8xf32>
    %c0_32 = arith.constant 0 : index
    %c72 = arith.constant 72 : index
    %39 = vector.load %arg51[%c0_32, %c72] : memref<8x96xf32, #tpu.memory_space<vmem>>, vector<8x8xf32>
    %cst_33 = arith.constant dense<0.000000e+00> : vector<8x8xf32>
    %40 = tpu.matmul %37, %38, %cst_33 {dimension_numbers = #tpu.dot_dimension_numbers<[1], [1], [0], [0], [0, 0, 1, 0], [], []>} : vector<8x8xf32>, vector<8x8xf32>, vector<8x8xf32> -> vector<8x8xf32>
    %cst_34 = arith.constant dense<0xFF800000> : vector<8xf32>
    %41 = vector.multi_reduction <maximumf>, %40, %cst_34 [1] : vector<8x8xf32> to vector<8xf32>
    %42 = vector.shape_cast %41 : vector<8xf32> to vector<8x1xf32>
    %43 = vector.broadcast %42 : vector<8x1xf32> to vector<8x8xf32>
    %44 = arith.subf %40, %43 : vector<8x8xf32>
    %45 = math.exp %44 : vector<8x8xf32>
    %cst_35 = arith.constant dense<0.000000e+00> : vector<8xf32>
    %46 = vector.multi_reduction <add>, %45, %cst_35 [1] : vector<8x8xf32> to vector<8xf32>
    %47 = vector.shape_cast %46 : vector<8xf32> to vector<8x1xf32>
    %48 = tpu.reciprocal %47 {approx = true} : vector<8x1xf32> -> vector<8x1xf32>
    %49 = vector.broadcast %48 : vector<8x1xf32> to vector<8x8xf32>
    %50 = arith.mulf %45, %49 : vector<8x8xf32>
    %cst_36 = arith.constant dense<0.000000e+00> : vector<8x8xf32>
    %51 = tpu.matmul %50, %39, %cst_36 {dimension_numbers = #tpu.dot_dimension_numbers<[1], [0], [0], [1], [0, 0, 1, 1], [], []>} : vector<8x8xf32>, vector<8x8xf32>, vector<8x8xf32> -> vector<8x8xf32>
    %c8_37 = arith.constant 8 : index
    %c0_38 = arith.constant 0 : index
    %52 = vector.load %arg35[%c8_37, %c0_38] : memref<32x32xf32, #tpu.memory_space<vmem>>, vector<8x32xf32>
    %cst_39 = arith.constant dense<0.000000e+00> : vector<8x32xf32>
    %53 = tpu.matmul %51, %52, %cst_39 {dimension_numbers = #tpu.dot_dimension_numbers<[1], [0], [0], [1], [0, 0, 1, 1], [], []>} : vector<8x8xf32>, vector<8x32xf32>, vector<8x32xf32> -> vector<8x32xf32>
    %54 = arith.addf %36, %53 : vector<8x32xf32>
    %c0_40 = arith.constant 0 : index
    %c16 = arith.constant 16 : index
    %55 = vector.load %arg51[%c0_40, %c16] : memref<8x96xf32, #tpu.memory_space<vmem>>, vector<8x8xf32>
    %c0_41 = arith.constant 0 : index
    %c48 = arith.constant 48 : index
    %56 = vector.load %arg51[%c0_41, %c48] : memref<8x96xf32, #tpu.memory_space<vmem>>, vector<8x8xf32>
    %c0_42 = arith.constant 0 : index
    %c80 = arith.constant 80 : index
    %57 = vector.load %arg51[%c0_42, %c80] : memref<8x96xf32, #tpu.memory_space<vmem>>, vector<8x8xf32>
    %cst_43 = arith.constant dense<0.000000e+00> : vector<8x8xf32>
    %58 = tpu.matmul %55, %56, %cst_43 {dimension_numbers = #tpu.dot_dimension_numbers<[1], [1], [0], [0], [0, 0, 1, 0], [], []>} : vector<8x8xf32>, vector<8x8xf32>, vector<8x8xf32> -> vector<8x8xf32>
    %cst_44 = arith.constant dense<0xFF800000> : vector<8xf32>
    %59 = vector.multi_reduction <maximumf>, %58, %cst_44 [1] : vector<8x8xf32> to vector<8xf32>
    %60 = vector.shape_cast %59 : vector<8xf32> to vector<8x1xf32>
    %61 = vector.broadcast %60 : vector<8x1xf32> to vector<8x8xf32>
    %62 = arith.subf %58, %61 : vector<8x8xf32>
    %63 = math.exp %62 : vector<8x8xf32>
    %cst_45 = arith.constant dense<0.000000e+00> : vector<8xf32>
    %64 = vector.multi_reduction <add>, %63, %cst_45 [1] : vector<8x8xf32> to vector<8xf32>
    %65 = vector.shape_cast %64 : vector<8xf32> to vector<8x1xf32>
    %66 = tpu.reciprocal %65 {approx = true} : vector<8x1xf32> -> vector<8x1xf32>
    %67 = vector.broadcast %66 : vector<8x1xf32> to vector<8x8xf32>
    %68 = arith.mulf %63, %67 : vector<8x8xf32>
    %cst_46 = arith.constant dense<0.000000e+00> : vector<8x8xf32>
    %69 = tpu.matmul %68, %57, %cst_46 {dimension_numbers = #tpu.dot_dimension_numbers<[1], [0], [0], [1], [0, 0, 1, 1], [], []>} : vector<8x8xf32>, vector<8x8xf32>, vector<8x8xf32> -> vector<8x8xf32>
    %c16_47 = arith.constant 16 : index
    %c0_48 = arith.constant 0 : index
    %70 = vector.load %arg35[%c16_47, %c0_48] : memref<32x32xf32, #tpu.memory_space<vmem>>, vector<8x32xf32>
    %cst_49 = arith.constant dense<0.000000e+00> : vector<8x32xf32>
    %71 = tpu.matmul %69, %70, %cst_49 {dimension_numbers = #tpu.dot_dimension_numbers<[1], [0], [0], [1], [0, 0, 1, 1], [], []>} : vector<8x8xf32>, vector<8x32xf32>, vector<8x32xf32> -> vector<8x32xf32>
    %72 = arith.addf %54, %71 : vector<8x32xf32>
    %c0_50 = arith.constant 0 : index
    %c24 = arith.constant 24 : index
    %73 = vector.load %arg51[%c0_50, %c24] : memref<8x96xf32, #tpu.memory_space<vmem>>, vector<8x8xf32>
    %c0_51 = arith.constant 0 : index
    %c56 = arith.constant 56 : index
    %74 = vector.load %arg51[%c0_51, %c56] : memref<8x96xf32, #tpu.memory_space<vmem>>, vector<8x8xf32>
    %c0_52 = arith.constant 0 : index
    %c88 = arith.constant 88 : index
    %75 = vector.load %arg51[%c0_52, %c88] : memref<8x96xf32, #tpu.memory_space<vmem>>, vector<8x8xf32>
    %cst_53 = arith.constant dense<0.000000e+00> : vector<8x8xf32>
    %76 = tpu.matmul %73, %74, %cst_53 {dimension_numbers = #tpu.dot_dimension_numbers<[1], [1], [0], [0], [0, 0, 1, 0], [], []>} : vector<8x8xf32>, vector<8x8xf32>, vector<8x8xf32> -> vector<8x8xf32>
    %cst_54 = arith.constant dense<0xFF800000> : vector<8xf32>
    %77 = vector.multi_reduction <maximumf>, %76, %cst_54 [1] : vector<8x8xf32> to vector<8xf32>
    %78 = vector.shape_cast %77 : vector<8xf32> to vector<8x1xf32>
    %79 = vector.broadcast %78 : vector<8x1xf32> to vector<8x8xf32>
    %80 = arith.subf %76, %79 : vector<8x8xf32>
    %81 = math.exp %80 : vector<8x8xf32>
    %cst_55 = arith.constant dense<0.000000e+00> : vector<8xf32>
    %82 = vector.multi_reduction <add>, %81, %cst_55 [1] : vector<8x8xf32> to vector<8xf32>
    %83 = vector.shape_cast %82 : vector<8xf32> to vector<8x1xf32>
    %84 = tpu.reciprocal %83 {approx = true} : vector<8x1xf32> -> vector<8x1xf32>
    %85 = vector.broadcast %84 : vector<8x1xf32> to vector<8x8xf32>
    %86 = arith.mulf %81, %85 : vector<8x8xf32>
    %cst_56 = arith.constant dense<0.000000e+00> : vector<8x8xf32>
    %87 = tpu.matmul %86, %75, %cst_56 {dimension_numbers = #tpu.dot_dimension_numbers<[1], [0], [0], [1], [0, 0, 1, 1], [], []>} : vector<8x8xf32>, vector<8x8xf32>, vector<8x8xf32> -> vector<8x8xf32>
    %c24_57 = arith.constant 24 : index
    %c0_58 = arith.constant 0 : index
    %88 = vector.load %arg35[%c24_57, %c0_58] : memref<32x32xf32, #tpu.memory_space<vmem>>, vector<8x32xf32>
    %cst_59 = arith.constant dense<0.000000e+00> : vector<8x32xf32>
    %89 = tpu.matmul %87, %88, %cst_59 {dimension_numbers = #tpu.dot_dimension_numbers<[1], [0], [0], [1], [0, 0, 1, 1], [], []>} : vector<8x8xf32>, vector<8x32xf32>, vector<8x32xf32> -> vector<8x32xf32>
    %90 = arith.addf %72, %89 : vector<8x32xf32>
    %c0_60 = arith.constant 0 : index
    %c0_61 = arith.constant 0 : index
    %91 = vector.load %arg34[%c0_60, %c0_61] : memref<1x32xf32, #tpu.memory_space<vmem>>, vector<1x32xf32>
    %92 = vector.broadcast %91 : vector<1x32xf32> to vector<8x32xf32>
    %93 = arith.addf %90, %92 : vector<8x32xf32>
    %94 = arith.addf %13, %93 : vector<8x32xf32>
    %c0_62 = arith.constant 0 : index
    %c0_63 = arith.constant 0 : index
    %95 = vector.load %arg31[%c0_62, %c0_63] : memref<1x32xf32, #tpu.memory_space<vmem>>, vector<1x32xf32>
    %c0_64 = arith.constant 0 : index
    %c0_65 = arith.constant 0 : index
    %96 = vector.load %arg30[%c0_64, %c0_65] : memref<1x32xf32, #tpu.memory_space<vmem>>, vector<1x32xf32>
    %cst_66 = arith.constant dense<0.000000e+00> : vector<8xf32>
    %97 = vector.multi_reduction <add>, %94, %cst_66 [1] : vector<8x32xf32> to vector<8xf32>
    %98 = vector.shape_cast %97 : vector<8xf32> to vector<8x1xf32>
    %cst_67 = arith.constant 3.200000e+01 : f32
    %99 = vector.broadcast %cst_67 : f32 to vector<8x1xf32>
    %100 = arith.divf %98, %99 : vector<8x1xf32>
    %101 = vector.broadcast %100 : vector<8x1xf32> to vector<8x32xf32>
    %102 = arith.subf %94, %101 : vector<8x32xf32>
    %103 = arith.mulf %102, %102 : vector<8x32xf32>
    %cst_68 = arith.constant dense<0.000000e+00> : vector<8xf32>
    %104 = vector.multi_reduction <add>, %103, %cst_68 [1] : vector<8x32xf32> to vector<8xf32>
    %105 = vector.shape_cast %104 : vector<8xf32> to vector<8x1xf32>
    %cst_69 = arith.constant 3.200000e+01 : f32
    %106 = vector.broadcast %cst_69 : f32 to vector<8x1xf32>
    %107 = arith.divf %105, %106 : vector<8x1xf32>
    %108 = vector.broadcast %100 : vector<8x1xf32> to vector<8x32xf32>
    %109 = arith.subf %94, %108 : vector<8x32xf32>
    %cst_70 = arith.constant 9.99999974E-6 : f32
    %110 = vector.broadcast %cst_70 : f32 to vector<8x1xf32>
    %111 = arith.addf %107, %110 : vector<8x1xf32>
    %112 = math.rsqrt %111 : vector<8x1xf32>
    %113 = vector.broadcast %112 : vector<8x1xf32> to vector<8x32xf32>
    %114 = arith.mulf %109, %113 : vector<8x32xf32>
    %115 = vector.broadcast %95 : vector<1x32xf32> to vector<8x32xf32>
    %116 = arith.mulf %114, %115 : vector<8x32xf32>
    %117 = vector.broadcast %96 : vector<1x32xf32> to vector<8x32xf32>
    %118 = arith.addf %116, %117 : vector<8x32xf32>
    %c0_71 = arith.constant 0 : index
    %c0_72 = arith.constant 0 : index
    %119 = vector.load %arg27[%c0_71, %c0_72] : memref<32x96xf32, #tpu.memory_space<vmem>>, vector<32x96xf32>
    %cst_73 = arith.constant dense<0.000000e+00> : vector<8x96xf32>
    %120 = tpu.matmul %118, %119, %cst_73 {dimension_numbers = #tpu.dot_dimension_numbers<[1], [0], [0], [1], [0, 0, 1, 1], [], []>} : vector<8x32xf32>, vector<32x96xf32>, vector<8x96xf32> -> vector<8x96xf32>
    %c0_74 = arith.constant 0 : index
    %c0_75 = arith.constant 0 : index
    %121 = vector.load %arg26[%c0_74, %c0_75] : memref<1x96xf32, #tpu.memory_space<vmem>>, vector<1x96xf32>
    %122 = vector.broadcast %121 : vector<1x96xf32> to vector<8x96xf32>
    %123 = arith.addf %120, %122 : vector<8x96xf32>
    %cst_76 = arith.constant 0.000000e+00 : f32
    %124 = vector.broadcast %cst_76 : f32 to vector<8x96xf32>
    %125 = arith.maximumf %123, %124 : vector<8x96xf32>
    %c0_77 = arith.constant 0 : index
    %c0_78 = arith.constant 0 : index
    %126 = vector.load %arg29[%c0_77, %c0_78] : memref<96x32xf32, #tpu.memory_space<vmem>>, vector<96x32xf32>
    %cst_79 = arith.constant dense<0.000000e+00> : vector<8x32xf32>
    %127 = tpu.matmul %125, %126, %cst_79 {dimension_numbers = #tpu.dot_dimension_numbers<[1], [0], [0], [1], [0, 0, 1, 1], [], []>} : vector<8x96xf32>, vector<96x32xf32>, vector<8x32xf32> -> vector<8x32xf32>
    %c0_80 = arith.constant 0 : index
    %c0_81 = arith.constant 0 : index
    %128 = vector.load %arg28[%c0_80, %c0_81] : memref<1x32xf32, #tpu.memory_space<vmem>>, vector<1x32xf32>
    %129 = vector.broadcast %128 : vector<1x32xf32> to vector<8x32xf32>
    %130 = arith.addf %127, %129 : vector<8x32xf32>
    %131 = arith.addf %118, %130 : vector<8x32xf32>
    %c0_82 = arith.constant 0 : index
    %c0_83 = arith.constant 0 : index
    %132 = vector.load %arg33[%c0_82, %c0_83] : memref<1x32xf32, #tpu.memory_space<vmem>>, vector<1x32xf32>
    %c0_84 = arith.constant 0 : index
    %c0_85 = arith.constant 0 : index
    %133 = vector.load %arg32[%c0_84, %c0_85] : memref<1x32xf32, #tpu.memory_space<vmem>>, vector<1x32xf32>
    %cst_86 = arith.constant dense<0.000000e+00> : vector<8xf32>
    %134 = vector.multi_reduction <add>, %131, %cst_86 [1] : vector<8x32xf32> to vector<8xf32>
    %135 = vector.shape_cast %134 : vector<8xf32> to vector<8x1xf32>
    %cst_87 = arith.constant 3.200000e+01 : f32
    %136 = vector.broadcast %cst_87 : f32 to vector<8x1xf32>
    %137 = arith.divf %135, %136 : vector<8x1xf32>
    %138 = vector.broadcast %137 : vector<8x1xf32> to vector<8x32xf32>
    %139 = arith.subf %131, %138 : vector<8x32xf32>
    %140 = arith.mulf %139, %139 : vector<8x32xf32>
    %cst_88 = arith.constant dense<0.000000e+00> : vector<8xf32>
    %141 = vector.multi_reduction <add>, %140, %cst_88 [1] : vector<8x32xf32> to vector<8xf32>
    %142 = vector.shape_cast %141 : vector<8xf32> to vector<8x1xf32>
    %cst_89 = arith.constant 3.200000e+01 : f32
    %143 = vector.broadcast %cst_89 : f32 to vector<8x1xf32>
    %144 = arith.divf %142, %143 : vector<8x1xf32>
    %145 = vector.broadcast %137 : vector<8x1xf32> to vector<8x32xf32>
    %146 = arith.subf %131, %145 : vector<8x32xf32>
    %cst_90 = arith.constant 9.99999974E-6 : f32
    %147 = vector.broadcast %cst_90 : f32 to vector<8x1xf32>
    %148 = arith.addf %144, %147 : vector<8x1xf32>
    %149 = math.rsqrt %148 : vector<8x1xf32>
    %150 = vector.broadcast %149 : vector<8x1xf32> to vector<8x32xf32>
    %151 = arith.mulf %146, %150 : vector<8x32xf32>
    %152 = vector.broadcast %132 : vector<1x32xf32> to vector<8x32xf32>
    %153 = arith.mulf %151, %152 : vector<8x32xf32>
    %154 = vector.broadcast %133 : vector<1x32xf32> to vector<8x32xf32>
    %155 = arith.addf %153, %154 : vector<8x32xf32>
    %c0_91 = arith.constant 0 : index
    %c0_92 = arith.constant 0 : index
    %156 = vector.load %arg25[%c0_91, %c0_92] : memref<1x32xf32, #tpu.memory_space<vmem>>, vector<1x32xf32>
    %c0_93 = arith.constant 0 : index
    %c0_94 = arith.constant 0 : index
    %157 = vector.load %arg24[%c0_93, %c0_94] : memref<1x32xf32, #tpu.memory_space<vmem>>, vector<1x32xf32>
    %cst_95 = arith.constant dense<0.000000e+00> : vector<8xf32>
    %158 = vector.multi_reduction <add>, %155, %cst_95 [1] : vector<8x32xf32> to vector<8xf32>
    %159 = vector.shape_cast %158 : vector<8xf32> to vector<8x1xf32>
    %cst_96 = arith.constant 3.200000e+01 : f32
    %160 = vector.broadcast %cst_96 : f32 to vector<8x1xf32>
    %161 = arith.divf %159, %160 : vector<8x1xf32>
    %162 = vector.broadcast %161 : vector<8x1xf32> to vector<8x32xf32>
    %163 = arith.subf %155, %162 : vector<8x32xf32>
    %164 = arith.mulf %163, %163 : vector<8x32xf32>
    %cst_97 = arith.constant dense<0.000000e+00> : vector<8xf32>
    %165 = vector.multi_reduction <add>, %164, %cst_97 [1] : vector<8x32xf32> to vector<8xf32>
    %166 = vector.shape_cast %165 : vector<8xf32> to vector<8x1xf32>
    %cst_98 = arith.constant 3.200000e+01 : f32
    %167 = vector.broadcast %cst_98 : f32 to vector<8x1xf32>
    %168 = arith.divf %166, %167 : vector<8x1xf32>
    %169 = vector.broadcast %161 : vector<8x1xf32> to vector<8x32xf32>
    %170 = arith.subf %155, %169 : vector<8x32xf32>
    %cst_99 = arith.constant 9.99999974E-6 : f32
    %171 = vector.broadcast %cst_99 : f32 to vector<8x1xf32>
    %172 = arith.addf %168, %171 : vector<8x1xf32>
    %173 = math.rsqrt %172 : vector<8x1xf32>
    %174 = vector.broadcast %173 : vector<8x1xf32> to vector<8x32xf32>
    %175 = arith.mulf %170, %174 : vector<8x32xf32>
    %176 = vector.broadcast %156 : vector<1x32xf32> to vector<8x32xf32>
    %177 = arith.mulf %175, %176 : vector<8x32xf32>
    %178 = vector.broadcast %157 : vector<1x32xf32> to vector<8x32xf32>
    %179 = arith.addf %177, %178 : vector<8x32xf32>
    %c0_100 = arith.constant 0 : index
    %c0_101 = arith.constant 0 : index
    %180 = vector.load %arg42[%c0_100, %c0_101] : memref<4x32xf32, #tpu.memory_space<vmem>>, vector<4x32xf32>
    %c0_102 = arith.constant 0 : index
    %c0_103 = arith.constant 0 : index
    %181 = vector.load %arg23[%c0_102, %c0_103] : memref<32x96xf32, #tpu.memory_space<vmem>>, vector<32x96xf32>
    %cst_104 = arith.constant dense<0.000000e+00> : vector<4x96xf32>
    %182 = tpu.matmul %180, %181, %cst_104 {dimension_numbers = #tpu.dot_dimension_numbers<[1], [0], [0], [1], [0, 0, 1, 1], [], []>} : vector<4x32xf32>, vector<32x96xf32>, vector<4x96xf32> -> vector<4x96xf32>
    %c0_105 = arith.constant 0 : index
    %c0_106 = arith.constant 0 : index
    %183 = vector.load %arg22[%c0_105, %c0_106] : memref<1x96xf32, #tpu.memory_space<vmem>>, vector<1x96xf32>
    %184 = vector.broadcast %183 : vector<1x96xf32> to vector<4x96xf32>
    %185 = arith.addf %182, %184 : vector<4x96xf32>
    %c0_107 = arith.constant 0 : index
    %c0_108 = arith.constant 0 : index
    %186 = vector.load %arg51[%c0_107, %c0_108] : memref<8x96xf32, #tpu.memory_space<vmem>>, vector<4x96xf32>
    tpu.vector_store %arg51[%c0_107, %c0_108], %185 {strides = array<i32>} : memref<8x96xf32, #tpu.memory_space<vmem>>, vector<4x96xf32>,
    %c0_109 = arith.constant 0 : index
    %c0_110 = arith.constant 0 : index
    %187 = vector.load %arg51[%c0_109, %c0_110] : memref<8x96xf32, #tpu.memory_space<vmem>>, vector<4x8xf32>
    %c0_111 = arith.constant 0 : index
    %c32_112 = arith.constant 32 : index
    %188 = vector.load %arg51[%c0_111, %c32_112] : memref<8x96xf32, #tpu.memory_space<vmem>>, vector<4x8xf32>
    %c0_113 = arith.constant 0 : index
    %c64_114 = arith.constant 64 : index
    %189 = vector.load %arg51[%c0_113, %c64_114] : memref<8x96xf32, #tpu.memory_space<vmem>>, vector<4x8xf32>
    %cst_115 = arith.constant dense<0.000000e+00> : vector<4x4xf32>
    %190 = tpu.matmul %187, %188, %cst_115 {dimension_numbers = #tpu.dot_dimension_numbers<[1], [1], [0], [0], [0, 0, 1, 0], [], []>} : vector<4x8xf32>, vector<4x8xf32>, vector<4x4xf32> -> vector<4x4xf32>
    %cst_116 = arith.constant dense<0xFF800000> : vector<4xf32>
    %191 = vector.multi_reduction <maximumf>, %190, %cst_116 [1] : vector<4x4xf32> to vector<4xf32>
    %192 = vector.shape_cast %191 : vector<4xf32> to vector<4x1xf32>
    %193 = vector.broadcast %192 : vector<4x1xf32> to vector<4x4xf32>
    %194 = arith.subf %190, %193 : vector<4x4xf32>
    %195 = math.exp %194 : vector<4x4xf32>
    %cst_117 = arith.constant dense<0.000000e+00> : vector<4xf32>
    %196 = vector.multi_reduction <add>, %195, %cst_117 [1] : vector<4x4xf32> to vector<4xf32>
    %197 = vector.shape_cast %196 : vector<4xf32> to vector<4x1xf32>
    %198 = tpu.reciprocal %197 {approx = true} : vector<4x1xf32> -> vector<4x1xf32>
    %199 = vector.broadcast %198 : vector<4x1xf32> to vector<4x4xf32>
    %200 = arith.mulf %195, %199 : vector<4x4xf32>
    %cst_118 = arith.constant dense<0.000000e+00> : vector<4x8xf32>
    %201 = tpu.matmul %200, %189, %cst_118 {dimension_numbers = #tpu.dot_dimension_numbers<[1], [0], [0], [1], [0, 0, 1, 1], [], []>} : vector<4x4xf32>, vector<4x8xf32>, vector<4x8xf32> -> vector<4x8xf32>
    %c0_119 = arith.constant 0 : index
    %c0_120 = arith.constant 0 : index
    %202 = vector.load %arg21[%c0_119, %c0_120] : memref<32x32xf32, #tpu.memory_space<vmem>>, vector<8x32xf32>
    %cst_121 = arith.constant dense<0.000000e+00> : vector<4x32xf32>
    %203 = tpu.matmul %201, %202, %cst_121 {dimension_numbers = #tpu.dot_dimension_numbers<[1], [0], [0], [1], [0, 0, 1, 1], [], []>} : vector<4x8xf32>, vector<8x32xf32>, vector<4x32xf32> -> vector<4x32xf32>
    %c0_122 = arith.constant 0 : index
    %c8_123 = arith.constant 8 : index
    %204 = vector.load %arg51[%c0_122, %c8_123] : memref<8x96xf32, #tpu.memory_space<vmem>>, vector<4x8xf32>
    %c0_124 = arith.constant 0 : index
    %c40_125 = arith.constant 40 : index
    %205 = vector.load %arg51[%c0_124, %c40_125] : memref<8x96xf32, #tpu.memory_space<vmem>>, vector<4x8xf32>
    %c0_126 = arith.constant 0 : index
    %c72_127 = arith.constant 72 : index
    %206 = vector.load %arg51[%c0_126, %c72_127] : memref<8x96xf32, #tpu.memory_space<vmem>>, vector<4x8xf32>
    %cst_128 = arith.constant dense<0.000000e+00> : vector<4x4xf32>
    %207 = tpu.matmul %204, %205, %cst_128 {dimension_numbers = #tpu.dot_dimension_numbers<[1], [1], [0], [0], [0, 0, 1, 0], [], []>} : vector<4x8xf32>, vector<4x8xf32>, vector<4x4xf32> -> vector<4x4xf32>
    %cst_129 = arith.constant dense<0xFF800000> : vector<4xf32>
    %208 = vector.multi_reduction <maximumf>, %207, %cst_129 [1] : vector<4x4xf32> to vector<4xf32>
    %209 = vector.shape_cast %208 : vector<4xf32> to vector<4x1xf32>
    %210 = vector.broadcast %209 : vector<4x1xf32> to vector<4x4xf32>
    %211 = arith.subf %207, %210 : vector<4x4xf32>
    %212 = math.exp %211 : vector<4x4xf32>
    %cst_130 = arith.constant dense<0.000000e+00> : vector<4xf32>
    %213 = vector.multi_reduction <add>, %212, %cst_130 [1] : vector<4x4xf32> to vector<4xf32>
    %214 = vector.shape_cast %213 : vector<4xf32> to vector<4x1xf32>
    %215 = tpu.reciprocal %214 {approx = true} : vector<4x1xf32> -> vector<4x1xf32>
    %216 = vector.broadcast %215 : vector<4x1xf32> to vector<4x4xf32>
    %217 = arith.mulf %212, %216 : vector<4x4xf32>
    %cst_131 = arith.constant dense<0.000000e+00> : vector<4x8xf32>
    %218 = tpu.matmul %217, %206, %cst_131 {dimension_numbers = #tpu.dot_dimension_numbers<[1], [0], [0], [1], [0, 0, 1, 1], [], []>} : vector<4x4xf32>, vector<4x8xf32>, vector<4x8xf32> -> vector<4x8xf32>
    %c8_132 = arith.constant 8 : index
    %c0_133 = arith.constant 0 : index
    %219 = vector.load %arg21[%c8_132, %c0_133] : memref<32x32xf32, #tpu.memory_space<vmem>>, vector<8x32xf32>
    %cst_134 = arith.constant dense<0.000000e+00> : vector<4x32xf32>
    %220 = tpu.matmul %218, %219, %cst_134 {dimension_numbers = #tpu.dot_dimension_numbers<[1], [0], [0], [1], [0, 0, 1, 1], [], []>} : vector<4x8xf32>, vector<8x32xf32>, vector<4x32xf32> -> vector<4x32xf32>
    %221 = arith.addf %203, %220 : vector<4x32xf32>
    %c0_135 = arith.constant 0 : index
    %c16_136 = arith.constant 16 : index
    %222 = vector.load %arg51[%c0_135, %c16_136] : memref<8x96xf32, #tpu.memory_space<vmem>>, vector<4x8xf32>
    %c0_137 = arith.constant 0 : index
    %c48_138 = arith.constant 48 : index
    %223 = vector.load %arg51[%c0_137, %c48_138] : memref<8x96xf32, #tpu.memory_space<vmem>>, vector<4x8xf32>
    %c0_139 = arith.constant 0 : index
    %c80_140 = arith.constant 80 : index
    %224 = vector.load %arg51[%c0_139, %c80_140] : memref<8x96xf32, #tpu.memory_space<vmem>>, vector<4x8xf32>
    %cst_141 = arith.constant dense<0.000000e+00> : vector<4x4xf32>
    %225 = tpu.matmul %222, %223, %cst_141 {dimension_numbers = #tpu.dot_dimension_numbers<[1], [1], [0], [0], [0, 0, 1, 0], [], []>} : vector<4x8xf32>, vector<4x8xf32>, vector<4x4xf32> -> vector<4x4xf32>
    %cst_142 = arith.constant dense<0xFF800000> : vector<4xf32>
    %226 = vector.multi_reduction <maximumf>, %225, %cst_142 [1] : vector<4x4xf32> to vector<4xf32>
    %227 = vector.shape_cast %226 : vector<4xf32> to vector<4x1xf32>
    %228 = vector.broadcast %227 : vector<4x1xf32> to vector<4x4xf32>
    %229 = arith.subf %225, %228 : vector<4x4xf32>
    %230 = math.exp %229 : vector<4x4xf32>
    %cst_143 = arith.constant dense<0.000000e+00> : vector<4xf32>
    %231 = vector.multi_reduction <add>, %230, %cst_143 [1] : vector<4x4xf32> to vector<4xf32>
    %232 = vector.shape_cast %231 : vector<4xf32> to vector<4x1xf32>
    %233 = tpu.reciprocal %232 {approx = true} : vector<4x1xf32> -> vector<4x1xf32>
    %234 = vector.broadcast %233 : vector<4x1xf32> to vector<4x4xf32>
    %235 = arith.mulf %230, %234 : vector<4x4xf32>
    %cst_144 = arith.constant dense<0.000000e+00> : vector<4x8xf32>
    %236 = tpu.matmul %235, %224, %cst_144 {dimension_numbers = #tpu.dot_dimension_numbers<[1], [0], [0], [1], [0, 0, 1, 1], [], []>} : vector<4x4xf32>, vector<4x8xf32>, vector<4x8xf32> -> vector<4x8xf32>
    %c16_145 = arith.constant 16 : index
    %c0_146 = arith.constant 0 : index
    %237 = vector.load %arg21[%c16_145, %c0_146] : memref<32x32xf32, #tpu.memory_space<vmem>>, vector<8x32xf32>
    %cst_147 = arith.constant dense<0.000000e+00> : vector<4x32xf32>
    %238 = tpu.matmul %236, %237, %cst_147 {dimension_numbers = #tpu.dot_dimension_numbers<[1], [0], [0], [1], [0, 0, 1, 1], [], []>} : vector<4x8xf32>, vector<8x32xf32>, vector<4x32xf32> -> vector<4x32xf32>
    %239 = arith.addf %221, %238 : vector<4x32xf32>
    %c0_148 = arith.constant 0 : index
    %c24_149 = arith.constant 24 : index
    %240 = vector.load %arg51[%c0_148, %c24_149] : memref<8x96xf32, #tpu.memory_space<vmem>>, vector<4x8xf32>
    %c0_150 = arith.constant 0 : index
    %c56_151 = arith.constant 56 : index
    %241 = vector.load %arg51[%c0_150, %c56_151] : memref<8x96xf32, #tpu.memory_space<vmem>>, vector<4x8xf32>
    %c0_152 = arith.constant 0 : index
    %c88_153 = arith.constant 88 : index
    %242 = vector.load %arg51[%c0_152, %c88_153] : memref<8x96xf32, #tpu.memory_space<vmem>>, vector<4x8xf32>
    %cst_154 = arith.constant dense<0.000000e+00> : vector<4x4xf32>
    %243 = tpu.matmul %240, %241, %cst_154 {dimension_numbers = #tpu.dot_dimension_numbers<[1], [1], [0], [0], [0, 0, 1, 0], [], []>} : vector<4x8xf32>, vector<4x8xf32>, vector<4x4xf32> -> vector<4x4xf32>
    %cst_155 = arith.constant dense<0xFF800000> : vector<4xf32>
    %244 = vector.multi_reduction <maximumf>, %243, %cst_155 [1] : vector<4x4xf32> to vector<4xf32>
    %245 = vector.shape_cast %244 : vector<4xf32> to vector<4x1xf32>
    %246 = vector.broadcast %245 : vector<4x1xf32> to vector<4x4xf32>
    %247 = arith.subf %243, %246 : vector<4x4xf32>
    %248 = math.exp %247 : vector<4x4xf32>
    %cst_156 = arith.constant dense<0.000000e+00> : vector<4xf32>
    %249 = vector.multi_reduction <add>, %248, %cst_156 [1] : vector<4x4xf32> to vector<4xf32>
    %250 = vector.shape_cast %249 : vector<4xf32> to vector<4x1xf32>
    %251 = tpu.reciprocal %250 {approx = true} : vector<4x1xf32> -> vector<4x1xf32>
    %252 = vector.broadcast %251 : vector<4x1xf32> to vector<4x4xf32>
    %253 = arith.mulf %248, %252 : vector<4x4xf32>
    %cst_157 = arith.constant dense<0.000000e+00> : vector<4x8xf32>
    %254 = tpu.matmul %253, %242, %cst_157 {dimension_numbers = #tpu.dot_dimension_numbers<[1], [0], [0], [1], [0, 0, 1, 1], [], []>} : vector<4x4xf32>, vector<4x8xf32>, vector<4x8xf32> -> vector<4x8xf32>
    %c24_158 = arith.constant 24 : index
    %c0_159 = arith.constant 0 : index
    %255 = vector.load %arg21[%c24_158, %c0_159] : memref<32x32xf32, #tpu.memory_space<vmem>>, vector<8x32xf32>
    %cst_160 = arith.constant dense<0.000000e+00> : vector<4x32xf32>
    %256 = tpu.matmul %254, %255, %cst_160 {dimension_numbers = #tpu.dot_dimension_numbers<[1], [0], [0], [1], [0, 0, 1, 1], [], []>} : vector<4x8xf32>, vector<8x32xf32>, vector<4x32xf32> -> vector<4x32xf32>
    %257 = arith.addf %239, %256 : vector<4x32xf32>
    %c0_161 = arith.constant 0 : index
    %c0_162 = arith.constant 0 : index
    %258 = vector.load %arg20[%c0_161, %c0_162] : memref<1x32xf32, #tpu.memory_space<vmem>>, vector<1x32xf32>
    %259 = vector.broadcast %258 : vector<1x32xf32> to vector<4x32xf32>
    %260 = arith.addf %257, %259 : vector<4x32xf32>
    %261 = arith.addf %180, %260 : vector<4x32xf32>
    %c0_163 = arith.constant 0 : index
    %c0_164 = arith.constant 0 : index
    %262 = vector.load %arg15[%c0_163, %c0_164] : memref<1x32xf32, #tpu.memory_space<vmem>>, vector<1x32xf32>
    %c0_165 = arith.constant 0 : index
    %c0_166 = arith.constant 0 : index
    %263 = vector.load %arg14[%c0_165, %c0_166] : memref<1x32xf32, #tpu.memory_space<vmem>>, vector<1x32xf32>
    %cst_167 = arith.constant dense<0.000000e+00> : vector<4xf32>
    %264 = vector.multi_reduction <add>, %261, %cst_167 [1] : vector<4x32xf32> to vector<4xf32>
    %265 = vector.shape_cast %264 : vector<4xf32> to vector<4x1xf32>
    %cst_168 = arith.constant 3.200000e+01 : f32
    %266 = vector.broadcast %cst_168 : f32 to vector<4x1xf32>
    %267 = arith.divf %265, %266 : vector<4x1xf32>
    %268 = vector.broadcast %267 : vector<4x1xf32> to vector<4x32xf32>
    %269 = arith.subf %261, %268 : vector<4x32xf32>
    %270 = arith.mulf %269, %269 : vector<4x32xf32>
    %cst_169 = arith.constant dense<0.000000e+00> : vector<4xf32>
    %271 = vector.multi_reduction <add>, %270, %cst_169 [1] : vector<4x32xf32> to vector<4xf32>
    %272 = vector.shape_cast %271 : vector<4xf32> to vector<4x1xf32>
    %cst_170 = arith.constant 3.200000e+01 : f32
    %273 = vector.broadcast %cst_170 : f32 to vector<4x1xf32>
    %274 = arith.divf %272, %273 : vector<4x1xf32>
    %275 = vector.broadcast %267 : vector<4x1xf32> to vector<4x32xf32>
    %276 = arith.subf %261, %275 : vector<4x32xf32>
    %cst_171 = arith.constant 9.99999974E-6 : f32
    %277 = vector.broadcast %cst_171 : f32 to vector<4x1xf32>
    %278 = arith.addf %274, %277 : vector<4x1xf32>
    %279 = math.rsqrt %278 : vector<4x1xf32>
    %280 = vector.broadcast %279 : vector<4x1xf32> to vector<4x32xf32>
    %281 = arith.mulf %276, %280 : vector<4x32xf32>
    %282 = vector.broadcast %262 : vector<1x32xf32> to vector<4x32xf32>
    %283 = arith.mulf %281, %282 : vector<4x32xf32>
    %284 = vector.broadcast %263 : vector<1x32xf32> to vector<4x32xf32>
    %285 = arith.addf %283, %284 : vector<4x32xf32>
    %c0_172 = arith.constant 0 : index
    %c0_173 = arith.constant 0 : index
    %286 = vector.load %arg9[%c0_172, %c0_173] : memref<32x32xf32, #tpu.memory_space<vmem>>, vector<32x32xf32>
    %cst_174 = arith.constant dense<0.000000e+00> : vector<4x32xf32>
    %287 = tpu.matmul %285, %286, %cst_174 {dimension_numbers = #tpu.dot_dimension_numbers<[1], [0], [0], [1], [0, 0, 1, 1], [], []>} : vector<4x32xf32>, vector<32x32xf32>, vector<4x32xf32> -> vector<4x32xf32>
    %c0_175 = arith.constant 0 : index
    %c0_176 = arith.constant 0 : index
    %288 = vector.load %arg8[%c0_175, %c0_176] : memref<1x32xf32, #tpu.memory_space<vmem>>, vector<1x32xf32>
    %289 = vector.broadcast %288 : vector<1x32xf32> to vector<4x32xf32>
    %290 = arith.addf %287, %289 : vector<4x32xf32>
    %c0_177 = arith.constant 0 : index
    %c0_178 = arith.constant 0 : index
    %291 = vector.load %arg51[%c0_177, %c0_178] : memref<8x96xf32, #tpu.memory_space<vmem>>, vector<4x32xf32>
    tpu.vector_store %arg51[%c0_177, %c0_178], %290 {strides = array<i32>} : memref<8x96xf32, #tpu.memory_space<vmem>>, vector<4x32xf32>,
    %c0_179 = arith.constant 0 : index
    %c0_180 = arith.constant 0 : index
    %292 = vector.load %arg5[%c0_179, %c0_180] : memref<32x64xf32, #tpu.memory_space<vmem>>, vector<32x64xf32>
    %cst_181 = arith.constant dense<0.000000e+00> : vector<8x64xf32>
    %293 = tpu.matmul %179, %292, %cst_181 {dimension_numbers = #tpu.dot_dimension_numbers<[1], [0], [0], [1], [0, 0, 1, 1], [], []>} : vector<8x32xf32>, vector<32x64xf32>, vector<8x64xf32> -> vector<8x64xf32>
    %c0_182 = arith.constant 0 : index
    %c0_183 = arith.constant 0 : index
    %294 = vector.load %arg4[%c0_182, %c0_183] : memref<1x64xf32, #tpu.memory_space<vmem>>, vector<1x64xf32>
    %295 = vector.broadcast %294 : vector<1x64xf32> to vector<8x64xf32>
    %296 = arith.addf %293, %295 : vector<8x64xf32>
    %c0_184 = arith.constant 0 : index
    %c32_185 = arith.constant 32 : index
    %297 = vector.load %arg51[%c0_184, %c32_185] : memref<8x96xf32, #tpu.memory_space<vmem>>, vector<8x64xf32>
    tpu.vector_store %arg51[%c0_184, %c32_185], %296 {strides = array<i32>} : memref<8x96xf32, #tpu.memory_space<vmem>>, vector<8x64xf32>,
    %c0_186 = arith.constant 0 : index
    %c0_187 = arith.constant 0 : index
    %298 = vector.load %arg51[%c0_186, %c0_187] : memref<8x96xf32, #tpu.memory_space<vmem>>, vector<4x8xf32>
    %c0_188 = arith.constant 0 : index
    %c32_189 = arith.constant 32 : index
    %299 = vector.load %arg51[%c0_188, %c32_189] : memref<8x96xf32, #tpu.memory_space<vmem>>, vector<8x8xf32>
    %c0_190 = arith.constant 0 : index
    %c64_191 = arith.constant 64 : index
    %300 = vector.load %arg51[%c0_190, %c64_191] : memref<8x96xf32, #tpu.memory_space<vmem>>, vector<8x8xf32>
    %cst_192 = arith.constant dense<0.000000e+00> : vector<4x8xf32>
    %301 = tpu.matmul %298, %299, %cst_192 {dimension_numbers = #tpu.dot_dimension_numbers<[1], [1], [0], [0], [0, 0, 1, 0], [], []>} : vector<4x8xf32>, vector<8x8xf32>, vector<4x8xf32> -> vector<4x8xf32>
    %cst_193 = arith.constant dense<0xFF800000> : vector<4xf32>
    %302 = vector.multi_reduction <maximumf>, %301, %cst_193 [1] : vector<4x8xf32> to vector<4xf32>
    %303 = vector.shape_cast %302 : vector<4xf32> to vector<4x1xf32>
    %304 = vector.broadcast %303 : vector<4x1xf32> to vector<4x8xf32>
    %305 = arith.subf %301, %304 : vector<4x8xf32>
    %306 = math.exp %305 : vector<4x8xf32>
    %cst_194 = arith.constant dense<0.000000e+00> : vector<4xf32>
    %307 = vector.multi_reduction <add>, %306, %cst_194 [1] : vector<4x8xf32> to vector<4xf32>
    %308 = vector.shape_cast %307 : vector<4xf32> to vector<4x1xf32>
    %309 = tpu.reciprocal %308 {approx = true} : vector<4x1xf32> -> vector<4x1xf32>
    %310 = vector.broadcast %309 : vector<4x1xf32> to vector<4x8xf32>
    %311 = arith.mulf %306, %310 : vector<4x8xf32>
    %cst_195 = arith.constant dense<0.000000e+00> : vector<4x8xf32>
    %312 = tpu.matmul %311, %300, %cst_195 {dimension_numbers = #tpu.dot_dimension_numbers<[1], [0], [0], [1], [0, 0, 1, 1], [], []>} : vector<4x8xf32>, vector<8x8xf32>, vector<4x8xf32> -> vector<4x8xf32>
    %c0_196 = arith.constant 0 : index
    %c0_197 = arith.constant 0 : index
    %313 = vector.load %arg7[%c0_196, %c0_197] : memref<32x32xf32, #tpu.memory_space<vmem>>, vector<8x32xf32>
    %cst_198 = arith.constant dense<0.000000e+00> : vector<4x32xf32>
    %314 = tpu.matmul %312, %313, %cst_198 {dimension_numbers = #tpu.dot_dimension_numbers<[1], [0], [0], [1], [0, 0, 1, 1], [], []>} : vector<4x8xf32>, vector<8x32xf32>, vector<4x32xf32> -> vector<4x32xf32>
    %c0_199 = arith.constant 0 : index
    %c8_200 = arith.constant 8 : index
    %315 = vector.load %arg51[%c0_199, %c8_200] : memref<8x96xf32, #tpu.memory_space<vmem>>, vector<4x8xf32>
    %c0_201 = arith.constant 0 : index
    %c40_202 = arith.constant 40 : index
    %316 = vector.load %arg51[%c0_201, %c40_202] : memref<8x96xf32, #tpu.memory_space<vmem>>, vector<8x8xf32>
    %c0_203 = arith.constant 0 : index
    %c72_204 = arith.constant 72 : index
    %317 = vector.load %arg51[%c0_203, %c72_204] : memref<8x96xf32, #tpu.memory_space<vmem>>, vector<8x8xf32>
    %cst_205 = arith.constant dense<0.000000e+00> : vector<4x8xf32>
    %318 = tpu.matmul %315, %316, %cst_205 {dimension_numbers = #tpu.dot_dimension_numbers<[1], [1], [0], [0], [0, 0, 1, 0], [], []>} : vector<4x8xf32>, vector<8x8xf32>, vector<4x8xf32> -> vector<4x8xf32>
    %cst_206 = arith.constant dense<0xFF800000> : vector<4xf32>
    %319 = vector.multi_reduction <maximumf>, %318, %cst_206 [1] : vector<4x8xf32> to vector<4xf32>
    %320 = vector.shape_cast %319 : vector<4xf32> to vector<4x1xf32>
    %321 = vector.broadcast %320 : vector<4x1xf32> to vector<4x8xf32>
    %322 = arith.subf %318, %321 : vector<4x8xf32>
    %323 = math.exp %322 : vector<4x8xf32>
    %cst_207 = arith.constant dense<0.000000e+00> : vector<4xf32>
    %324 = vector.multi_reduction <add>, %323, %cst_207 [1] : vector<4x8xf32> to vector<4xf32>
    %325 = vector.shape_cast %324 : vector<4xf32> to vector<4x1xf32>
    %326 = tpu.reciprocal %325 {approx = true} : vector<4x1xf32> -> vector<4x1xf32>
    %327 = vector.broadcast %326 : vector<4x1xf32> to vector<4x8xf32>
    %328 = arith.mulf %323, %327 : vector<4x8xf32>
    %cst_208 = arith.constant dense<0.000000e+00> : vector<4x8xf32>
    %329 = tpu.matmul %328, %317, %cst_208 {dimension_numbers = #tpu.dot_dimension_numbers<[1], [0], [0], [1], [0, 0, 1, 1], [], []>} : vector<4x8xf32>, vector<8x8xf32>, vector<4x8xf32> -> vector<4x8xf32>
    %c8_209 = arith.constant 8 : index
    %c0_210 = arith.constant 0 : index
    %330 = vector.load %arg7[%c8_209, %c0_210] : memref<32x32xf32, #tpu.memory_space<vmem>>, vector<8x32xf32>
    %cst_211 = arith.constant dense<0.000000e+00> : vector<4x32xf32>
    %331 = tpu.matmul %329, %330, %cst_211 {dimension_numbers = #tpu.dot_dimension_numbers<[1], [0], [0], [1], [0, 0, 1, 1], [], []>} : vector<4x8xf32>, vector<8x32xf32>, vector<4x32xf32> -> vector<4x32xf32>
    %332 = arith.addf %314, %331 : vector<4x32xf32>
    %c0_212 = arith.constant 0 : index
    %c16_213 = arith.constant 16 : index
    %333 = vector.load %arg51[%c0_212, %c16_213] : memref<8x96xf32, #tpu.memory_space<vmem>>, vector<4x8xf32>
    %c0_214 = arith.constant 0 : index
    %c48_215 = arith.constant 48 : index
    %334 = vector.load %arg51[%c0_214, %c48_215] : memref<8x96xf32, #tpu.memory_space<vmem>>, vector<8x8xf32>
    %c0_216 = arith.constant 0 : index
    %c80_217 = arith.constant 80 : index
    %335 = vector.load %arg51[%c0_216, %c80_217] : memref<8x96xf32, #tpu.memory_space<vmem>>, vector<8x8xf32>
    %cst_218 = arith.constant dense<0.000000e+00> : vector<4x8xf32>
    %336 = tpu.matmul %333, %334, %cst_218 {dimension_numbers = #tpu.dot_dimension_numbers<[1], [1], [0], [0], [0, 0, 1, 0], [], []>} : vector<4x8xf32>, vector<8x8xf32>, vector<4x8xf32> -> vector<4x8xf32>
    %cst_219 = arith.constant dense<0xFF800000> : vector<4xf32>
    %337 = vector.multi_reduction <maximumf>, %336, %cst_219 [1] : vector<4x8xf32> to vector<4xf32>
    %338 = vector.shape_cast %337 : vector<4xf32> to vector<4x1xf32>
    %339 = vector.broadcast %338 : vector<4x1xf32> to vector<4x8xf32>
    %340 = arith.subf %336, %339 : vector<4x8xf32>
    %341 = math.exp %340 : vector<4x8xf32>
    %cst_220 = arith.constant dense<0.000000e+00> : vector<4xf32>
    %342 = vector.multi_reduction <add>, %341, %cst_220 [1] : vector<4x8xf32> to vector<4xf32>
    %343 = vector.shape_cast %342 : vector<4xf32> to vector<4x1xf32>
    %344 = tpu.reciprocal %343 {approx = true} : vector<4x1xf32> -> vector<4x1xf32>
    %345 = vector.broadcast %344 : vector<4x1xf32> to vector<4x8xf32>
    %346 = arith.mulf %341, %345 : vector<4x8xf32>
    %cst_221 = arith.constant dense<0.000000e+00> : vector<4x8xf32>
    %347 = tpu.matmul %346, %335, %cst_221 {dimension_numbers = #tpu.dot_dimension_numbers<[1], [0], [0], [1], [0, 0, 1, 1], [], []>} : vector<4x8xf32>, vector<8x8xf32>, vector<4x8xf32> -> vector<4x8xf32>
    %c16_222 = arith.constant 16 : index
    %c0_223 = arith.constant 0 : index
    %348 = vector.load %arg7[%c16_222, %c0_223] : memref<32x32xf32, #tpu.memory_space<vmem>>, vector<8x32xf32>
    %cst_224 = arith.constant dense<0.000000e+00> : vector<4x32xf32>
    %349 = tpu.matmul %347, %348, %cst_224 {dimension_numbers = #tpu.dot_dimension_numbers<[1], [0], [0], [1], [0, 0, 1, 1], [], []>} : vector<4x8xf32>, vector<8x32xf32>, vector<4x32xf32> -> vector<4x32xf32>
    %350 = arith.addf %332, %349 : vector<4x32xf32>
    %c0_225 = arith.constant 0 : index
    %c24_226 = arith.constant 24 : index
    %351 = vector.load %arg51[%c0_225, %c24_226] : memref<8x96xf32, #tpu.memory_space<vmem>>, vector<4x8xf32>
    %c0_227 = arith.constant 0 : index
    %c56_228 = arith.constant 56 : index
    %352 = vector.load %arg51[%c0_227, %c56_228] : memref<8x96xf32, #tpu.memory_space<vmem>>, vector<8x8xf32>
    %c0_229 = arith.constant 0 : index
    %c88_230 = arith.constant 88 : index
    %353 = vector.load %arg51[%c0_229, %c88_230] : memref<8x96xf32, #tpu.memory_space<vmem>>, vector<8x8xf32>
    %cst_231 = arith.constant dense<0.000000e+00> : vector<4x8xf32>
    %354 = tpu.matmul %351, %352, %cst_231 {dimension_numbers = #tpu.dot_dimension_numbers<[1], [1], [0], [0], [0, 0, 1, 0], [], []>} : vector<4x8xf32>, vector<8x8xf32>, vector<4x8xf32> -> vector<4x8xf32>
    %cst_232 = arith.constant dense<0xFF800000> : vector<4xf32>
    %355 = vector.multi_reduction <maximumf>, %354, %cst_232 [1] : vector<4x8xf32> to vector<4xf32>
    %356 = vector.shape_cast %355 : vector<4xf32> to vector<4x1xf32>
    %357 = vector.broadcast %356 : vector<4x1xf32> to vector<4x8xf32>
    %358 = arith.subf %354, %357 : vector<4x8xf32>
    %359 = math.exp %358 : vector<4x8xf32>
    %cst_233 = arith.constant dense<0.000000e+00> : vector<4xf32>
    %360 = vector.multi_reduction <add>, %359, %cst_233 [1] : vector<4x8xf32> to vector<4xf32>
    %361 = vector.shape_cast %360 : vector<4xf32> to vector<4x1xf32>
    %362 = tpu.reciprocal %361 {approx = true} : vector<4x1xf32> -> vector<4x1xf32>
    %363 = vector.broadcast %362 : vector<4x1xf32> to vector<4x8xf32>
    %364 = arith.mulf %359, %363 : vector<4x8xf32>
    %cst_234 = arith.constant dense<0.000000e+00> : vector<4x8xf32>
    %365 = tpu.matmul %364, %353, %cst_234 {dimension_numbers = #tpu.dot_dimension_numbers<[1], [0], [0], [1], [0, 0, 1, 1], [], []>} : vector<4x8xf32>, vector<8x8xf32>, vector<4x8xf32> -> vector<4x8xf32>
    %c24_235 = arith.constant 24 : index
    %c0_236 = arith.constant 0 : index
    %366 = vector.load %arg7[%c24_235, %c0_236] : memref<32x32xf32, #tpu.memory_space<vmem>>, vector<8x32xf32>
    %cst_237 = arith.constant dense<0.000000e+00> : vector<4x32xf32>
    %367 = tpu.matmul %365, %366, %cst_237 {dimension_numbers = #tpu.dot_dimension_numbers<[1], [0], [0], [1], [0, 0, 1, 1], [], []>} : vector<4x8xf32>, vector<8x32xf32>, vector<4x32xf32> -> vector<4x32xf32>
    %368 = arith.addf %350, %367 : vector<4x32xf32>
    %c0_238 = arith.constant 0 : index
    %c0_239 = arith.constant 0 : index
    %369 = vector.load %arg6[%c0_238, %c0_239] : memref<1x32xf32, #tpu.memory_space<vmem>>, vector<1x32xf32>
    %370 = vector.broadcast %369 : vector<1x32xf32> to vector<4x32xf32>
    %371 = arith.addf %368, %370 : vector<4x32xf32>
    %372 = arith.addf %285, %371 : vector<4x32xf32>
    %c0_240 = arith.constant 0 : index
    %c0_241 = arith.constant 0 : index
    %373 = vector.load %arg17[%c0_240, %c0_241] : memref<1x32xf32, #tpu.memory_space<vmem>>, vector<1x32xf32>
    %c0_242 = arith.constant 0 : index
    %c0_243 = arith.constant 0 : index
    %374 = vector.load %arg16[%c0_242, %c0_243] : memref<1x32xf32, #tpu.memory_space<vmem>>, vector<1x32xf32>
    %cst_244 = arith.constant dense<0.000000e+00> : vector<4xf32>
    %375 = vector.multi_reduction <add>, %372, %cst_244 [1] : vector<4x32xf32> to vector<4xf32>
    %376 = vector.shape_cast %375 : vector<4xf32> to vector<4x1xf32>
    %cst_245 = arith.constant 3.200000e+01 : f32
    %377 = vector.broadcast %cst_245 : f32 to vector<4x1xf32>
    %378 = arith.divf %376, %377 : vector<4x1xf32>
    %379 = vector.broadcast %378 : vector<4x1xf32> to vector<4x32xf32>
    %380 = arith.subf %372, %379 : vector<4x32xf32>
    %381 = arith.mulf %380, %380 : vector<4x32xf32>
    %cst_246 = arith.constant dense<0.000000e+00> : vector<4xf32>
    %382 = vector.multi_reduction <add>, %381, %cst_246 [1] : vector<4x32xf32> to vector<4xf32>
    %383 = vector.shape_cast %382 : vector<4xf32> to vector<4x1xf32>
    %cst_247 = arith.constant 3.200000e+01 : f32
    %384 = vector.broadcast %cst_247 : f32 to vector<4x1xf32>
    %385 = arith.divf %383, %384 : vector<4x1xf32>
    %386 = vector.broadcast %378 : vector<4x1xf32> to vector<4x32xf32>
    %387 = arith.subf %372, %386 : vector<4x32xf32>
    %cst_248 = arith.constant 9.99999974E-6 : f32
    %388 = vector.broadcast %cst_248 : f32 to vector<4x1xf32>
    %389 = arith.addf %385, %388 : vector<4x1xf32>
    %390 = math.rsqrt %389 : vector<4x1xf32>
    %391 = vector.broadcast %390 : vector<4x1xf32> to vector<4x32xf32>
    %392 = arith.mulf %387, %391 : vector<4x32xf32>
    %393 = vector.broadcast %373 : vector<1x32xf32> to vector<4x32xf32>
    %394 = arith.mulf %392, %393 : vector<4x32xf32>
    %395 = vector.broadcast %374 : vector<1x32xf32> to vector<4x32xf32>
    %396 = arith.addf %394, %395 : vector<4x32xf32>
    %c0_249 = arith.constant 0 : index
    %c0_250 = arith.constant 0 : index
    %397 = vector.load %arg11[%c0_249, %c0_250] : memref<32x96xf32, #tpu.memory_space<vmem>>, vector<32x96xf32>
    %cst_251 = arith.constant dense<0.000000e+00> : vector<4x96xf32>
    %398 = tpu.matmul %396, %397, %cst_251 {dimension_numbers = #tpu.dot_dimension_numbers<[1], [0], [0], [1], [0, 0, 1, 1], [], []>} : vector<4x32xf32>, vector<32x96xf32>, vector<4x96xf32> -> vector<4x96xf32>
    %c0_252 = arith.constant 0 : index
    %c0_253 = arith.constant 0 : index
    %399 = vector.load %arg10[%c0_252, %c0_253] : memref<1x96xf32, #tpu.memory_space<vmem>>, vector<1x96xf32>
    %400 = vector.broadcast %399 : vector<1x96xf32> to vector<4x96xf32>
    %401 = arith.addf %398, %400 : vector<4x96xf32>
    %cst_254 = arith.constant 0.000000e+00 : f32
    %402 = vector.broadcast %cst_254 : f32 to vector<4x96xf32>
    %403 = arith.maximumf %401, %402 : vector<4x96xf32>
    %c0_255 = arith.constant 0 : index
    %c0_256 = arith.constant 0 : index
    %404 = vector.load %arg13[%c0_255, %c0_256] : memref<96x32xf32, #tpu.memory_space<vmem>>, vector<96x32xf32>
    %cst_257 = arith.constant dense<0.000000e+00> : vector<4x32xf32>
    %405 = tpu.matmul %403, %404, %cst_257 {dimension_numbers = #tpu.dot_dimension_numbers<[1], [0], [0], [1], [0, 0, 1, 1], [], []>} : vector<4x96xf32>, vector<96x32xf32>, vector<4x32xf32> -> vector<4x32xf32>
    %c0_258 = arith.constant 0 : index
    %c0_259 = arith.constant 0 : index
    %406 = vector.load %arg12[%c0_258, %c0_259] : memref<1x32xf32, #tpu.memory_space<vmem>>, vector<1x32xf32>
    %407 = vector.broadcast %406 : vector<1x32xf32> to vector<4x32xf32>
    %408 = arith.addf %405, %407 : vector<4x32xf32>
    %409 = arith.addf %396, %408 : vector<4x32xf32>
    %c0_260 = arith.constant 0 : index
    %c0_261 = arith.constant 0 : index
    %410 = vector.load %arg19[%c0_260, %c0_261] : memref<1x32xf32, #tpu.memory_space<vmem>>, vector<1x32xf32>
    %c0_262 = arith.constant 0 : index
    %c0_263 = arith.constant 0 : index
    %411 = vector.load %arg18[%c0_262, %c0_263] : memref<1x32xf32, #tpu.memory_space<vmem>>, vector<1x32xf32>
    %cst_264 = arith.constant dense<0.000000e+00> : vector<4xf32>
    %412 = vector.multi_reduction <add>, %409, %cst_264 [1] : vector<4x32xf32> to vector<4xf32>
    %413 = vector.shape_cast %412 : vector<4xf32> to vector<4x1xf32>
    %cst_265 = arith.constant 3.200000e+01 : f32
    %414 = vector.broadcast %cst_265 : f32 to vector<4x1xf32>
    %415 = arith.divf %413, %414 : vector<4x1xf32>
    %416 = vector.broadcast %415 : vector<4x1xf32> to vector<4x32xf32>
    %417 = arith.subf %409, %416 : vector<4x32xf32>
    %418 = arith.mulf %417, %417 : vector<4x32xf32>
    %cst_266 = arith.constant dense<0.000000e+00> : vector<4xf32>
    %419 = vector.multi_reduction <add>, %418, %cst_266 [1] : vector<4x32xf32> to vector<4xf32>
    %420 = vector.shape_cast %419 : vector<4xf32> to vector<4x1xf32>
    %cst_267 = arith.constant 3.200000e+01 : f32
    %421 = vector.broadcast %cst_267 : f32 to vector<4x1xf32>
    %422 = arith.divf %420, %421 : vector<4x1xf32>
    %423 = vector.broadcast %415 : vector<4x1xf32> to vector<4x32xf32>
    %424 = arith.subf %409, %423 : vector<4x32xf32>
    %cst_268 = arith.constant 9.99999974E-6 : f32
    %425 = vector.broadcast %cst_268 : f32 to vector<4x1xf32>
    %426 = arith.addf %422, %425 : vector<4x1xf32>
    %427 = math.rsqrt %426 : vector<4x1xf32>
    %428 = vector.broadcast %427 : vector<4x1xf32> to vector<4x32xf32>
    %429 = arith.mulf %424, %428 : vector<4x32xf32>
    %430 = vector.broadcast %410 : vector<1x32xf32> to vector<4x32xf32>
    %431 = arith.mulf %429, %430 : vector<4x32xf32>
    %432 = vector.broadcast %411 : vector<1x32xf32> to vector<4x32xf32>
    %433 = arith.addf %431, %432 : vector<4x32xf32>
    %c0_269 = arith.constant 0 : index
    %c0_270 = arith.constant 0 : index
    %434 = vector.load %arg3[%c0_269, %c0_270] : memref<1x32xf32, #tpu.memory_space<vmem>>, vector<1x32xf32>
    %c0_271 = arith.constant 0 : index
    %c0_272 = arith.constant 0 : index
    %435 = vector.load %arg2[%c0_271, %c0_272] : memref<1x32xf32, #tpu.memory_space<vmem>>, vector<1x32xf32>
    %cst_273 = arith.constant dense<0.000000e+00> : vector<4xf32>
    %436 = vector.multi_reduction <add>, %433, %cst_273 [1] : vector<4x32xf32> to vector<4xf32>
    %437 = vector.shape_cast %436 : vector<4xf32> to vector<4x1xf32>
    %cst_274 = arith.constant 3.200000e+01 : f32
    %438 = vector.broadcast %cst_274 : f32 to vector<4x1xf32>
    %439 = arith.divf %437, %438 : vector<4x1xf32>
    %440 = vector.broadcast %439 : vector<4x1xf32> to vector<4x32xf32>
    %441 = arith.subf %433, %440 : vector<4x32xf32>
    %442 = arith.mulf %441, %441 : vector<4x32xf32>
    %cst_275 = arith.constant dense<0.000000e+00> : vector<4xf32>
    %443 = vector.multi_reduction <add>, %442, %cst_275 [1] : vector<4x32xf32> to vector<4xf32>
    %444 = vector.shape_cast %443 : vector<4xf32> to vector<4x1xf32>
    %cst_276 = arith.constant 3.200000e+01 : f32
    %445 = vector.broadcast %cst_276 : f32 to vector<4x1xf32>
    %446 = arith.divf %444, %445 : vector<4x1xf32>
    %447 = vector.broadcast %439 : vector<4x1xf32> to vector<4x32xf32>
    %448 = arith.subf %433, %447 : vector<4x32xf32>
    %cst_277 = arith.constant 9.99999974E-6 : f32
    %449 = vector.broadcast %cst_277 : f32 to vector<4x1xf32>
    %450 = arith.addf %446, %449 : vector<4x1xf32>
    %451 = math.rsqrt %450 : vector<4x1xf32>
    %452 = vector.broadcast %451 : vector<4x1xf32> to vector<4x32xf32>
    %453 = arith.mulf %448, %452 : vector<4x32xf32>
    %454 = vector.broadcast %434 : vector<1x32xf32> to vector<4x32xf32>
    %455 = arith.mulf %453, %454 : vector<4x32xf32>
    %456 = vector.broadcast %435 : vector<1x32xf32> to vector<4x32xf32>
    %457 = arith.addf %455, %456 : vector<4x32xf32>
    %c0_278 = arith.constant 0 : index
    %c0_279 = arith.constant 0 : index
    %458 = vector.load %arg46[%c0_278, %c0_279] : memref<32x4xf32, #tpu.memory_space<vmem>>, vector<32x4xf32>
    %cst_280 = arith.constant dense<0.000000e+00> : vector<4x4xf32>
    %459 = tpu.matmul %457, %458, %cst_280 {dimension_numbers = #tpu.dot_dimension_numbers<[1], [0], [0], [1], [0, 0, 1, 1], [], []>} : vector<4x32xf32>, vector<32x4xf32>, vector<4x4xf32> -> vector<4x4xf32>
    %c0_281 = arith.constant 0 : index
    %c0_282 = arith.constant 0 : index
    %460 = vector.load %arg44[%c0_281, %c0_282] : memref<1x4xf32, #tpu.memory_space<vmem>>, vector<1x4xf32>
    %461 = vector.broadcast %460 : vector<1x4xf32> to vector<4x4xf32>
    %462 = arith.addf %459, %461 : vector<4x4xf32>
    %c0_283 = arith.constant 0 : index
    %c0_284 = arith.constant 0 : index
    %463 = vector.load %arg45[%c0_283, %c0_284] : memref<4x32xf32, #tpu.memory_space<vmem>>, vector<4x32xf32>
    %464 = arith.mulf %457, %463 : vector<4x32xf32>
    %cst_285 = arith.constant dense<0.000000e+00> : vector<4xf32>
    %465 = vector.multi_reduction <add>, %464, %cst_285 [1] : vector<4x32xf32> to vector<4xf32>
    %466 = vector.shape_cast %465 : vector<4xf32> to vector<4x1xf32>
    %c0_286 = arith.constant 0 : index
    %c0_287 = arith.constant 0 : index
    %467 = vector.load %arg43[%c0_286, %c0_287] : memref<4x1xf32, #tpu.memory_space<vmem>>, vector<4x1xf32>
    %468 = arith.addf %466, %467 : vector<4x1xf32>
    %cst_288 = arith.constant 0.000000e+00 : f32
    %469 = vector.broadcast %cst_288 : f32 to vector<4x1xf32>
    %470 = arith.subf %469, %468 : vector<4x1xf32>
    %471 = math.exp %470 : vector<4x1xf32>
    %cst_289 = arith.constant 1.000000e+00 : f32
    %472 = vector.broadcast %cst_289 : f32 to vector<4x1xf32>
    %473 = arith.addf %472, %471 : vector<4x1xf32>
    %cst_290 = arith.constant 1.000000e+00 : f32
    %474 = vector.broadcast %cst_290 : f32 to vector<4x1xf32>
    %475 = arith.divf %474, %473 : vector<4x1xf32>
    %cst_291 = arith.constant dense<0.000000e+00> : vector<1xf32>
    %476 = vector.multi_reduction <add>, %475, %cst_291 [0] : vector<4x1xf32> to vector<1xf32>
    %477 = vector.shape_cast %476 : vector<1xf32> to vector<1x1xf32>
    %478 = vector.broadcast %477 : vector<1x1xf32> to vector<4x1xf32>
    %479 = arith.divf %475, %478 : vector<4x1xf32>
    %c0_292 = arith.constant 0 : index
    %c0_293 = arith.constant 0 : index
    %480 = vector.load %arg47[%c0_292, %c0_293] : memref<4x1xf32, #tpu.memory_space<vmem>>, vector<4x1xf32>
    %481 = arith.mulf %480, %479 : vector<4x1xf32>
    %cst_294 = arith.constant dense<0.000000e+00> : vector<1xf32>
    %482 = vector.multi_reduction <add>, %481, %cst_294 [0] : vector<4x1xf32> to vector<1xf32>
    %483 = vector.shape_cast %482 : vector<1xf32> to vector<1x1xf32>
    %c0_295 = arith.constant 0 : index
    %c0_296 = arith.constant 0 : index
    %c0_297 = arith.constant 0 : index
    %484 = vector.load %arg48[%c0_295, %c0_296, %c0_297] : memref<1x1x1xf32, #tpu.memory_space<vmem>>, vector<1x1x1xf32>
    %485 = vector.shape_cast %484 : vector<1x1x1xf32> to vector<1x1xf32>
    %486 = vector.shape_cast %483 : vector<1x1xf32> to vector<1x1x1xf32>
    tpu.vector_store %arg48[%c0_295, %c0_296, %c0_297], %486 {strides = array<i32>} : memref<1x1x1xf32, #tpu.memory_space<vmem>>, vector<1x1x1xf32>,
    %c0_298 = arith.constant 0 : index
    %c0_299 = arith.constant 0 : index
    %c0_300 = arith.constant 0 : index
    %487 = vector.load %arg49[%c0_298, %c0_299, %c0_300] : memref<1x4x32xf32, #tpu.memory_space<vmem>>, vector<1x4x32xf32>
    %488 = vector.shape_cast %487 : vector<1x4x32xf32> to vector<4x32xf32>
    %489 = vector.shape_cast %457 : vector<4x32xf32> to vector<1x4x32xf32>
    tpu.vector_store %arg49[%c0_298, %c0_299, %c0_300], %489 {strides = array<i32>} : memref<1x4x32xf32, #tpu.memory_space<vmem>>, vector<1x4x32xf32>,
    %c0_301 = arith.constant 0 : index
    %c0_302 = arith.constant 0 : index
    %c0_303 = arith.constant 0 : index
    %490 = vector.load %arg50[%c0_301, %c0_302, %c0_303] : memref<1x4x4xf32, #tpu.memory_space<vmem>>, vector<1x4x4xf32>
    %491 = vector.shape_cast %490 : vector<1x4x4xf32> to vector<4x4xf32>
    %492 = vector.shape_cast %462 : vector<4x4xf32> to vector<1x4x4xf32>
    tpu.vector_store %arg50[%c0_301, %c0_302, %c0_303], %492 {strides = array<i32>} : memref<1x4x4xf32, #tpu.memory_space<vmem>>, vector<1x4x4xf32>,
    return
  }
  func.func @transform_0(%arg0: i32) -> (i32, i32, i32) {
    %c0_i32 = arith.constant 0 : i32
    %c0_i32_0 = arith.constant 0 : i32
    %c0_i32_1 = arith.constant 0 : i32
    return %arg0, %c0_i32, %c0_i32_0 : i32, i32, i32
  }
  func.func @transform_1(%arg0: i32) -> (i32, i32) {
    %c0_i32 = arith.constant 0 : i32
    %c0_i32_0 = arith.constant 0 : i32
    %c0_i32_1 = arith.constant 0 : i32
    return %c0_i32, %c0_i32_0 : i32, i32
  }
  func.func @transform_2(%arg0: i32) -> (i32, i32) {
    %c0_i32 = arith.constant 0 : i32
    %c0_i32_0 = arith.constant 0 : i32
    %c0_i32_1 = arith.constant 0 : i32
    return %c0_i32, %c0_i32_0 : i32, i32
  }
  func.func @transform_3(%arg0: i32) -> (i32, i32) {
    %c0_i32 = arith.constant 0 : i32
    %c0_i32_0 = arith.constant 0 : i32
    %c0_i32_1 = arith.constant 0 : i32
    return %c0_i32, %c0_i32_0 : i32, i32
  }
  func.func @transform_4(%arg0: i32) -> (i32, i32) {
    %c0_i32 = arith.constant 0 : i32
    %c0_i32_0 = arith.constant 0 : i32
    %c0_i32_1 = arith.constant 0 : i32
    return %c0_i32, %c0_i32_0 : i32, i32
  }
  func.func @transform_5(%arg0: i32) -> (i32, i32) {
    %c0_i32 = arith.constant 0 : i32
    %c0_i32_0 = arith.constant 0 : i32
    %c0_i32_1 = arith.constant 0 : i32
    return %c0_i32, %c0_i32_0 : i32, i32
  }
  func.func @transform_6(%arg0: i32) -> (i32, i32) {
    %c0_i32 = arith.constant 0 : i32
    %c0_i32_0 = arith.constant 0 : i32
    %c0_i32_1 = arith.constant 0 : i32
    return %c0_i32, %c0_i32_0 : i32, i32
  }
  func.func @transform_7(%arg0: i32) -> (i32, i32) {
    %c0_i32 = arith.constant 0 : i32
    %c0_i32_0 = arith.constant 0 : i32
    %c0_i32_1 = arith.constant 0 : i32
    return %c0_i32, %c0_i32_0 : i32, i32
  }
  func.func @transform_8(%arg0: i32) -> (i32, i32) {
    %c0_i32 = arith.constant 0 : i32
    %c0_i32_0 = arith.constant 0 : i32
    %c0_i32_1 = arith.constant 0 : i32
    return %c0_i32, %c0_i32_0 : i32, i32
  }
  func.func @transform_9(%arg0: i32) -> (i32, i32) {
    %c0_i32 = arith.constant 0 : i32
    %c0_i32_0 = arith.constant 0 : i32
    %c0_i32_1 = arith.constant 0 : i32
    return %c0_i32, %c0_i32_0 : i32, i32
  }
  func.func @transform_10(%arg0: i32) -> (i32, i32) {
    %c0_i32 = arith.constant 0 : i32
    %c0_i32_0 = arith.constant 0 : i32
    %c0_i32_1 = arith.constant 0 : i32
    return %c0_i32, %c0_i32_0 : i32, i32
  }
  func.func @transform_11(%arg0: i32) -> (i32, i32) {
    %c0_i32 = arith.constant 0 : i32
    %c0_i32_0 = arith.constant 0 : i32
    %c0_i32_1 = arith.constant 0 : i32
    return %c0_i32, %c0_i32_0 : i32, i32
  }
  func.func @transform_12(%arg0: i32) -> (i32, i32) {
    %c0_i32 = arith.constant 0 : i32
    %c0_i32_0 = arith.constant 0 : i32
    %c0_i32_1 = arith.constant 0 : i32
    return %c0_i32, %c0_i32_0 : i32, i32
  }
  func.func @transform_13(%arg0: i32) -> (i32, i32) {
    %c0_i32 = arith.constant 0 : i32
    %c0_i32_0 = arith.constant 0 : i32
    %c0_i32_1 = arith.constant 0 : i32
    return %c0_i32, %c0_i32_0 : i32, i32
  }
  func.func @transform_14(%arg0: i32) -> (i32, i32) {
    %c0_i32 = arith.constant 0 : i32
    %c0_i32_0 = arith.constant 0 : i32
    %c0_i32_1 = arith.constant 0 : i32
    return %c0_i32, %c0_i32_0 : i32, i32
  }
  func.func @transform_15(%arg0: i32) -> (i32, i32) {
    %c0_i32 = arith.constant 0 : i32
    %c0_i32_0 = arith.constant 0 : i32
    %c0_i32_1 = arith.constant 0 : i32
    return %c0_i32, %c0_i32_0 : i32, i32
  }
  func.func @transform_16(%arg0: i32) -> (i32, i32) {
    %c0_i32 = arith.constant 0 : i32
    %c0_i32_0 = arith.constant 0 : i32
    %c0_i32_1 = arith.constant 0 : i32
    return %c0_i32, %c0_i32_0 : i32, i32
  }
  func.func @transform_17(%arg0: i32) -> (i32, i32) {
    %c0_i32 = arith.constant 0 : i32
    %c0_i32_0 = arith.constant 0 : i32
    %c0_i32_1 = arith.constant 0 : i32
    return %c0_i32, %c0_i32_0 : i32, i32
  }
  func.func @transform_18(%arg0: i32) -> (i32, i32) {
    %c0_i32 = arith.constant 0 : i32
    %c0_i32_0 = arith.constant 0 : i32
    %c0_i32_1 = arith.constant 0 : i32
    return %c0_i32, %c0_i32_0 : i32, i32
  }
  func.func @transform_19(%arg0: i32) -> (i32, i32) {
    %c0_i32 = arith.constant 0 : i32
    %c0_i32_0 = arith.constant 0 : i32
    %c0_i32_1 = arith.constant 0 : i32
    return %c0_i32, %c0_i32_0 : i32, i32
  }
  func.func @transform_20(%arg0: i32) -> (i32, i32) {
    %c0_i32 = arith.constant 0 : i32
    %c0_i32_0 = arith.constant 0 : i32
    %c0_i32_1 = arith.constant 0 : i32
    return %c0_i32, %c0_i32_0 : i32, i32
  }
  func.func @transform_21(%arg0: i32) -> (i32, i32) {
    %c0_i32 = arith.constant 0 : i32
    %c0_i32_0 = arith.constant 0 : i32
    %c0_i32_1 = arith.constant 0 : i32
    return %c0_i32, %c0_i32_0 : i32, i32
  }
  func.func @transform_22(%arg0: i32) -> (i32, i32) {
    %c0_i32 = arith.constant 0 : i32
    %c0_i32_0 = arith.constant 0 : i32
    %c0_i32_1 = arith.constant 0 : i32
    return %c0_i32, %c0_i32_0 : i32, i32
  }
  func.func @transform_23(%arg0: i32) -> (i32, i32) {
    %c0_i32 = arith.constant 0 : i32
    %c0_i32_0 = arith.constant 0 : i32
    %c0_i32_1 = arith.constant 0 : i32
    return %c0_i32, %c0_i32_0 : i32, i32
  }
  func.func @transform_24(%arg0: i32) -> (i32, i32) {
    %c0_i32 = arith.constant 0 : i32
    %c0_i32_0 = arith.constant 0 : i32
    %c0_i32_1 = arith.constant 0 : i32
    return %c0_i32, %c0_i32_0 : i32, i32
  }
  func.func @transform_25(%arg0: i32) -> (i32, i32) {
    %c0_i32 = arith.constant 0 : i32
    %c0_i32_0 = arith.constant 0 : i32
    %c0_i32_1 = arith.constant 0 : i32
    return %c0_i32, %c0_i32_0 : i32, i32
  }
  func.func @transform_26(%arg0: i32) -> (i32, i32) {
    %c0_i32 = arith.constant 0 : i32
    %c0_i32_0 = arith.constant 0 : i32
    %c0_i32_1 = arith.constant 0 : i32
    return %c0_i32, %c0_i32_0 : i32, i32
  }
  func.func @transform_27(%arg0: i32) -> (i32, i32) {
    %c0_i32 = arith.constant 0 : i32
    %c0_i32_0 = arith.constant 0 : i32
    %c0_i32_1 = arith.constant 0 : i32
    return %c0_i32, %c0_i32_0 : i32, i32
  }
  func.func @transform_28(%arg0: i32) -> (i32, i32) {
    %c0_i32 = arith.constant 0 : i32
    %c0_i32_0 = arith.constant 0 : i32
    %c0_i32_1 = arith.constant 0 : i32
    return %c0_i32, %c0_i32_0 : i32, i32
  }
  func.func @transform_29(%arg0: i32) -> (i32, i32) {
    %c0_i32 = arith.constant 0 : i32
    %c0_i32_0 = arith.constant 0 : i32
    %c0_i32_1 = arith.constant 0 : i32
    return %c0_i32, %c0_i32_0 : i32, i32
  }
  func.func @transform_30(%arg0: i32) -> (i32, i32) {
    %c0_i32 = arith.constant 0 : i32
    %c0_i32_0 = arith.constant 0 : i32
    %c0_i32_1 = arith.constant 0 : i32
    return %c0_i32, %c0_i32_0 : i32, i32
  }
  func.func @transform_31(%arg0: i32) -> (i32, i32) {
    %c0_i32 = arith.constant 0 : i32
    %c0_i32_0 = arith.constant 0 : i32
    %c0_i32_1 = arith.constant 0 : i32
    return %c0_i32, %c0_i32_0 : i32, i32
  }
  func.func @transform_32(%arg0: i32) -> (i32, i32) {
    %c0_i32 = arith.constant 0 : i32
    %c0_i32_0 = arith.constant 0 : i32
    %c0_i32_1 = arith.constant 0 : i32
    return %c0_i32, %c0_i32_0 : i32, i32
  }
  func.func @transform_33(%arg0: i32) -> (i32, i32) {
    %c0_i32 = arith.constant 0 : i32
    %c0_i32_0 = arith.constant 0 : i32
    %c0_i32_1 = arith.constant 0 : i32
    return %c0_i32, %c0_i32_0 : i32, i32
  }
  func.func @transform_34(%arg0: i32) -> (i32, i32) {
    %c0_i32 = arith.constant 0 : i32
    %c0_i32_0 = arith.constant 0 : i32
    %c0_i32_1 = arith.constant 0 : i32
    return %c0_i32, %c0_i32_0 : i32, i32
  }
  func.func @transform_35(%arg0: i32) -> (i32, i32) {
    %c0_i32 = arith.constant 0 : i32
    %c0_i32_0 = arith.constant 0 : i32
    %c0_i32_1 = arith.constant 0 : i32
    return %c0_i32, %c0_i32_0 : i32, i32
  }
  func.func @transform_36(%arg0: i32) -> (i32, i32) {
    %c0_i32 = arith.constant 0 : i32
    %c0_i32_0 = arith.constant 0 : i32
    %c0_i32_1 = arith.constant 0 : i32
    return %c0_i32, %c0_i32_0 : i32, i32
  }
  func.func @transform_37(%arg0: i32) -> (i32, i32) {
    %c0_i32 = arith.constant 0 : i32
    %c0_i32_0 = arith.constant 0 : i32
    %c0_i32_1 = arith.constant 0 : i32
    return %c0_i32, %c0_i32_0 : i32, i32
  }
  func.func @transform_38(%arg0: i32) -> (i32, i32) {
    %c0_i32 = arith.constant 0 : i32
    %c0_i32_0 = arith.constant 0 : i32
    %c0_i32_1 = arith.constant 0 : i32
    return %c0_i32, %c0_i32_0 : i32, i32
  }
  func.func @transform_39(%arg0: i32) -> (i32, i32) {
    %c0_i32 = arith.constant 0 : i32
    %c0_i32_0 = arith.constant 0 : i32
    %c0_i32_1 = arith.constant 0 : i32
    return %c0_i32, %c0_i32_0 : i32, i32
  }
  func.func @transform_40(%arg0: i32) -> (i32, i32) {
    %c0_i32 = arith.constant 0 : i32
    %c0_i32_0 = arith.constant 0 : i32
    %c0_i32_1 = arith.constant 0 : i32
    return %c0_i32, %c0_i32_0 : i32, i32
  }
  func.func @transform_41(%arg0: i32) -> (i32, i32) {
    %c0_i32 = arith.constant 0 : i32
    %c0_i32_0 = arith.constant 0 : i32
    %c0_i32_1 = arith.constant 0 : i32
    return %c0_i32, %c0_i32_0 : i32, i32
  }
  func.func @transform_42(%arg0: i32) -> (i32, i32) {
    %c0_i32 = arith.constant 0 : i32
    %c0_i32_0 = arith.constant 0 : i32
    %c0_i32_1 = arith.constant 0 : i32
    return %c0_i32, %c0_i32_0 : i32, i32
  }
  func.func @transform_43(%arg0: i32) -> (i32, i32) {
    %c0_i32 = arith.constant 0 : i32
    %c0_i32_0 = arith.constant 0 : i32
    %c0_i32_1 = arith.constant 0 : i32
    return %c0_i32, %c0_i32_0 : i32, i32
  }
  func.func @transform_44(%arg0: i32) -> (i32, i32) {
    %c0_i32 = arith.constant 0 : i32
    %c0_i32_0 = arith.constant 0 : i32
    %c0_i32_1 = arith.constant 0 : i32
    return %c0_i32, %c0_i32_0 : i32, i32
  }
  func.func @transform_45(%arg0: i32) -> (i32, i32) {
    %c0_i32 = arith.constant 0 : i32
    %c0_i32_0 = arith.constant 0 : i32
    %c0_i32_1 = arith.constant 0 : i32
    return %c0_i32, %c0_i32_0 : i32, i32
  }
  func.func @transform_46(%arg0: i32) -> (i32, i32) {
    %c0_i32 = arith.constant 0 : i32
    %c0_i32_0 = arith.constant 0 : i32
    %c0_i32_1 = arith.constant 0 : i32
    return %c0_i32, %c0_i32_0 : i32, i32
  }
  func.func @transform_47(%arg0: i32) -> (i32, i32, i32) {
    %c0_i32 = arith.constant 0 : i32
    %c0_i32_0 = arith.constant 0 : i32
    %c0_i32_1 = arith.constant 0 : i32
    return %arg0, %c0_i32, %c0_i32_0 : i32, i32, i32
  }
  func.func @transform_48(%arg0: i32) -> (i32, i32, i32) {
    %c0_i32 = arith.constant 0 : i32
    %c0_i32_0 = arith.constant 0 : i32
    %c0_i32_1 = arith.constant 0 : i32
    return %arg0, %c0_i32, %c0_i32_0 : i32, i32, i32
  }
  func.func @transform_49(%arg0: i32) -> (i32, i32, i32) {
    %c0_i32 = arith.constant 0 : i32
    %c0_i32_0 = arith.constant 0 : i32
    %c0_i32_1 = arith.constant 0 : i32
    return %arg0, %c0_i32, %c0_i32_0 : i32, i32, i32
  }
}

</mosaic_0001>

<bundles_post_ra>
// kernel: gdlt_forward.1
= control target key start
LH: loop header
LB: loop body
LE: loop exit
PB: predicated region body
PF: predicated region fallthrough
CT: control target
= control target key end

     0   :  { %s7538_s6 = smov 1   ;;  %s7539_s10 = smov 2   ;;  %s8642_s0 = inlined_call_operand.smem [shape: u32[50], index: -1, kind: input, shape index: {}] }
   0x1   :  { %s7625_s5 = sld [smem:[%s8642_s0]]   ;;  %s7540_s14 = smov 3  }
   0x2   :  { %s7630_s9 = sld [smem:[%s8642_s0 + %s7538_s6]]   ;;  %s7541_s18 = smov 4  }
   0x3   :  { %s7635_s13 = sld [smem:[%s8642_s0 + %s7539_s10]]   ;;  %s7542_s22 = smov 5  }
   0x4   :  { %s7640_s17 = sld [smem:[%s8642_s0 + %s7540_s14]]   ;;  %s7543_s26 = smov 6  }
   0x5   :  { %s7645_s21 = sld [smem:[%s8642_s0 + %s7541_s18]]   ;;  %s7544_s30 = smov 7  }
   0x6   :  { %s7650_s25 = sld [smem:[%s8642_s0 + %s7542_s22]]   ;;  %s7545_s4 = smov 8  }
   0x7   :  { %8700 = sst [smem:[#allocation36_spill]] %s7625_s5  ;;  %s7546_s10 = smov 9  }
   0x8   :  { %8701 = sst [smem:[#allocation37_spill]] %s7630_s9  ;;  %s7547_s15 = smov 10  }
   0x9   :  { %8702 = sst [smem:[#allocation38_spill]] %s7635_s13  ;;  %s7548_s20 = smov 11  }
   0xa   :  { %s7655_s29 = sld [smem:[%s8642_s0 + %s7543_s26]]   ;;  %s7549_s26 = smov 12  }
   0xb   :  { %8703 = sst [smem:[#allocation39_spill]] %s7645_s21  ;;  %s7550_s1 = smov 13  }
   0xc   :  { %8704 = sst [smem:[#allocation40_spill]] %s7650_s25  ;;  %s7551_s7 = smov 14  }
   0xd   :  { %s7660_s3 = sld [smem:[%s8642_s0 + %s7544_s30]]   ;;  %s7553_s22 = smov 16  }
   0xe   :  { %s7665_s8 = sld [smem:[%s8642_s0 + %s7545_s4]]   ;;  %s7554_s28 = smov 17  }
   0xf   :  { %s7670_s14 = sld [smem:[%s8642_s0 + %s7546_s10]]  }
  0x10   :  { %8705 = sst [smem:[#allocation41_spill]] %s7655_s29 }
  0x11   :  { %s7675_s19 = sld [smem:[%s8642_s0 + %s7547_s15]]   ;;  %s7552_s15 = smov 15  }
  0x12   :  { %s7680_s24 = sld [smem:[%s8642_s0 + %s7548_s20]]  }
  0x13   :  { %8706 = sst [smem:[#allocation42_spill]] %s7660_s3 }
  0x14   :  { %8707 = sst [smem:[#allocation43_spill]] %s7665_s8 }
  0x15   :  { %8708 = sst [smem:[#allocation44_spill]] %s7670_s14 }
  0x16   :  { %s7685_s30 = sld [smem:[%s8642_s0 + %s7549_s26]]  }
  0x17   :  { %8709 = sst [smem:[#allocation45_spill]] %s7675_s19 }
  0x18   :  { %s7690_s6 = sld [smem:[%s8642_s0 + %s7550_s1]]  }
  0x19   :  { %s7695_s12 = sld [smem:[%s8642_s0 + %s7551_s7]]   ;;  %s7555_s7 = smov 18  }
  0x1a   :  { %s7700_s20 = sld [smem:[%s8642_s0 + %s7552_s15]]   ;;  %s7556_s15 = smov 19  }
  0x1b   :  { %s7705_s27 = sld [smem:[%s8642_s0 + %s7553_s22]]   ;;  %s7557_s22 = smov 20  }
  0x1c   :  { %8710 = sst [smem:[#allocation46_spill]] %s7685_s30 }
  0x1d   :  { %s7710_s4 = sld [smem:[%s8642_s0 + %s7554_s28]]   ;;  %s7558_s28 = smov 21  }
  0x1e   :  { %8711 = sst [smem:[#allocation47_spill]] %s7690_s6 }
  0x1f   :  { %8712 = sst [smem:[#allocation48_spill]] %s7695_s12 }
  0x20   :  { %s7715_s14 = sld [smem:[%s8642_s0 + %s7555_s7]]   ;;  %s7559_s7 = smov 22  }
  0x21   :  { %s7720_s30 = sld [smem:[%s8642_s0 + %s7556_s15]]   ;;  %s7560_s15 = smov 23  }
  0x22   :  { %s7725_s19 = sld [smem:[%s8642_s0 + %s7557_s22]]   ;;  %s7561_s22 = smov 24  }
  0x23   :  { %8713 = sst [smem:[#allocation49_spill]] %s7710_s4 }
  0x24   :  { %s7730_s29 = sld [smem:[%s8642_s0 + %s7558_s28]]   ;;  %s7562_s28 = smov 25  }
  0x25   :  { %s7735_s8 = sld [smem:[%s8642_s0 + %s7559_s7]]   ;;  %s7563_s7 = smov 26  }
  0x26   :  { %8714 = sst [smem:[#allocation50_spill]] %s7715_s14 }
  0x27   :  { %s7740_s21 = sld [smem:[%s8642_s0 + %s7560_s15]]   ;;  %s7564_s15 = smov 27  }
  0x28   :  { %8715 = sst [smem:[#allocation51_spill]] %s7725_s19 }
  0x29   :  { %s7745_s19 = sld [smem:[%s8642_s0 + %s7561_s22]]   ;;  %s7565_s22 = smov 28  }
  0x2a   :  { %8716 = sst [smem:[#allocation52_spill]] %s7730_s29 }
  0x2b   :  { %8717 = sst [smem:[#allocation53_spill]] %s7735_s8 }
  0x2c   :  { %s7750_s29 = sld [smem:[%s8642_s0 + %s7562_s28]]   ;;  %s7566_s28 = smov 29  }
  0x2d   :  { %8718 = sst [smem:[#allocation54_spill]] %s7740_s21 }
  0x2e   :  { %s7755_s8 = sld [smem:[%s8642_s0 + %s7563_s7]]   ;;  %s7567_s7 = smov 30  }
  0x2f   :  { %8719 = sst [smem:[#allocation55_spill]] %s7745_s19 }
  0x30   :  { %s7760_s21 = sld [smem:[%s8642_s0 + %s7564_s15]]   ;;  %s7568_s15 = smov 31  }
  0x31   :  { %s7765_s19 = sld [smem:[%s8642_s0 + %s7565_s22]]   ;;  %s7569_s22 = smov 32  }
  0x32   :  { %8720 = sst [smem:[#allocation56_spill]] %s7750_s29 }
  0x33   :  { %s7770_s29 = sld [smem:[%s8642_s0 + %s7566_s28]]   ;;  %s7570_s28 = smov 33  }
  0x34   :  { %8721 = sst [smem:[#allocation57_spill]] %s7755_s8 }
  0x35   :  { %s7775_s8 = sld [smem:[%s8642_s0 + %s7567_s7]]   ;;  %s7571_s7 = smov 34  }
  0x36   :  { %8722 = sst [smem:[#allocation58_spill]] %s7760_s21 }
  0x37   :  { %8723 = sst [smem:[#allocation59_spill]] %s7765_s19 }
  0x38   :  { %s7780_s21 = sld [smem:[%s8642_s0 + %s7568_s15]]   ;;  %s7572_s15 = smov 35  }
  0x39   :  { %8724 = sst [smem:[#allocation60_spill]] %s7770_s29 }
  0x3a   :  { %s7785_s19 = sld [smem:[%s8642_s0 + %s7569_s22]]   ;;  %s7573_s22 = smov 36  }
  0x3b   :  { %8725 = sst [smem:[#allocation61_spill]] %s7775_s8 }
  0x3c   :  { %s7790_s29 = sld [smem:[%s8642_s0 + %s7570_s28]]   ;;  %s7574_s28 = smov 37  }
  0x3d   :  { %s7795_s8 = sld [smem:[%s8642_s0 + %s7571_s7]]   ;;  %s7575_s7 = smov 38  }
  0x3e   :  { %8726 = sst [smem:[#allocation62_spill]] %s7780_s21 }
  0x3f   :  { %s7800_s21 = sld [smem:[%s8642_s0 + %s7572_s15]]   ;;  %s7576_s15 = smov 39  }
  0x40   :  { %8727 = sst [smem:[#allocation63_spill]] %s7785_s19 }
  0x41   :  { %s7805_s19 = sld [smem:[%s8642_s0 + %s7573_s22]]   ;;  %s7577_s22 = smov 40  }
  0x42   :  { %8728 = sst [smem:[#allocation64_spill]] %s7790_s29 }
  0x43   :  { %8729 = sst [smem:[#allocation65_spill]] %s7795_s8 }
  0x44   :  { %s7810_s29 = sld [smem:[%s8642_s0 + %s7574_s28]]   ;;  %s7578_s28 = smov 41  }
  0x45   :  { %8730 = sst [smem:[#allocation66_spill]] %s7800_s21 }
  0x46   :  { %s7815_s8 = sld [smem:[%s8642_s0 + %s7575_s7]]   ;;  %s7579_s7 = smov 42  }
  0x47   :  { %8731 = sst [smem:[#allocation67_spill]] %s7805_s19 }
  0x48   :  { %s7820_s21 = sld [smem:[%s8642_s0 + %s7576_s15]]   ;;  %s7580_s15 = smov 43  }
  0x49   :  { %s7825_s19 = sld [smem:[%s8642_s0 + %s7577_s22]]   ;;  %s7581_s22 = smov 44  }
  0x4a   :  { %8732 = sst [smem:[#allocation68_spill]] %s7810_s29 }
  0x4b   :  { %s7830_s29 = sld [smem:[%s8642_s0 + %s7578_s28]]   ;;  %s7582_s28 = smov 45  }
  0x4c   :  { %8733 = sst [smem:[#allocation69_spill]] %s7815_s8 }
  0x4d   :  { %s7835_s5 = sld [smem:[%s8642_s0 + %s7579_s7]]   ;;  %s7583_s7 = smov 46  }
  0x4e   :  { %8734 = sst [smem:[#allocation70_spill]] %s7820_s21 }
  0x4f   :  { %8735 = sst [smem:[#allocation71_spill]] %s7825_s19 }
  0x50   :  { %s7840_s21 = sld [smem:[%s8642_s0 + %s7580_s15]]   ;;  %s7584_s15 = smov 47  }
  0x51   :  { %8736 = sst [smem:[#allocation72_spill]] %s7830_s29 }
  0x52   :  { %s7845_s19 = sld [smem:[%s8642_s0 + %s7581_s22]]   ;;  %s7585_s22 = smov 48  }
  0x53   :  { %8737 = sst [smem:[#allocation73_spill]] %s7835_s5 }
  0x54   :  { %s7850_s29 = sld [smem:[%s8642_s0 + %s7582_s28]]   ;;  %s7586_s28 = smov 49  }
  0x55   :  { %s7855_s5 = sld [smem:[%s8642_s0 + %s7583_s7]]  }
  0x56   :  { %8738 = sst [smem:[#allocation74_spill]] %s7840_s21 }
  0x57   :  { %s7860_s21 = sld [smem:[%s8642_s0 + %s7584_s15]]  }
  0x58   :  { %8739 = sst [smem:[#allocation75_spill]] %s7845_s19 }
  0x59   :  { %s7865_s19 = sld [smem:[%s8642_s0 + %s7585_s22]]  }
  0x5a   :  { %8740 = sst [smem:[#allocation76_spill]] %s7850_s29 }
  0x5b   :  { %s7870_s29 = sld [smem:[%s8642_s0 + %s7586_s28]]  }
  0x5c   :  { %105 = vsyncpa [#allocation4], 0 }
  0x5d   :  { %106 = vsyncpa [#allocation7], 0 }
  0x5e   :  { %107 = vsyncpa [#allocation10], 0 }
  0x5f   :  { %108 = vsyncpa [#allocation13], 0 }
  0x60   :  { %109 = vsyncpa [#allocation16], 0 }
  0x61   :  { %110 = vsyncpa [#allocation19], 0 }
  0x62   :  { %111 = vsyncpa [#allocation22], 0 }
  0x63   :  { %112 = vsyncpa [#allocation5], 0 }
  0x64   :  { %114 = vsyncpa [#allocation5 + $0x1], 0 }
  0x65   :  { %115 = vsyncpa [#allocation26], 0 }
  0x66   :  { %117 = vsyncpa [#allocation26 + $0x1], 0  ;;  %s7872_s7 = smov 0   ;;  %s7874_s10 = smov 0  }
  0x67   :  { %s7876_s11 = smov 0   ;;  %s7878_s15 = smov 0  }
  0x68 LB: > { %s8741_s14 = sld [smem:[#allocation50_spill]]  ;;  %s8742_s12 = sld [smem:[#allocation48_spill]]  ;;  %s7524_s7 = sphi %s7872_s7, %s8829_s7   ;;  %s7536_s15 = sphi %s7878_s15, %s8826_s15   ;;  %s7532_s11 = sphi %s7876_s11, %s8828_s11   ;;  %s7528_s10 = sphi %s7874_s10, %s8830_s10  }
  0x69   : > { %s8743_s9 = sld [smem:[#allocation37_spill]]  ;;  %s8745_s6 = sld [smem:[#allocation47_spill]] }
  0x6a   : > { %s8744_s8 = sld [smem:[#allocation69_spill]]  ;;  %s8746_s4 = sld [smem:[#allocation49_spill]] }
  0x6b   : > { %s8747_s3 = sld [smem:[#allocation42_spill]]  ;;  %s8748_s25 = sld [smem:[#allocation40_spill]] }
  0x6c   : > { %s8749_s13 = sld [smem:[#allocation38_spill]]  ;;  %8750 = sst [smem:[#allocation77_spill]] %s7524_s7 }
  0x6d   : > { %8751 = sst [smem:[#allocation78_spill]] %s7532_s11  ;;  %s7893_s0 = sadd.s32 4294967295, %s7536_s15  }
  0x6e   : > { %s6071_s16 = sadd.s32 4294967294, %s7536_s15   ;;  %s7897_s18 = sadd.s32 1, %s7536_s15  }
  0x6f   : > { %8752 = sst [smem:[#allocation79_spill]] %s7897_s18  ;;  %s1148_s22 = sadd.s32 1, %s7532_s11 }
  0x70   : > { %s1145_s23 = ssub.s32 %s7536_s15, %s7897_s18  ;;  %p1158_p0 = scmp.ne.s32.totalorder %s7532_s11, %s7528_s10 }
  0x71   : > { %p1146_p1 = scmp.eq.s32.totalorder %s1145_s23, 0  ;;  %p1159_p2 = scmp.eq.s32.totalorder %s7893_s0, 1 }
  0x72   : > { %p1164_p3 = scmp.ne.s32.totalorder %s7528_s10, %s7524_s7  ;;  %p1165_p4 = scmp.eq.s32.totalorder %s6071_s16, 1 }
  0x73   : > { %s7908_s26 = scalar_select %p1146_p1, %s7532_s11, %s1148_s22  }
  0x74   : > { %p7910_p5 = por %p1159_p2, %p1158_p0  ;;  %p7914_p6 = por %p1165_p4, %p1164_p3 }
  0x75   : > { %8753 = sst [smem:[#allocation80_spill]] %s7908_s26  ;;  %p6072_p7 = scmp.ge.s32.totalorder %s7536_s15, 1 }
  0x76   : > { %s8754_s28 = scalar_select %p7910_p5, 1, 0 }
  0x77   : > { %s8755_s1 = scalar_select %p7914_p6, 1, 0 }
  0x78   : > { %p1198_p8 = scmp.lt.s32.totalorder %s7536_s15, 3  ;;  %p8660_p9 = scmp.eq.s32.totalorder %s7893_s0, 0 }
  0x79   : > { %8756 = sst [smem:[#allocation81_spill]] %s8755_s1  ;;  %s7587_s16 = smov [#allocation6]  }
  0x7a   : > { %p7921_p10 = pnand %p6072_p7, %p1198_p8  ;;  %s1222_s22 = sshll.u32 %s7587_s16, 4  ;;  %s1223_s22 = int_to_ptr.vmem [resolvable:$true] %s1222_s22 }
  0x7b   : > { %s7588_s23 = smov [#allocation9]   ;;  %s7589_s18 = smov [#allocation12]  }
  0x7c   : > { %s8757_s2 = scalar_select %p7921_p10, 1, 0 }
  0x7d   : > { %p6799_p11 = pneg %p7921_p10  ;;  %s1247_s26 = sshll.u32 %s7588_s23, 4  ;;  %s7933_s26 = int_to_ptr.vmem [resolvable:$true] %s1247_s26 }
  0x7e   : > { %s1281_s1 = sshll.u32 %s7589_s18, 4  ;;  %s7050_s7 = scalar_lea.hbm %s8749_s13, 16  ;;  %s7935_s1 = int_to_ptr.vmem [resolvable:$true] %s1281_s1 }
  0x7f   : > { %p7929_p12 = pnand %p8660_p9, %p6799_p11  ;;  %p7051_p13 = scmp.ne.s32.totalorder %s8749_s13, %s7050_s7 }
  0x80   : > { %p7057_p3 = scmp.lt.u32.totalorder %s7050_s7, %s8749_s13 }
  0x81   : > { %p7941_p0 = pneg %p7929_p12 }
  0x83   : > { %p7053_p1 = pnand %p7941_p0, %p7051_p13 }
  0x85   : > { %p7054_p2 = pneg %p7053_p1 }
  0x87   : > { %p7059_p4 = pnand %p7057_p3, %p7054_p2 }
  0x89   : > { %7062 = shalt.err (!%p7059_p4)
}
  0x8a   : > { %s7063_s23 = scalar_lea.vmem %s1223_s22, 16  ;;  %s7070_s18 = scalar_lea.vmem %s1223_s22, 32 }
  0x8b   : > { %p7064_p7 = scmp.ne.s32.totalorder %s1223_s22, %s7063_s23  ;;  %p7071_p9 = scmp.lt.s32.totalorder %s1223_s22, %s1223_s22 }
  0x8c   : > { %p7072_p6 = scmp.lt.s32.totalorder %s7070_s18, %s7063_s23 }
  0x8d   : > { %p7066_p8 = pnand %p7064_p7, %p7941_p0 }
  0x8e   : > { %p7073_p5 = por %p7072_p6, %p7071_p9 }
  0x8f   : > { %p7067_p11 = pneg %p7066_p8 }
  0x91   : > { %p7074_p10 = pnand %p7073_p5, %p7067_p11 }
  0x93   : > { %7077 = shalt.err (!%p7074_p10)
}
  0x94   : > { %6805 = dma.hbm_to_vmem [thread:$0]  (!%p7929_p12), %s8749_s13, 16, %s1223_s22, [#allocation7]  }
  0x95   : > { %s7078_s7 = scalar_lea.hbm %s8748_s25, 16 }
  0x96   : > { %p7079_p13 = scmp.ne.s32.totalorder %s8748_s25, %s7078_s7  ;;  %p7085_p3 = scmp.lt.u32.totalorder %s7078_s7, %s8748_s25 }
  0x98   : > { %p7081_p1 = pnand %p7079_p13, %p7941_p0 }
  0x9a   : > { %p7082_p2 = pneg %p7081_p1 }
  0x9c   : > { %p7087_p4 = pnand %p7085_p3, %p7082_p2 }
  0x9e   : > { %7090 = shalt.err (!%p7087_p4)
}
  0x9f   : > { %s7091_s23 = scalar_lea.vmem %s7933_s26, 16  ;;  %s7098_s18 = scalar_lea.vmem %s7933_s26, 32 }
  0xa0   : > { %p7092_p5 = scmp.ne.s32.totalorder %s7933_s26, %s7091_s23  ;;  %p7099_p10 = scmp.lt.s32.totalorder %s7933_s26, %s7933_s26 }
  0xa1   : > { %p7100_p7 = scmp.lt.s32.totalorder %s7098_s18, %s7091_s23 }
  0xa2   : > { %p7094_p6 = pnand %p7092_p5, %p7941_p0 }
  0xa3   : > { %p7101_p8 = por %p7100_p7, %p7099_p10 }
  0xa4   : > { %p7095_p9 = pneg %p7094_p6 }
  0xa6   : > { %p7102_p11 = pnand %p7101_p8, %p7095_p9 }
  0xa8   : > { %7105 = shalt.err (!%p7102_p11)
}
  0xa9   : > { %6811 = dma.hbm_to_vmem [thread:$0]  (!%p7929_p12), %s8748_s25, 16, %s7933_s26, [#allocation10]  }
  0xaa   : > { %s7106_s22 = scalar_lea.hbm %s7680_s24, 16 }
  0xab   : > { %p7107_p13 = scmp.ne.s32.totalorder %s7680_s24, %s7106_s22  ;;  %p7113_p3 = scmp.lt.u32.totalorder %s7106_s22, %s7680_s24 }
  0xad   : > { %p7109_p1 = pnand %p7107_p13, %p7941_p0 }
  0xaf   : > { %p7110_p2 = pneg %p7109_p1 }
  0xb1   : > { %p7115_p4 = pnand %p7113_p3, %p7110_p2 }
  0xb3   : > { %7118 = shalt.err (!%p7115_p4)
}
  0xb4   : > { %s7119_s7 = scalar_lea.vmem %s7935_s1, 16  ;;  %s7126_s23 = scalar_lea.vmem %s7935_s1, 32 }
  0xb5   : > { %p7120_p5 = scmp.ne.s32.totalorder %s7935_s1, %s7119_s7  ;;  %p7127_p10 = scmp.lt.s32.totalorder %s7935_s1, %s7935_s1 }
  0xb6   : > { %p7128_p7 = scmp.lt.s32.totalorder %s7126_s23, %s7119_s7 }
  0xb7   : > { %p7122_p6 = pnand %p7120_p5, %p7941_p0 }
  0xb8   : > { %p7129_p8 = por %p7128_p7, %p7127_p10 }
  0xb9   : > { %p7123_p9 = pneg %p7122_p6 }
  0xbb   : > { %p7130_p11 = pnand %p7129_p8, %p7123_p9 }
  0xbd   : > { %7133 = shalt.err (!%p7130_p11)
}
  0xbe   : > { %6817 = dma.hbm_to_vmem [thread:$0]  (!%p7929_p12), %s7680_s24, 16, %s7935_s1, [#allocation13]  }
  0xbf   : > { %s7590_s26 = smov [#allocation15]   ;;  %s7591_s22 = smov [#allocation18]  }
  0xc0   : > { %s1306_s18 = sshll.u32 %s7590_s26, 4  ;;  %s1328_s13 = sshll.u32 %s7591_s22, 4  ;;  %s1307_s18 = int_to_ptr.vmem [resolvable:$true] %s1306_s18  ;;  %s1329_s13 = int_to_ptr.vmem [resolvable:$true] %s1328_s13 }
  0xc1   : > { %s7134_s25 = scalar_lea.hbm %s8742_s12, 16 }
  0xc2   : > { %p7135_p13 = scmp.ne.s32.totalorder %s8742_s12, %s7134_s25  ;;  %p7141_p3 = scmp.lt.u32.totalorder %s7134_s25, %s8742_s12 }
  0xc4   : > { %p7137_p1 = pnand %p7135_p13, %p7941_p0 }
  0xc6   : > { %p7138_p2 = pneg %p7137_p1 }
  0xc8   : > { %p7143_p4 = pnand %p7141_p3, %p7138_p2 }
  0xca   : > { %7146 = shalt.err (!%p7143_p4)
}
  0xcb   : > { %s7147_s7 = scalar_lea.vmem %s1307_s18, 16  ;;  %s7154_s1 = scalar_lea.vmem %s1307_s18, 32 }
  0xcc   : > { %p7148_p5 = scmp.ne.s32.totalorder %s1307_s18, %s7147_s7  ;;  %p7155_p10 = scmp.lt.s32.totalorder %s1307_s18, %s1307_s18 }
  0xcd   : > { %p7156_p7 = scmp.lt.s32.totalorder %s7154_s1, %s7147_s7 }
  0xce   : > { %p7150_p6 = pnand %p7148_p5, %p7941_p0 }
  0xcf   : > { %p7157_p8 = por %p7156_p7, %p7155_p10 }
  0xd0   : > { %p7151_p9 = pneg %p7150_p6 }
  0xd2   : > { %p7158_p11 = pnand %p7157_p8, %p7151_p9 }
  0xd4   : > { %7161 = shalt.err (!%p7158_p11)
}
  0xd5   : > { %6823 = dma.hbm_to_vmem [thread:$0]  (!%p7929_p12), %s8742_s12, 16, %s1307_s18, [#allocation16]  }
  0xd6   : > { %s7162_s25 = scalar_lea.hbm %s7705_s27, 16 }
  0xd7   : > { %p7163_p13 = scmp.ne.s32.totalorder %s7705_s27, %s7162_s25  ;;  %p7169_p3 = scmp.lt.u32.totalorder %s7162_s25, %s7705_s27 }
  0xd9   : > { %p7165_p1 = pnand %p7163_p13, %p7941_p0 }
  0xdb   : > { %p7166_p2 = pneg %p7165_p1 }
  0xdd   : > { %p7171_p4 = pnand %p7169_p3, %p7166_p2 }
  0xdf   : > { %7174 = shalt.err (!%p7171_p4)
}
  0xe0   : > { %s7175_s23 = scalar_lea.vmem %s1329_s13, 16  ;;  %s7182_s26 = scalar_lea.vmem %s1329_s13, 32 }
  0xe1   : > { %p7176_p5 = scmp.ne.s32.totalorder %s1329_s13, %s7175_s23  ;;  %p7183_p10 = scmp.lt.s32.totalorder %s1329_s13, %s1329_s13 }
  0xe2   : > { %p7184_p7 = scmp.lt.s32.totalorder %s7182_s26, %s7175_s23 }
  0xe3   : > { %p7178_p6 = pnand %p7176_p5, %p7941_p0 }
  0xe4   : > { %p7185_p8 = por %p7184_p7, %p7183_p10 }
  0xe5   : > { %p7179_p9 = pneg %p7178_p6 }
  0xe7   : > { %p7186_p11 = pnand %p7185_p8, %p7179_p9 }
  0xe9   : > { %7189 = shalt.err (!%p7186_p11)
}
  0xea   : > { %6829 = dma.hbm_to_vmem [thread:$0]  (!%p7929_p12), %s7705_s27, 16, %s1329_s13, [#allocation19]  }
  0xeb   : > { %s7592_s18 = smov [#allocation21]   ;;  %s7593_s7 = smov [#allocation3]  }
  0xec   : > { %s1350_s22 = sshll.u32 %s7592_s18, 4  ;;  %s1211_s1 = sshll.u32 %s7593_s7, 4  ;;  %s1351_s22 = int_to_ptr.vmem [resolvable:$true] %s1350_s22  ;;  %s1212_s1 = int_to_ptr.vmem [resolvable:$true] %s1211_s1 }
  0xed   : > { %s7190_s25 = scalar_lea.hbm %s8741_s14, 16 }
  0xee   : > { %p7191_p13 = scmp.ne.s32.totalorder %s8741_s14, %s7190_s25  ;;  %p7197_p3 = scmp.lt.u32.totalorder %s7190_s25, %s8741_s14 }
  0xf0   : > { %p7193_p1 = pnand %p7191_p13, %p7941_p0 }
  0xf2   : > { %p7194_p2 = pneg %p7193_p1 }
  0xf4   : > { %p7199_p4 = pnand %p7197_p3, %p7194_p2 }
  0xf6   : > { %7202 = shalt.err (!%p7199_p4)
}
  0xf7   : > { %s7203_s23 = scalar_lea.vmem %s1351_s22, 16  ;;  %s7210_s13 = scalar_lea.vmem %s1351_s22, 32 }
  0xf8   : > { %p7204_p5 = scmp.ne.s32.totalorder %s1351_s22, %s7203_s23  ;;  %p7211_p10 = scmp.lt.s32.totalorder %s1351_s22, %s1351_s22 }
  0xf9   : > { %p7212_p7 = scmp.lt.s32.totalorder %s7210_s13, %s7203_s23 }
  0xfa   : > { %p7206_p6 = pnand %p7204_p5, %p7941_p0 }
  0xfb   : > { %p7213_p8 = por %p7212_p7, %p7211_p10 }
  0xfc   : > { %p7207_p9 = pneg %p7206_p6 }
  0xfe   : > { %p7214_p11 = pnand %p7213_p8, %p7207_p9 }
 0x100   : > { %7217 = shalt.err (!%p7214_p11)
}
 0x101   : > { %6835 = dma.hbm_to_vmem [thread:$0]  (!%p7929_p12), %s8741_s14, 16, %s1351_s22, [#allocation22]  }
 0x102   : > { %s7218_s26 = scalar_lea.hbm %s8743_s9, 16 }
 0x103   : > { %p7219_p13 = scmp.ne.s32.totalorder %s8743_s9, %s7218_s26  ;;  %p7225_p3 = scmp.lt.u32.totalorder %s7218_s26, %s8743_s9 }
 0x105   : > { %p7221_p1 = pnand %p7219_p13, %p7941_p0 }
 0x107   : > { %p7222_p2 = pneg %p7221_p1 }
 0x109   : > { %p7227_p4 = pnand %p7225_p3, %p7222_p2 }
 0x10b   : > { %7230 = shalt.err (!%p7227_p4)
}
 0x10c   : > { %s7231_s18 = scalar_lea.vmem %s1212_s1, 16  ;;  %s7238_s7 = scalar_lea.vmem %s1212_s1, 32 }
 0x10d   : > { %p7232_p5 = scmp.ne.s32.totalorder %s1212_s1, %s7231_s18  ;;  %p7239_p10 = scmp.lt.s32.totalorder %s1212_s1, %s1212_s1 }
 0x10e   : > { %p7240_p7 = scmp.lt.s32.totalorder %s7238_s7, %s7231_s18 }
 0x10f   : > { %p7234_p6 = pnand %p7232_p5, %p7941_p0 }
 0x110   : > { %p7241_p8 = por %p7240_p7, %p7239_p10 }
 0x111   : > { %p7235_p9 = pneg %p7234_p6 }
 0x113   : > { %p7242_p11 = pnand %p7241_p8, %p7235_p9 }
 0x115   : > { %7245 = shalt.err (!%p7242_p11)
}
 0x116   : > { %6802 = dma.hbm_to_vmem [thread:$0]  (!%p7929_p12), %s8743_s9, 16, %s1212_s1, [#allocation4]  }
 0x117   : > { %s7594_s22 = smov [#allocation8]   ;;  %s7595_s23 = smov [#allocation11]  }
 0x118   : > { %s1233_s25 = sshll.u32 %s7594_s22, 4  ;;  %s1261_s13 = sshll.u32 %s7595_s23, 4  ;;  %s1234_s25 = int_to_ptr.vmem [resolvable:$true] %s1233_s25  ;;  %s1262_s13 = int_to_ptr.vmem [resolvable:$true] %s1261_s13 }
 0x119   : > { %s7246_s26 = scalar_lea.hbm %s7640_s17, 16 }
 0x11a   : > { %p7247_p13 = scmp.ne.s32.totalorder %s7640_s17, %s7246_s26  ;;  %p7253_p3 = scmp.lt.u32.totalorder %s7246_s26, %s7640_s17 }
 0x11c   : > { %p7249_p1 = pnand %p7247_p13, %p7941_p0 }
 0x11e   : > { %p7250_p2 = pneg %p7249_p1 }
 0x120   : > { %p7255_p4 = pnand %p7253_p3, %p7250_p2 }
 0x122   : > { %7258 = shalt.err (!%p7255_p4)
}
 0x123   : > { %s7259_s18 = scalar_lea.vmem %s1234_s25, 16  ;;  %s7266_s1 = scalar_lea.vmem %s1234_s25, 32 }
 0x124   : > { %p7260_p5 = scmp.ne.s32.totalorder %s1234_s25, %s7259_s18  ;;  %p7267_p10 = scmp.lt.s32.totalorder %s1234_s25, %s1234_s25 }
 0x125   : > { %p7268_p7 = scmp.lt.s32.totalorder %s7266_s1, %s7259_s18 }
 0x126   : > { %p7262_p6 = pnand %p7260_p5, %p7941_p0 }
 0x127   : > { %p7269_p8 = por %p7268_p7, %p7267_p10 }
 0x128   : > { %p7263_p9 = pneg %p7262_p6 }
 0x12a   : > { %p7270_p11 = pnand %p7269_p8, %p7263_p9 }
 0x12c   : > { %7273 = shalt.err (!%p7270_p11)
}
 0x12d   : > { %6808 = dma.hbm_to_vmem [thread:$0]  (!%p7929_p12), %s7640_s17, 16, %s1234_s25, [#allocation7]  }
 0x12e   : > { %s7274_s7 = scalar_lea.hbm %s8747_s3, 16 }
 0x12f   : > { %p7275_p13 = scmp.ne.s32.totalorder %s8747_s3, %s7274_s7  ;;  %p7281_p3 = scmp.lt.u32.totalorder %s7274_s7, %s8747_s3 }
 0x131   : > { %p7277_p1 = pnand %p7275_p13, %p7941_p0 }
 0x133   : > { %p7278_p2 = pneg %p7277_p1 }
 0x135   : > { %p7283_p4 = pnand %p7281_p3, %p7278_p2 }
 0x137   : > { %7286 = shalt.err (!%p7283_p4)
}
 0x138   : > { %s7287_s22 = scalar_lea.vmem %s1262_s13, 16  ;;  %s7294_s23 = scalar_lea.vmem %s1262_s13, 32 }
 0x139   : > { %p7288_p5 = scmp.ne.s32.totalorder %s1262_s13, %s7287_s22  ;;  %p7295_p10 = scmp.lt.s32.totalorder %s1262_s13, %s1262_s13 }
 0x13a   : > { %p7296_p7 = scmp.lt.s32.totalorder %s7294_s23, %s7287_s22 }
 0x13b   : > { %p7290_p6 = pnand %p7288_p5, %p7941_p0 }
 0x13c   : > { %p7297_p8 = por %p7296_p7, %p7295_p10 }
 0x13d   : > { %p7291_p9 = pneg %p7290_p6 }
 0x13f   : > { %p7298_p11 = pnand %p7297_p8, %p7291_p9 }
 0x141   : > { %7301 = shalt.err (!%p7298_p11)
}
 0x142   : > { %6814 = dma.hbm_to_vmem [thread:$0]  (!%p7929_p12), %s8747_s3, 16, %s1262_s13, [#allocation10]  }
 0x143   : > { %s7596_s25 = smov [#allocation14]   ;;  %s7597_s18 = smov [#allocation17]  }
 0x144   : > { %s1295_s26 = sshll.u32 %s7596_s25, 4  ;;  %s1317_s1 = sshll.u32 %s7597_s18, 4  ;;  %s1296_s26 = int_to_ptr.vmem [resolvable:$true] %s1295_s26  ;;  %s1318_s1 = int_to_ptr.vmem [resolvable:$true] %s1317_s1 }
 0x145   : > { %s7302_s7 = scalar_lea.hbm %s8745_s6, 16 }
 0x146   : > { %p7303_p13 = scmp.ne.s32.totalorder %s8745_s6, %s7302_s7  ;;  %p7309_p3 = scmp.lt.u32.totalorder %s7302_s7, %s8745_s6 }
 0x148   : > { %p7305_p1 = pnand %p7303_p13, %p7941_p0 }
 0x14a   : > { %p7306_p2 = pneg %p7305_p1 }
 0x14c   : > { %p7311_p4 = pnand %p7309_p3, %p7306_p2 }
 0x14e   : > { %7314 = shalt.err (!%p7311_p4)
}
 0x14f   : > { %s7315_s22 = scalar_lea.vmem %s1296_s26, 16  ;;  %s7322_s13 = scalar_lea.vmem %s1296_s26, 32 }
 0x150   : > { %p7316_p5 = scmp.ne.s32.totalorder %s1296_s26, %s7315_s22  ;;  %p7323_p10 = scmp.lt.s32.totalorder %s1296_s26, %s1296_s26 }
 0x151   : > { %p7324_p7 = scmp.lt.s32.totalorder %s7322_s13, %s7315_s22 }
 0x152   : > { %p7318_p6 = pnand %p7316_p5, %p7941_p0 }
 0x153   : > { %p7325_p8 = por %p7324_p7, %p7323_p10 }
 0x154   : > { %p7319_p9 = pneg %p7318_p6 }
 0x156   : > { %p7326_p11 = pnand %p7325_p8, %p7319_p9 }
 0x158   : > { %7329 = shalt.err (!%p7326_p11)
}
 0x159   : > { %6820 = dma.hbm_to_vmem [thread:$0]  (!%p7929_p12), %s8745_s6, 16, %s1296_s26, [#allocation13]  }
 0x15a   : > { %s7330_s23 = scalar_lea.hbm %s7700_s20, 16 }
 0x15b   : > { %p7331_p13 = scmp.ne.s32.totalorder %s7700_s20, %s7330_s23  ;;  %p7337_p3 = scmp.lt.u32.totalorder %s7330_s23, %s7700_s20 }
 0x15d   : > { %p7333_p1 = pnand %p7331_p13, %p7941_p0 }
 0x15f   : > { %p7334_p2 = pneg %p7333_p1 }
 0x161   : > { %p7339_p4 = pnand %p7337_p3, %p7334_p2 }
 0x163   : > { %7342 = shalt.err (!%p7339_p4)
}
 0x164   : > { %s7343_s25 = scalar_lea.vmem %s1318_s1, 16  ;;  %s7350_s18 = scalar_lea.vmem %s1318_s1, 32 }
 0x165   : > { %p7344_p5 = scmp.ne.s32.totalorder %s1318_s1, %s7343_s25  ;;  %p7351_p10 = scmp.lt.s32.totalorder %s1318_s1, %s1318_s1 }
 0x166   : > { %p7352_p7 = scmp.lt.s32.totalorder %s7350_s18, %s7343_s25 }
 0x167   : > { %p7346_p6 = pnand %p7344_p5, %p7941_p0 }
 0x168   : > { %p7353_p8 = por %p7352_p7, %p7351_p10 }
 0x169   : > { %p7347_p9 = pneg %p7346_p6 }
 0x16b   : > { %p7354_p11 = pnand %p7353_p8, %p7347_p9 }
 0x16d   : > { %7357 = shalt.err (!%p7354_p11)
}
 0x16e   : > { %6826 = dma.hbm_to_vmem [thread:$0]  (!%p7929_p12), %s7700_s20, 16, %s1318_s1, [#allocation16]  }
 0x16f   : > { %s7598_s26 = smov [#allocation20]   ;;  %s7599_s22 = smov [#allocation23]  }
 0x170   : > { %s1339_s7 = sshll.u32 %s7598_s26, 4  ;;  %s1361_s13 = sshll.u32 %s7599_s22, 4  ;;  %s1340_s7 = int_to_ptr.vmem [resolvable:$true] %s1339_s7  ;;  %s1362_s13 = int_to_ptr.vmem [resolvable:$true] %s1361_s13 }
 0x171   : > { %s7358_s23 = scalar_lea.hbm %s8746_s4, 16 }
 0x172   : > { %p7359_p13 = scmp.ne.s32.totalorder %s8746_s4, %s7358_s23  ;;  %p7365_p3 = scmp.lt.u32.totalorder %s7358_s23, %s8746_s4 }
 0x174   : > { %p7361_p1 = pnand %p7359_p13, %p7941_p0 }
 0x176   : > { %p7362_p2 = pneg %p7361_p1 }
 0x178   : > { %p7367_p4 = pnand %p7365_p3, %p7362_p2 }
 0x17a   : > { %7370 = shalt.err (!%p7367_p4)
}
 0x17b   : > { %s7371_s25 = scalar_lea.vmem %s1340_s7, 16  ;;  %s7378_s1 = scalar_lea.vmem %s1340_s7, 32 }
 0x17c   : > { %p7372_p5 = scmp.ne.s32.totalorder %s1340_s7, %s7371_s25  ;;  %p7379_p10 = scmp.lt.s32.totalorder %s1340_s7, %s1340_s7 }
 0x17d   : > { %p7380_p7 = scmp.lt.s32.totalorder %s7378_s1, %s7371_s25 }
 0x17e   : > { %p7374_p6 = pnand %p7372_p5, %p7941_p0 }
 0x17f   : > { %p7381_p8 = por %p7380_p7, %p7379_p10 }
 0x180   : > { %p7375_p9 = pneg %p7374_p6 }
 0x182   : > { %p7382_p11 = pnand %p7381_p8, %p7375_p9 }
 0x184   : > { %7385 = shalt.err (!%p7382_p11)
}
 0x185   : > { %6832 = dma.hbm_to_vmem [thread:$0]  (!%p7929_p12), %s8746_s4, 16, %s1340_s7, [#allocation19]  }
 0x186   : > { %s7386_s18 = scalar_lea.hbm %s7720_s30, 16 }
 0x187   : > { %p7387_p13 = scmp.ne.s32.totalorder %s7720_s30, %s7386_s18  ;;  %p7393_p3 = scmp.lt.u32.totalorder %s7386_s18, %s7720_s30 }
 0x189   : > { %p7389_p1 = pnand %p7387_p13, %p7941_p0 }
 0x18b   : > { %p7390_p2 = pneg %p7389_p1 }
 0x18d   : > { %p7395_p4 = pnand %p7393_p3, %p7390_p2 }
 0x18f   : > { %7398 = shalt.err (!%p7395_p4)
}
 0x190   : > { %s7399_s26 = scalar_lea.vmem %s1362_s13, 16  ;;  %s7406_s22 = scalar_lea.vmem %s1362_s13, 32 }
 0x191   : > { %p7400_p5 = scmp.ne.s32.totalorder %s1362_s13, %s7399_s26  ;;  %p7407_p10 = scmp.lt.s32.totalorder %s1362_s13, %s1362_s13 }
 0x192   : > { %p7408_p7 = scmp.lt.s32.totalorder %s7406_s22, %s7399_s26 }
 0x193   : > { %p7402_p6 = pnand %p7400_p5, %p7941_p0 }
 0x194   : > { %p7409_p8 = por %p7408_p7, %p7407_p10 }
 0x195   : > { %p7403_p9 = pneg %p7402_p6 }
 0x197   : > { %p7410_p11 = pnand %p7409_p8, %p7403_p9 }
 0x199   : > { %7413 = shalt.err (!%p7410_p11)
}
 0x19a   : > { %6838 = dma.hbm_to_vmem [thread:$0]  (!%p7929_p12), %s7720_s30, 16, %s1362_s13, [#allocation22]  }
 0x19b   : > { %p8760_p13 = scmp.ne.s32.totalorder %s8757_s2, 0 }
 0x19c   : > { %p8761_p1 = scmp.eq.s32.totalorder (!%p8760_p13), %s7893_s0, 0 }
 0x19d   : > { %1462 = sbr.rel (%p8760_p13) target bundleno = 11353 (0x2c59), region = 208 }
 0x1a4   : > { %7487 = dma.done.wait (%p8761_p1), [#allocation4], 16   ;;  %p8762_p2 = pmov %p8761_p1 }
 0x1a5   : > { %p8763_p0 = pmov %p8761_p1 }
 0x1a6   : > { %7489 = vsyncadd (%p8762_p2), [#allocation4], 4294967280 }
 0x1a7   : > { %7491 = dma.done.wait (%p8763_p0), [#allocation7], 32   ;;  %p8764_p3 = pmov %p8763_p0 }
 0x1a8   : > { %p8765_p4 = pmov %p8763_p0 }
 0x1a9   : > { %7493 = vsyncadd (%p8764_p3), [#allocation7], 4294967264 }
 0x1aa   : > { %7495 = dma.done.wait (%p8765_p4), [#allocation10], 32   ;;  %p8766_p12 = pmov %p8763_p0 }
 0x1ab   : > { %p8767_p5 = pmov %p8763_p0 }
 0x1ac   : > { %7497 = vsyncadd (%p8766_p12), [#allocation10], 4294967264 }
 0x1ad   : > { %7499 = dma.done.wait (%p8767_p5), [#allocation13], 32   ;;  %p8768_p6 = pmov %p8763_p0 }
 0x1ae   : > { %p8769_p9 = pmov %p8763_p0 }
 0x1af   : > { %7501 = vsyncadd (%p8768_p6), [#allocation13], 4294967264 }
 0x1b0   : > { %7503 = dma.done.wait (%p8769_p9), [#allocation16], 32   ;;  %p8770_p10 = pmov %p8763_p0 }
 0x1b1   : > { %p8771_p7 = pmov %p8763_p0 }
 0x1b2   : > { %7505 = vsyncadd (%p8770_p10), [#allocation16], 4294967264 }
 0x1b3   : > { %7507 = dma.done.wait (%p8771_p7), [#allocation19], 32   ;;  %p8772_p8 = pmov %p8763_p0 }
 0x1b4   : > { %p8773_p11 = pmov %p8763_p0 }
 0x1b5   : > { %7509 = vsyncadd (%p8772_p8), [#allocation19], 4294967264 }
 0x1b6   : > { %7511 = dma.done.wait (%p8773_p11), [#allocation22], 32   ;;  %p8774_p13 = pmov %p8763_p0 }
 0x1b7   : > { %s8775_s11 = sld [smem:[#allocation36_spill]]  ;;  %p1633_p1 = scmp.lt.s32.totalorder %s7893_s0, 1  ;;  %v7600_v0 = vmov 0.0|0.0   ;;  %vm7601_vm0 = vmmov 0   ;;  %v7602_v1 = vmov 0.0   ;;  %v1641_v2 = vld [vmem:[%s8744_s8] sm:$0xff] }
 0x1b8   : > { %7513 = vsyncadd (%p8774_p13), [#allocation22], 4294967264  ;;  %6662 = vmatprep.subr.bf16.mxu1 %v7600_v0  ;;  %s8776_s2 = sld [smem:[#allocation71_spill]]  ;;  %6343 = vmatprep.mubr.msk.f32.mxu1 %vm7601_vm0, %v7602_v1  ;;  %s8777_s7 = sld [smem:[#allocation68_spill]]  ;;  %v1642_v3 = vld [vmem:[%s8744_s8 + $0x8] sm:$0xff]  ;;  %vm1650_vm1 = vcmask 130048  }
 0x1b9   : > { %s8120_s16 = scalar_select %p1633_p1, %s7893_s0, 1  ;;  %6362 = vmatprep.subr.mxu0 %v7602_v1  ;;  %6364 = vmatprep.mubr.msk.f32.mxu0 %vm7601_vm0, %v7602_v1  ;;  %v6663_v4 = vpack.c.bf16 %v1642_v3, %v1641_v2  ;;  %vm1733_vm2 = vcmask 64512   ;;  %vm1818_vm3 = vcmask 261120   ;;  %vm1892_vm4 = vcmask 785408  }
 0x1ba   : > { %s8778_s13 = sld [smem:[#allocation67_spill]]  ;;  %s8779_s1 = sld [smem:[#allocation70_spill]]  ;;  %vm3212_vm5 = vcmask 781312   ;;  %vm3292_vm6 = vcmask 27648   ;;  %vm3310_vm7 = vcmask 1043456   ;;  %vm3306_vm8 = vcmask 31744  }
 0x1bb   : > { %s6103_s23 = sshll.u32 %s8120_s16, 3  ;;  %6664 = vmatpush3.bf16.msra.mxu1 %v6663_v4  ;;  %s8780_s18 = sld [smem:[#allocation66_spill]]  ;;  %vm4190_vm9 = vcmask 257024   ;;  %vm4391_vm10 = vcmask 785664   ;;  %vm4473_vm11 = vcmask 60416  }
 0x1bc   : > { %6346 = vmatprep.subr.mxu1 %v7602_v1  ;;  %s8679_s26 = smov 120   ;;  %s8685_s22 = smov 96  }
 0x1bd   : > { %s1636_s25 = scalar_lea.vmem %s8775_s11, %s6103_s23  ;;  %s8681_s11 = smov 88  }
 0x1be   : > { %v1640_v5 = vld [vmem:[%s1636_s25] sm:$0xff]  ;;  %s8683_s23 = smov 64   ;;  %s8665_s25 = smov 80  }
 0x1bf   : > { %6344 = vmatmul.mubr.msk.f32.vlgmr.msra.gmra.mrb[0].mxu1 %vm1650_vm1, %v1640_v5  ;;  %v1725_v6 = vld [vmem:[%s8776_s2] sm:$0xff]  ;;  %s8781_s2 = sld [smem:[#allocation65_spill]]  ;;  %s8799_s3 = smov 112  }
 0x1c0   : > { %6348 = vmatprep.mubr.msk.f32.mxu1 %vm7601_vm0, %v7602_v1  ;;  %6347 = vmatpush3.msra.mxu1 %v1725_v6  ;;  %v6104_v7 = vld [vmem:[%s8777_s7] ss:$0 sm:$0xff]  ;;  %v1808_v9 = vld [vmem:[%s8778_s13 + $0x8] sm:$0xff]  ;;  %v1809_v15 = vld [vmem:[%s8778_s13 + $0x10] sm:$0xff]  ;;  %s8677_s7 = smov 56   ;;  %s8800_s4 = smov 80  }
 0x1c1   : > { %6665 = vmatprep.subr.bf16.mxu1 %v7600_v0  ;;  %v1807_v8 = vld [vmem:[%s8778_s13] sm:$0xff]  ;;  %v1810_v16 = vld [vmem:[%s8778_s13 + $0x18] sm:$0xff]  ;;  %s8802_s6 = smov 104   ;;  %s8803_s8 = smov 72  }
 0x1c2   : > { %v6666_v13 = vpack.c.bf16 %v1808_v9, %v1807_v8  ;;  %v6669_v17 = vpack.c.bf16 %v1810_v16, %v1809_v15  ;;  %v6106_v18 = vld [vmem:[%s8779_s1] ss:$0 sm:$0xff]  ;;  %s8667_s1 = smov 112   ;;  %s8804_s9 = sld [smem:[#allocation58_spill]] }
 0x1c3   : > { %v6108_v22 = vld [vmem:[%s8780_s18] ss:$0 sm:$0xff]  ;;  %s8669_s18 = smov 72   ;;  %s8806_s12 = smov 40  }
 0x1c4   : > { %s8807_s13 = sld [smem:[#allocation62_spill]]  ;;  %s8811_s14 = sld [smem:[#allocation43_spill]] }
 0x1c5   : > { %v2225_v46 = vld [vmem:[%s8781_s2 + $0x8] sm:$0xff]  ;;  %v2059_v55 = vld [vmem:[%s8781_s2] sm:$0xff]  ;;  %p8819_p0 = scmp.ne.s32.totalorder %s8754_s28, 0 }
 0x292   : > { %v1720_v10 = vpop.f32.mrb[0].mxu1 }
 0x293   : > { %v1721_v11 = vadd.f32 %v6104_v7, %v1720_v10  ;;  %v6345_v12 = vpop.f32.mrb[1].mxu1 }
 0x295   : > { %v1724_v14 = vmax.f32 %v1721_v11, 0.0 }
 0x297   : > { %6349 = vmatmul.mubr.msk.f32.vlgmr.msra.gmra.mrb[2].mxu1 %vm1733_vm2, %v1724_v14 }
 0x298   : > { %6667 = vmatpush3.bf16.msra.mxu1 %v6666_v13  ;;  %6359 = vmatprep.mubr.msk.f32.mxu1 %vm7601_vm0, %v7602_v1 }
 0x299   : > { %6668 = vmatprep.subr.bf16.mxu1 %v7600_v0 }
 0x29c   : > { %6670 = vmatpush3.bf16.msra.mxu1 %v6669_v17 }
 0x29d   : > { %6372 = vmatprep.subr.mxu1 %v7602_v1 }
 0x36a   : > { %v1803_v19 = vpop.f32.mrb[2].mxu1 }
 0x36b   : > { %v8145_v20 = vadd.f32 %v6106_v18, %v1803_v19  ;;  %v6350_v21 = vpop.f32.mrb[3].mxu1  ;;  %v2537_v19 = vld [vmem:[%s8781_s2 + $0x10] sm:$0xff] }
 0x36d   : > { %6360 = vmatmul.mubr.msk.f32.vlgmr.msra.gmra.mrb[4].mxu1 %vm1818_vm3, %v8145_v20 }
 0x36e   : > { %6374 = vmatprep.mubr.msk.f32.mxu1 %vm7601_vm0, %v7602_v1 }
 0x440   : > { %v1888_v23 = vpop.f32.mrb[4].mxu1 }
 0x441   : > { %v1889_v24 = vadd.f32 %v6108_v22, %v1888_v23  ;;  %v6361_v25 = vpop.f32.mrb[5].mxu1 }
 0x443   : > { %1893 = vst.msk [vmem:[#allocation2] sm:$0xff] %vm1892_vm4, %v1889_v24 }
 0x44a   : > { %v8153_v26 = vld [vmem:[#allocation2] sm:$0xff] }
 0x44b   : > { %2060 = vrot.lane.b32.xlu1 %v8153_v26, %s8679_s26  ;;  %1896 = vrot.lane.b32.xlu0 %v8153_v26, %s8685_s22  ;;  %s8790_s22 = sld [smem:[#allocation56_spill]] }
 0x44f   : > { %2062 = vrot.lane.b32.xlu0 %v8153_v26, %s8681_s11  ;;  %s8788_s11 = sld [smem:[#allocation60_spill]] }
 0x4bd   : > { %v1897_v27 = vpop.permute.xlu0 %1896  ;;  %v2061_v29 = vpop.permute.xlu1 %2060 }
 0x4be   : > { %6363 = vmatpush3.xpose.msk.msra.mxu0 %vm1733_vm2, %v1897_v27 }
 0x4bf   : > { %6367 = vmatprep.subr.mxu0 %v7602_v1 }
 0x4c1   : > { %6365 = vmatmul.mubr.msk.f32.vlgmr.msra.gmra.mrb[0].mxu0 %vm1733_vm2, %v8153_v26  ;;  %v2063_v28 = vpop.permute.xlu0 %2062 }
 0x4c2   : > { %6373 = vmatpush3.xpose.msk.msra.mxu1 %vm1733_vm2, %v2063_v28  ;;  %6369 = vmatprep.mubr.msk.f32.mxu0 %vm7601_vm0, %v7602_v1 }
 0x4c3   : > { %6382 = vmatprep.subr.mxu1 %v7602_v1 }
 0x4c5   : > { %6375 = vmatmul.mubr.msk.f32.vlgmr.msra.gmra.mrb[6].mxu1 %vm1733_vm2, %v2061_v29 }
 0x4c6   : > { %6384 = vmatprep.mubr.msk.f32.mxu1 %vm7601_vm0, %v7602_v1  ;;  %6383 = vmatpush3.msra.mxu1 %v2225_v46 }
 0x4c7   : > { %6392 = vmatprep.subr.mxu1 %v7602_v1 }
 0x594   : > { %v1968_v30 = vpop.f32.mrb[0].mxu0 }
 0x595   : > { %v6366_v31 = vpop.f32.mrb[1].mxu0  ;;  %v1972_v32 = vsel %vm1733_vm2, %v1968_v30, -inf }
 0x596   : > { %1973 = vmax.xlane.f32.xlu1 %v1972_v32 }
 0x598   : > { %v2134_v33 = vpop.f32.mrb[6].mxu1 }
 0x599   : > { %v6376_v34 = vpop.f32.mrb[7].mxu1  ;;  %v2138_v35 = vsel %vm1733_vm2, %v2134_v33, -inf }
 0x59a   : > { %2139 = vmax.xlane.f32.xlu0 %v2138_v35 }
 0x623   : > { %v1974_v36 = vpop.xlane.xlu1 %1973 }
 0x624   : > { %v1975_v37 = vsub.f32 %v1968_v30, %v1974_v36 }
 0x626   : > { %v1976_v38 = vmul.f32 1.442695, %v1975_v37 }
 0x627   : > { %v2140_v39 = vpop.xlane.xlu0 %2139 }
 0x628   : > { %6982 = vpow2.f32 %v1976_v38  ;;  %v2141_v40 = vsub.f32 %v2134_v33, %v2140_v39  ;;  %v2777_v33 = vld [vmem:[%s8781_s2 + $0x18] sm:$0xff]  ;;  %s8798_s2 = smov 56  }
 0x62a   : > { %v2142_v41 = vmul.f32 1.442695, %v2141_v40 }
 0x62c   : > { %6984 = vpow2.f32 %v2142_v41 }
 0x632   : > { %v6983_v42 = vpop.eup %6982 }
 0x633   : > { %v1978_v43 = vsel %vm1733_vm2, %v6983_v42, 0.0 }
 0x634   : > { %1979 = vadd.xlane.f32.xlu0 %v1978_v43 }
 0x636   : > { %v6985_v44 = vpop.eup %6984 }
 0x637   : > { %v2144_v45 = vsel %vm1733_vm2, %v6985_v44, 0.0 }
 0x638   : > { %2145 = vadd.xlane.f32.xlu1 %v2144_v45 }
 0x649   : > { %2149 = vrot.lane.b32.xlu1 %v8153_v26, %s8677_s7  ;;  %s8786_s7 = sld [smem:[#allocation53_spill]] }
 0x64a   : > { %1983 = vrot.lane.b32.xlu0 %v8153_v26, %s8683_s23  ;;  %s8789_s23 = sld [smem:[#allocation72_spill]] }
 0x64d   : > { %2374 = vrot.lane.b32.xlu1 %v8153_v26, %s8665_s25  ;;  %s8671_s25 = smov 104  }
 0x64e   : > { %2372 = vrot.lane.b32.xlu0 %v8153_v26, %s8667_s1  ;;  %s8675_s1 = smov 48  }
 0x64f   : > { %s8787_s26 = smov %s8786_s7 }
 0x6c1   : > { %v1980_v47 = vpop.xlane.xlu0 %1979 }
 0x6c2   : > { %6986 = vrcp.f32 %v1980_v47 }
 0x6c5   : > { %v2146_v48 = vpop.xlane.xlu1 %2145  ;;  %v1984_v49 = vpop.permute.xlu0 %1983 }
 0x6c6   : > { %6988 = vrcp.f32 %v2146_v48  ;;  %6368 = vmatpush3.msra.mxu0 %v1984_v49 }
 0x6c7   : > { %6377 = vmatprep.subr.mxu0 %v7602_v1 }
 0x6c9   : > { %v2150_v52 = vpop.permute.xlu1 %2149  ;;  %v2373_v61 = vpop.permute.xlu0 %2372 }
 0x6cc   : > { %v6987_v50 = vpop.eup %6986 }
 0x6cd   : > { %v1982_v51 = vmul.f32 %v6987_v50, %v6983_v42  ;;  %v2375_v59 = vpop.permute.xlu1 %2374 }
 0x6cf   : > { %6370 = vmatmul.mubr.msk.f32.vlgmr.msra.gmra.mrb[2].mxu0 %vm1733_vm2, %v1982_v51 }
 0x6d0   : > { %v6989_v53 = vpop.eup %6988  ;;  %6378 = vmatpush3.msra.mxu0 %v2150_v52  ;;  %6379 = vmatprep.mubr.msk.f32.mxu0 %vm7601_vm0, %v7602_v1 }
 0x6d1   : > { %v2148_v54 = vmul.f32 %v6989_v53, %v6985_v44  ;;  %6387 = vmatprep.subr.mxu0 %v7602_v1 }
 0x6d3   : > { %6380 = vmatmul.mubr.msk.f32.vlgmr.msra.gmra.mrb[4].mxu0 %vm1733_vm2, %v2148_v54 }
 0x6d4   : > { %6389 = vmatprep.mubr.msk.f32.mxu0 %vm7601_vm0, %v7602_v1  ;;  %6388 = vmatpush3.msra.mxu0 %v2059_v55 }
 0x6d5   : > { %6397 = vmatprep.subr.mxu0 %v7602_v1 }
 0x7a2   : > { %v2055_v56 = vpop.f32.mrb[2].mxu0 }
 0x7a3   : > { %v6371_v57 = vpop.f32.mrb[3].mxu0  ;;  %6390 = vmatmul.mubr.msk.f32.vlgmr.msra.gmra.mrb[6].mxu0 %vm1733_vm2, %v2055_v56 }
 0x7a4   : > { %6399 = vmatprep.mubr.msk.f32.mxu0 %vm7601_vm0, %v7602_v1 }
 0x7a6   : > { %v2221_v58 = vpop.f32.mrb[4].mxu0 }
 0x7a7   : > { %v6381_v60 = vpop.f32.mrb[5].mxu0  ;;  %6385 = vmatmul.mubr.msk.f32.vlgmr.msra.gmra.mrb[8].mxu1 %vm1733_vm2, %v2221_v58 }
 0x7a8   : > { %6393 = vmatpush3.xpose.msk.msra.mxu1 %vm1733_vm2, %v2375_v59  ;;  %6394 = vmatprep.mubr.msk.f32.mxu1 %vm7601_vm0, %v7602_v1 }
 0x7a9   : > { %6402 = vmatprep.subr.mxu1 %v7602_v1 }
 0x7ab   : > { %6395 = vmatmul.mubr.msk.f32.vlgmr.msra.gmra.mrb[10].mxu1 %vm1733_vm2, %v2373_v61 }
 0x7ac   : > { %6404 = vmatprep.mubr.msk.f32.mxu1 %vm7601_vm0, %v7602_v1  ;;  %6403 = vmatpush3.msra.mxu1 %v2537_v19  ;;  %v6128_v19 = vld [vmem:[%s8788_s11] ss:$0 sm:$0xff]  ;;  %s8791_s11 = sld [smem:[#allocation52_spill]] }
 0x7ad   : > { %6412 = vmatprep.subr.mxu1 %v7602_v1 }
 0x876   : > { %v2368_v62 = vpop.f32.mrb[6].mxu0 }
 0x877   : > { %v6391_v63 = vpop.f32.mrb[7].mxu0 }
 0x87a   : > { %v2295_v2 = vpop.f32.mrb[8].mxu1 }
 0x87b   : > { %v2369_v3 = vadd.f32 %v2368_v62, %v2295_v2  ;;  %v6386_v4 = vpop.f32.mrb[9].mxu1 }
 0x87e   : > { %v2446_v5 = vpop.f32.mrb[10].mxu1 }
 0x87f   : > { %v6396_v6 = vpop.f32.mrb[11].mxu1  ;;  %v2450_v7 = vsel %vm1733_vm2, %v2446_v5, -inf }
 0x880   : > { %2451 = vmax.xlane.f32.xlu1 %v2450_v7 }
 0x891   : > { %2614 = vrot.lane.b32.xlu1 %v8153_v26, %s8669_s18  ;;  %s8673_s18 = smov 40  }
 0x895   : > { %2612 = vrot.lane.b32.xlu1 %v8153_v26, %s8671_s25  ;;  %s8782_s25 = sld [smem:[#allocation64_spill]] }
 0x89b   : > { %v6126_v42 = vld [vmem:[%s8782_s25] ss:$0 sm:$0xff]  ;;  %s8785_s25 = sld [smem:[#allocation61_spill]] }
 0x90d   : > { %v2452_v8 = vpop.xlane.xlu1 %2451 }
 0x90e   : > { %v2453_v9 = vsub.f32 %v2446_v5, %v2452_v8 }
 0x910   : > { %v2454_v10 = vmul.f32 1.442695, %v2453_v9 }
 0x911   : > { %v2615_v16 = vpop.permute.xlu1 %2614 }
 0x912   : > { %6990 = vpow2.f32 %v2454_v10 }
 0x915   : > { %v2613_v18 = vpop.permute.xlu1 %2612 }
 0x91c   : > { %v6991_v11 = vpop.eup %6990 }
 0x91d   : > { %v2456_v12 = vsel %vm1733_vm2, %v6991_v11, 0.0 }
 0x91e   : > { %2457 = vadd.xlane.f32.xlu0 %v2456_v12 }
 0x934   : > { %2461 = vrot.lane.b32.xlu0 %v8153_v26, %s8675_s1  ;;  %s8784_s1 = sld [smem:[#allocation59_spill]] }
 0x93a   : > { %v2976_v58 = vld [vmem:[%s8784_s1] sm:$0xff]  ;;  %v2977_v59 = vld [vmem:[%s8784_s1 + $0x8] sm:$0xff]  ;;  %v2978_v60 = vld [vmem:[%s8784_s1 + $0x10] sm:$0xff] }
 0x93b   : > { %v6678_v61 = vpack.c.bf16 %v2977_v59, %v2976_v58  ;;  %v2979_v62 = vld [vmem:[%s8784_s1 + $0x18] sm:$0xff]  ;;  %v2980_v2 = vld [vmem:[%s8784_s1 + $0x20] sm:$0xff]  ;;  %v2982_v5 = vld [vmem:[%s8784_s1 + $0x30] sm:$0xff] }
 0x93c   : > { %v6681_v63 = vpack.c.bf16 %v2979_v62, %v2978_v60  ;;  %v2983_v6 = vld [vmem:[%s8784_s1 + $0x38] sm:$0xff]  ;;  %v2984_v8 = vld [vmem:[%s8784_s1 + $0x40] sm:$0xff]  ;;  %v2985_v9 = vld [vmem:[%s8784_s1 + $0x48] sm:$0xff] }
 0x93d   : > { %v6687_v7 = vpack.c.bf16 %v2983_v6, %v2982_v5  ;;  %v6690_v10 = vpack.c.bf16 %v2985_v9, %v2984_v8 }
 0x9ab   : > { %v2458_v13 = vpop.xlane.xlu0 %2457 }
 0x9ac   : > { %6992 = vrcp.f32 %v2458_v13 }
 0x9af   : > { %v2462_v14 = vpop.permute.xlu0 %2461 }
 0x9b0   : > { %6398 = vmatpush3.msra.mxu0 %v2462_v14 }
 0x9b1   : > { %6407 = vmatprep.subr.mxu0 %v7602_v1 }
 0x9b6   : > { %v6993_v15 = vpop.eup %6992 }
 0x9b7   : > { %v2460_v17 = vmul.f32 %v6993_v15, %v6991_v11  ;;  %v6127_v15 = vld [vmem:[%s8785_s25] ss:$0 sm:$0xff]  ;;  %s8795_s25 = smov 88  }
 0x9b9   : > { %6400 = vmatmul.mubr.msk.f32.vlgmr.msra.gmra.mrb[8].mxu0 %vm1733_vm2, %v2460_v17  ;;  %v3128_v17 = vld [vmem:[%s8786_s7] sm:$0xff]  ;;  %s8792_s7 = smov 96  }
 0x9ba   : > { %6408 = vmatpush3.xpose.msk.msra.mxu0 %vm1733_vm2, %v2615_v16  ;;  %6409 = vmatprep.mubr.msk.f32.mxu0 %vm7601_vm0, %v7602_v1 }
 0x9bb   : > { %6417 = vmatprep.subr.mxu0 %v7602_v1 }
 0x9bd   : > { %6410 = vmatmul.mubr.msk.f32.vlgmr.msra.gmra.mrb[10].mxu0 %vm1733_vm2, %v2613_v18  ;;  %v3129_v18 = vld [vmem:[%s8787_s26 + $0x8] sm:$0xff] }
 0x9be   : > { %6419 = vmatprep.mubr.msk.f32.mxu0 %vm7601_vm0, %v7602_v1  ;;  %6418 = vmatpush3.msra.mxu0 %v2777_v33 }
 0x9bf   : > { %6677 = vmatprep.subr.bf16.mxu0 %v7600_v0 }
 0xa8c   : > { %v2533_v21 = vpop.f32.mrb[8].mxu0 }
 0xa8d   : > { %v6401_v22 = vpop.f32.mrb[9].mxu0  ;;  %6405 = vmatmul.mubr.msk.f32.vlgmr.msra.gmra.mrb[12].mxu1 %vm1733_vm2, %v2533_v21 }
 0xa8e   : > { %6414 = vmatprep.mubr.msk.f32.mxu1 %vm7601_vm0, %v7602_v1  ;;  %v6696_v22 = vpack.c.bf16 %v3129_v18, %v3128_v17 }
 0xa90   : > { %v2686_v23 = vpop.f32.mrb[10].mxu0 }
 0xa91   : > { %v6411_v24 = vpop.f32.mrb[11].mxu0  ;;  %v2690_v25 = vsel %vm1733_vm2, %v2686_v23, -inf }
 0xa92   : > { %2691 = vmax.xlane.f32.xlu0 %v2690_v25  ;;  %v3130_v24 = vld [vmem:[%s8787_s26 + $0x10] sm:$0xff]  ;;  %v3131_v25 = vld [vmem:[%s8787_s26 + $0x18] sm:$0xff] }
 0xaa8   : > { %2701 = vrot.lane.b32.xlu0 %v8153_v26, %s8673_s18  ;;  %s8783_s18 = sld [smem:[#allocation57_spill]] }
 0xaae   : > { %v2891_v53 = vld [vmem:[%s8783_s18] sm:$0xff]  ;;  %v2892_v54 = vld [vmem:[%s8783_s18 + $0x8] sm:$0xff]  ;;  %v2894_v56 = vld [vmem:[%s8783_s18 + $0x18] sm:$0xff] }
 0xaaf   : > { %v6672_v55 = vpack.c.bf16 %v2892_v54, %v2891_v53 }
 0xb1f   : > { %v2692_v27 = vpop.xlane.xlu0 %2691 }
 0xb20   : > { %v2693_v28 = vsub.f32 %v2686_v23, %v2692_v27  ;;  %v6699_v27 = vpack.c.bf16 %v3131_v25, %v3130_v24 }
 0xb22   : > { %v2694_v29 = vmul.f32 1.442695, %v2693_v28  ;;  %v8281_v28 = vld [vmem:[%s8789_s23] sm:$0xf]  ;;  %s8794_s23 = smov 120  }
 0xb23   : > { %v2702_v30 = vpop.permute.xlu0 %2701 }
 0xb24   : > { %6994 = vpow2.f32 %v2694_v29  ;;  %6413 = vmatpush3.msra.mxu1 %v2702_v30  ;;  %v2986_v29 = vld [vmem:[%s8784_s1 + $0x50] sm:$0xff]  ;;  %v2987_v30 = vld [vmem:[%s8784_s1 + $0x58] sm:$0xff] }
 0xb25   : > { %6671 = vmatprep.subr.bf16.mxu1 %v7600_v0 }
 0xb2e   : > { %v6995_v31 = vpop.eup %6994 }
 0xb2f   : > { %v2696_v32 = vsel %vm1733_vm2, %v6995_v31, 0.0 }
 0xb30   : > { %2697 = vadd.xlane.f32.xlu1 %v2696_v32  ;;  %v6129_v32 = vld [vmem:[%s8790_s22] ss:$0 sm:$0xff]  ;;  %s8793_s22 = smov 64  }
 0xb60   : > { %v2607_v34 = vpop.f32.mrb[12].mxu1 }
 0xb61   : > { %v2611_v35 = vadd.f32 %v2607_v34, %v2369_v3  ;;  %v6406_v26 = vpop.f32.mrb[13].mxu1  ;;  %v2981_v3 = vld [vmem:[%s8784_s1 + $0x28] sm:$0xff] }
 0xb62   : > { %v6684_v4 = vpack.c.bf16 %v2981_v3, %v2980_v2 }
 0xbbd   : > { %v2698_v36 = vpop.xlane.xlu1 %2697 }
 0xbbe   : > { %6996 = vrcp.f32 %v2698_v36  ;;  %v6137_v36 = vld [vmem:[%s8791_s11] ss:$0 sm:$0xff]  ;;  %s8796_s11 = sld [smem:[#allocation51_spill]] }
 0xbc4   : > { %s8797_s1 = smov %s8796_s11  ;;  %v3550_v6 = vld [vmem:[%s8796_s11 + $0x8] sm:$0xff]  ;;  %s8801_s11 = smov 48  }
 0xbc8   : > { %v6997_v37 = vpop.eup %6996 }
 0xbc9   : > { %v2700_v38 = vmul.f32 %v6997_v37, %v6995_v31  ;;  %v6693_v31 = vpack.c.bf16 %v2987_v30, %v2986_v29 }
 0xbcb   : > { %6415 = vmatmul.mubr.msk.f32.vlgmr.msra.gmra.mrb[14].mxu1 %vm1733_vm2, %v2700_v38 }
 0xbcc   : > { %6430 = vmatprep.mubr.msk.f32.mxu1 %vm7601_vm0, %v7602_v1  ;;  %6673 = vmatpush3.bf16.msra.mxu1 %v6672_v55 }
 0xbcd   : > { %6674 = vmatprep.subr.bf16.mxu1 %v7600_v0 }
 0xc9e   : > { %v2773_v39 = vpop.f32.mrb[14].mxu1 }
 0xc9f   : > { %v6416_v40 = vpop.f32.mrb[15].mxu1  ;;  %6420 = vmatmul.mubr.msk.f32.vlgmr.msra.gmra.mrb[12].mxu0 %vm1733_vm2, %v2773_v39 }
 0xca0   : > { %6457 = vmatprep.mubr.msk.f32.mxu0 %vm7601_vm0, %v7602_v1  ;;  %6679 = vmatpush3.bf16.msra.mxu0 %v6678_v61 }
 0xca1   : > { %6680 = vmatprep.subr.bf16.mxu0 %v7600_v0 }
 0xca4   : > { %6682 = vmatpush3.bf16.msra.mxu0 %v6681_v63 }
 0xca5   : > { %6683 = vmatprep.subr.bf16.mxu0 %v7600_v0 }
 0xca8   : > { %6685 = vmatpush3.bf16.msra.mxu0 %v6684_v4 }
 0xca9   : > { %6686 = vmatprep.subr.bf16.mxu0 %v7600_v0 }
 0xcac   : > { %6688 = vmatpush3.bf16.msra.mxu0 %v6687_v7 }
 0xcad   : > { %6689 = vmatprep.subr.bf16.mxu0 %v7600_v0 }
 0xcb0   : > { %6691 = vmatpush3.bf16.msra.mxu0 %v6690_v10  ;;  %v3383_v10 = vld [vmem:[%s8797_s1] sm:$0xff] }
 0xcb1   : > { %6692 = vmatprep.subr.bf16.mxu0 %v7600_v0 }
 0xcb4   : > { %6694 = vmatpush3.bf16.msra.mxu0 %v6693_v31 }
 0xcb5   : > { %6486 = vmatprep.subr.mxu0 %v7602_v1 }
 0xd72   : > { %v2847_v41 = vpop.f32.mrb[12].mxu0 }
 0xd73   : > { %v2851_v43 = vadd.f32 %v2847_v41, %v2611_v35  ;;  %v6421_v44 = vpop.f32.mrb[13].mxu0 }
 0xd75   : > { %v2859_v45 = vadd.f32 %v6126_v42, %v2851_v43 }
 0xd77   : > { %v2860_v46 = vadd.f32 %v2859_v45, %v8145_v20  ;;  %v2893_v20 = vld [vmem:[%s8783_s18 + $0x10] sm:$0xff] }
 0xd78   : > { %v6675_v57 = vpack.c.bf16 %v2894_v56, %v2893_v20 }
 0xd79   : > { %v2863_v47 = vsel %vm1818_vm3, %v2860_v46, 0.0 }
 0xd7a   : > { %2864 = vadd.xlane.f32.xlu1 %v2863_v47  ;;  %6676 = vmatpush3.bf16.msra.mxu1 %v6675_v57 }
 0xd7b   : > { %6695 = vmatprep.subr.bf16.mxu1 %v7600_v0 }
 0xe07   : > { %v2865_v48 = vpop.xlane.xlu1 %2864 }
 0xe08   : > { %v2867_v49 = vmul.f32 0.03125, %v2865_v48 }
 0xe0a   : > { %v2868_v50 = vsub.f32 %v2860_v46, %v2867_v49 }
 0xe0c   : > { %v2869_v51 = vmul.f32 %v2868_v50, %v2868_v50 }
 0xe0e   : > { %v2870_v52 = vsel %vm1818_vm3, %v2869_v51, 0.0 }
 0xe0f   : > { %2871 = vadd.xlane.f32.xlu1 %v2870_v52 }
 0xe9c   : > { %v2872_v11 = vpop.xlane.xlu1 %2871 }
 0xe9d   : > { %v2873_v12 = vmul.f32 0.03125, %v2872_v11 }
 0xe9f   : > { %v2874_v13 = vadd.f32 1e-05, %v2873_v12 }
 0xea1   : > { %6998 = vrsqrt.f32 %v2874_v13 }
 0xeab   : > { %v6999_v14 = vpop.eup %6998 }
 0xeac   : > { %v2876_v16 = vmul.f32 %v6999_v14, %v2868_v50 }
 0xeae   : > { %v2883_v21 = vmul.f32 %v6127_v15, %v2876_v16 }
 0xeb0   : > { %v8271_v23 = vadd.f32 %v6128_v19, %v2883_v21 }
 0xeb2   : > { %6431 = vmatmul.mubr.msk.f32.vlgmr.msra.gmra.mrb[16].mxu1 %vm1818_vm3, %v8271_v23 }
 0xeb3   : > { %6697 = vmatpush3.bf16.msra.mxu1 %v6696_v22  ;;  %6468 = vmatprep.mubr.msk.f32.mxu1 %vm7601_vm0, %v7602_v1 }
 0xeb4   : > { %6698 = vmatprep.subr.bf16.mxu1 %v7600_v0 }
 0xeb7   : > { %6700 = vmatpush3.bf16.msra.mxu1 %v6699_v27 }
 0xeb8   : > { %6471 = vmatprep.subr.mxu1 %v7602_v1 }
 0xeba   : > { %6469 = vmatmul.mubr.msk.f32.vlgmr.msra.gmra.mrb[18].mxu1 %vm1818_vm3, %v8281_v28 }
 0xebb   : > { %6473 = vmatprep.mubr.msk.f32.mxu1 %vm7601_vm0, %v7602_v1 }
 0xf85   : > { %v2971_v33 = vpop.f32.mrb[16].mxu1 }
 0xf86   : > { %v2972_v34 = vadd.f32 %v6129_v32, %v2971_v33  ;;  %v6432_v35 = vpop.f32.mrb[17].mxu1 }
 0xf88   : > { %v2975_v26 = vmax.f32 %v2972_v34, 0.0 }
 0xf8a   : > { %6458 = vmatmul.mubr.msk.f32.vlgmr.msra.gmra.mrb[14].mxu0 %vm1892_vm4, %v2975_v26 }
 0xf8b   : > { %6488 = vmatprep.mubr.msk.f32.mxu0 %vm7601_vm0, %v7602_v1 }
 0xf8d   : > { %v3208_v37 = vpop.f32.mrb[18].mxu1 }
 0xf8e   : > { %v3209_v38 = vadd.f32 %v6137_v36, %v3208_v37  ;;  %v6470_v39 = vpop.f32.mrb[19].mxu1  ;;  %v3863_v37 = vld [vmem:[%s8797_s1 + $0x10] sm:$0xff] }
 0xf90   : > { %3213 = vst.msk [vmem:[#allocation2] sm:$0xf] %vm3212_vm5, %v3209_v38  ;;  %v6131_v38 = vld [vmem:[%s8804_s9] ss:$0 sm:$0xff]  ;;  %s8805_s9 = sld [smem:[#allocation63_spill]] }
 0xf97   : > { %v8296_v40 = vld [vmem:[#allocation2] sm:$0xf] }
 0xf98   : > { %3216 = vrot.lane.b32.xlu1 %v8296_v40, %s8792_s7 }
0x100a   : > { %v3217_v41 = vpop.permute.xlu1 %3216 }
0x100b   : > { %6472 = vmatpush3.xpose.msk.msra.mxu1 %vm1733_vm2, %v3217_v41 }
0x100c   : > { %6476 = vmatprep.subr.mxu1 %v7602_v1 }
0x100e   : > { %6474 = vmatmul.mubr.msk.f32.vlgmr.msra.gmra.mrb[20].mxu1 %vm1733_vm2, %v8296_v40 }
0x100f   : > { %6478 = vmatprep.mubr.msk.f32.mxu1 %vm7601_vm0, %v7602_v1 }
0x105d   : > { %v8306_v42 = vpop.f32.mrb[14].mxu0 }
0x105e   : > { %v6459_v43 = vpop.f32.mrb[15].mxu0  ;;  %v3065_v41 = vadd.f32 %v6131_v38, %v8306_v42 }
0x10e1   : > { %v3288_v44 = vpop.f32.mrb[20].mxu1 }
0x10e2   : > { %v6475_v45 = vpop.f32.mrb[21].mxu1  ;;  %v3293_v46 = vsel %vm3292_vm6, %v3288_v44, -inf }
0x10e3   : > { %3294 = vmax.xlane.f32.xlu0 %v3293_v46 }
0x10f9   : > { %3304 = vrot.lane.b32.xlu0 %v8296_v40, %s8793_s22 }
0x10fd   : > { %3384 = vrot.lane.b32.xlu0 %v8296_v40, %s8794_s23 }
0x1170   : > { %v3295_v47 = vpop.xlane.xlu0 %3294 }
0x1171   : > { %v3296_v48 = vsub.f32 %v3288_v44, %v3295_v47  ;;  %v3068_v47 = vadd.f32 %v3065_v41, %v8271_v23 }
0x1173   : > { %v3297_v49 = vmul.f32 1.442695, %v3296_v48  ;;  %v3071_v48 = vsel %vm1818_vm3, %v3068_v47, 0.0 }
0x1174   : > { %v3305_v50 = vpop.permute.xlu0 %3304 }
0x1175   : > { %7000 = vpow2.f32 %v3297_v49  ;;  %6477 = vmatpush3.msk.msra.mxu1 %vm3310_vm7, %v3305_v50 }
0x1176   : > { %6481 = vmatprep.subr.mxu1 %v7602_v1 }
0x1178   : > { %v3385_v56 = vpop.permute.xlu0 %3384 }
0x117f   : > { %v7001_v51 = vpop.eup %7000 }
0x1180   : > { %v3299_v52 = vsel %vm3292_vm6, %v7001_v51, 0.0 }
0x1181   : > { %3300 = vadd.xlane.f32.xlu1 %v3299_v52 }
0x1192   : > { %3386 = vrot.lane.b32.xlu1 %v8296_v40, %s8795_s25 }
0x120e   : > { %v3301_v53 = vpop.xlane.xlu1 %3300 }
0x120f   : > { %7002 = vrcp.f32 %v3301_v53 }
0x1212   : > { %v3387_v20 = vpop.permute.xlu1 %3386 }
0x1219   : > { %v7003_v54 = vpop.eup %7002 }
0x121a   : > { %v3303_v55 = vmul.f32 %v7003_v54, %v7001_v51 }
0x121c   : > { %6479 = vmatmul.mubr.msk.f32.vlgmr.msra.gmra.mrb[22].mxu1 %vm3306_vm8, %v3303_v55 }
0x121d   : > { %6482 = vmatpush3.xpose.msk.msra.mxu1 %vm1733_vm2, %v3387_v20  ;;  %6483 = vmatprep.mubr.msk.f32.mxu1 %vm7601_vm0, %v7602_v1 }
0x121e   : > { %6491 = vmatprep.subr.mxu1 %v7602_v1 }
0x1220   : > { %6484 = vmatmul.mubr.msk.f32.vlgmr.msra.gmra.mrb[24].mxu1 %vm1733_vm2, %v3385_v56 }
0x1221   : > { %6493 = vmatprep.mubr.msk.f32.mxu1 %vm7601_vm0, %v7602_v1  ;;  %6492 = vmatpush3.msra.mxu1 %v3550_v6  ;;  %v6134_v6 = vld [vmem:[%s8807_s13] ss:$0 sm:$0xff]  ;;  %s8808_s13 = sld [smem:[#allocation39_spill]] }
0x1222   : > { %6501 = vmatprep.subr.mxu1 %v7602_v1 }
0x12ef   : > { %v3379_v57 = vpop.f32.mrb[22].mxu1 }
0x12f0   : > { %v6480_v58 = vpop.f32.mrb[23].mxu1 }
0x12f3   : > { %v3458_v59 = vpop.f32.mrb[24].mxu1 }
0x12f4   : > { %v6485_v60 = vpop.f32.mrb[25].mxu1  ;;  %v3462_v61 = vsel %vm3292_vm6, %v3458_v59, -inf }
0x12f5   : > { %3463 = vmax.xlane.f32.xlu0 %v3462_v61 }
0x130b   : > { %3473 = vrot.lane.b32.xlu0 %v8296_v40, %s8798_s2 }
0x130f   : > { %3697 = vrot.lane.b32.xlu0 %v8296_v40, %s8799_s3 }
0x1382   : > { %v3464_v62 = vpop.xlane.xlu0 %3463 }
0x1383   : > { %v3465_v63 = vsub.f32 %v3458_v59, %v3464_v62 }
0x1385   : > { %v3466_v2 = vmul.f32 1.442695, %v3465_v63 }
0x1386   : > { %v3474_v3 = vpop.permute.xlu0 %3473 }
0x1387   : > { %7004 = vpow2.f32 %v3466_v2  ;;  %6487 = vmatpush3.msk.msra.mxu0 %vm3310_vm7, %v3474_v3  ;;  %v6133_v3 = vld [vmem:[%s8805_s9] ss:$0 sm:$0xff]  ;;  %s8809_s9 = sld [smem:[#allocation55_spill]] }
0x1388   : > { %6496 = vmatprep.subr.mxu0 %v7602_v1 }
0x138a   : > { %v3698_v14 = vpop.permute.xlu0 %3697 }
0x1391   : > { %v7005_v4 = vpop.eup %7004 }
0x1392   : > { %v3468_v5 = vsel %vm3292_vm6, %v7005_v4, 0.0 }
0x1393   : > { %3469 = vadd.xlane.f32.xlu1 %v3468_v5 }
0x13a4   : > { %3699 = vrot.lane.b32.xlu1 %v8296_v40, %s8800_s4 }
0x1420   : > { %v3470_v7 = vpop.xlane.xlu1 %3469 }
0x1421   : > { %7006 = vrcp.f32 %v3470_v7 }
0x1424   : > { %v3700_v12 = vpop.permute.xlu1 %3699 }
0x142b   : > { %v7007_v8 = vpop.eup %7006 }
0x142c   : > { %v3472_v9 = vmul.f32 %v7007_v8, %v7005_v4 }
0x142e   : > { %6489 = vmatmul.mubr.msk.f32.vlgmr.msra.gmra.mrb[16].mxu0 %vm3306_vm8, %v3472_v9 }
0x142f   : > { %6497 = vmatpush3.msra.mxu0 %v3383_v10  ;;  %6498 = vmatprep.mubr.msk.f32.mxu0 %vm7601_vm0, %v7602_v1  ;;  %v4104_v10 = vld [vmem:[%s8797_s1 + $0x18] sm:$0xff]  ;;  %s8810_s1 = sld [smem:[#allocation54_spill]] }
0x1430   : > { %6506 = vmatprep.subr.mxu0 %v7602_v1 }
0x1432   : > { %6499 = vmatmul.mubr.msk.f32.vlgmr.msra.gmra.mrb[18].mxu0 %vm1733_vm2, %v3379_v57 }
0x1433   : > { %6508 = vmatprep.mubr.msk.f32.mxu0 %vm7601_vm0, %v7602_v1 }
0x1501   : > { %v3546_v11 = vpop.f32.mrb[16].mxu0 }
0x1502   : > { %v6490_v13 = vpop.f32.mrb[17].mxu0  ;;  %6494 = vmatmul.mubr.msk.f32.vlgmr.msra.gmra.mrb[26].mxu1 %vm1733_vm2, %v3546_v11 }
0x1503   : > { %6502 = vmatpush3.xpose.msk.msra.mxu1 %vm1733_vm2, %v3700_v12  ;;  %6503 = vmatprep.mubr.msk.f32.mxu1 %vm7601_vm0, %v7602_v1 }
0x1504   : > { %6511 = vmatprep.subr.mxu1 %v7602_v1 }
0x1505   : > { %v3693_v15 = vpop.f32.mrb[18].mxu0 }
0x1506   : > { %v6500_v16 = vpop.f32.mrb[19].mxu0  ;;  %6504 = vmatmul.mubr.msk.f32.vlgmr.msra.gmra.mrb[28].mxu1 %vm1733_vm2, %v3698_v14 }
0x1507   : > { %6513 = vmatprep.mubr.msk.f32.mxu1 %vm7601_vm0, %v7602_v1  ;;  %6512 = vmatpush3.msra.mxu1 %v3863_v37  ;;  %v6159_v16 = vld [vmem:[#allocation23] ss:$0 sm:$0xff] }
0x1508   : > { %6521 = vmatprep.subr.mxu1 %v7602_v1 }
0x15d5   : > { %v3620_v17 = vpop.f32.mrb[26].mxu1 }
0x15d6   : > { %v3694_v18 = vadd.f32 %v3693_v15, %v3620_v17  ;;  %v6495_v19 = vpop.f32.mrb[27].mxu1 }
0x15d9   : > { %v3771_v21 = vpop.f32.mrb[28].mxu1 }
0x15da   : > { %v6505_v22 = vpop.f32.mrb[29].mxu1  ;;  %v3775_v24 = vsel %vm3292_vm6, %v3771_v21, -inf }
0x15db   : > { %3776 = vmax.xlane.f32.xlu0 %v3775_v24 }
0x15f1   : > { %3786 = vrot.lane.b32.xlu0 %v8296_v40, %s8801_s11 }
0x15f5   : > { %3938 = vrot.lane.b32.xlu0 %v8296_v40, %s8802_s6 }
0x1668   : > { %v3777_v25 = vpop.xlane.xlu0 %3776 }
0x1669   : > { %v3778_v27 = vsub.f32 %v3771_v21, %v3777_v25 }
0x166b   : > { %v3779_v29 = vmul.f32 1.442695, %v3778_v27 }
0x166c   : > { %v3787_v30 = vpop.permute.xlu0 %3786 }
0x166d   : > { %7008 = vpow2.f32 %v3779_v29  ;;  %6507 = vmatpush3.msk.msra.mxu0 %vm3310_vm7, %v3787_v30  ;;  %v4303_v29 = vld [vmem:[%s8808_s13] sm:$0xff]  ;;  %v4304_v30 = vld [vmem:[%s8808_s13 + $0x8] sm:$0xff] }
0x166e   : > { %6516 = vmatprep.subr.mxu0 %v7602_v1 }
0x1670   : > { %v3939_v36 = vpop.permute.xlu0 %3938 }
0x1677   : > { %v7009_v31 = vpop.eup %7008 }
0x1678   : > { %v3781_v32 = vsel %vm3292_vm6, %v7009_v31, 0.0 }
0x1679   : > { %3782 = vadd.xlane.f32.xlu1 %v3781_v32  ;;  %v4305_v32 = vld [vmem:[%s8808_s13 + $0x10] sm:$0xff] }
0x168a   : > { %3940 = vrot.lane.b32.xlu1 %v8296_v40, %s8803_s8 }
0x1706   : > { %v3783_v33 = vpop.xlane.xlu1 %3782 }
0x1707   : > { %7010 = vrcp.f32 %v3783_v33  ;;  %v4306_v33 = vld [vmem:[%s8808_s13 + $0x18] sm:$0xff] }
0x170a   : > { %v3941_v26 = vpop.permute.xlu1 %3940 }
0x1711   : > { %v7011_v34 = vpop.eup %7010 }
0x1712   : > { %v3785_v35 = vmul.f32 %v7011_v34, %v7009_v31  ;;  %v6708_v31 = vpack.c.bf16 %v4304_v30, %v4303_v29  ;;  %v6711_v34 = vpack.c.bf16 %v4306_v33, %v4305_v32 }
0x1714   : > { %6509 = vmatmul.mubr.msk.f32.vlgmr.msra.gmra.mrb[20].mxu0 %vm3306_vm8, %v3785_v35 }
0x1715   : > { %6517 = vmatpush3.xpose.msk.msra.mxu0 %vm1733_vm2, %v3941_v26  ;;  %6518 = vmatprep.mubr.msk.f32.mxu0 %vm7601_vm0, %v7602_v1 }
0x1716   : > { %6526 = vmatprep.subr.mxu0 %v7602_v1 }
0x1718   : > { %6519 = vmatmul.mubr.msk.f32.vlgmr.msra.gmra.mrb[22].mxu0 %vm1733_vm2, %v3939_v36 }
0x1719   : > { %6528 = vmatprep.mubr.msk.f32.mxu0 %vm7601_vm0, %v7602_v1  ;;  %6527 = vmatpush3.msra.mxu0 %v4104_v10 }
0x171a   : > { %6707 = vmatprep.subr.bf16.mxu0 %v7600_v0 }
0x17e7   : > { %v3859_v39 = vpop.f32.mrb[20].mxu0 }
0x17e8   : > { %v6510_v43 = vpop.f32.mrb[21].mxu0  ;;  %6514 = vmatmul.mubr.msk.f32.vlgmr.msra.gmra.mrb[30].mxu1 %vm1733_vm2, %v3859_v39 }
0x17e9   : > { %6523 = vmatprep.mubr.msk.f32.mxu1 %vm7601_vm0, %v7602_v1 }
0x17eb   : > { %v4012_v44 = vpop.f32.mrb[22].mxu0 }
0x17ec   : > { %v6520_v45 = vpop.f32.mrb[23].mxu0  ;;  %v4016_v46 = vsel %vm3292_vm6, %v4012_v44, -inf }
0x17ed   : > { %4017 = vmax.xlane.f32.xlu1 %v4016_v46  ;;  %v6136_v46 = vld [vmem:[%s8810_s1] ss:$0 sm:$0xff]  ;;  %s7614_s1 = smov 32  }
0x17f1   : > { %3072 = vadd.xlane.f32.xlu1 %v3071_v48 }
0x187a   : > { %v4018_v49 = vpop.xlane.xlu1 %4017 }
0x187b   : > { %v4019_v50 = vsub.f32 %v4012_v44, %v4018_v49  ;;  %v6135_v44 = vld [vmem:[%s8809_s9] ss:$0 sm:$0xff] }
0x187c   : > { %v4218_v49 = vld [vmem:[%s8811_s14] sm:$0xff] }
0x187d   : > { %v4020_v51 = vmul.f32 1.442695, %v4019_v50  ;;  %v4219_v50 = vld [vmem:[%s8811_s14 + $0x8] sm:$0xff] }
0x187e   : > { %v3073_v42 = vpop.xlane.xlu1 %3072 }
0x187f   : > { %7012 = vpow2.f32 %v4020_v51  ;;  %v3074_v52 = vmul.f32 0.03125, %v3073_v42  ;;  %v6702_v51 = vpack.c.bf16 %v4219_v50, %v4218_v49  ;;  %v4220_v42 = vld [vmem:[%s8811_s14 + $0x10] sm:$0xff] }
0x1881   : > { %v3075_v53 = vsub.f32 %v3068_v47, %v3074_v52  ;;  %v4221_v52 = vld [vmem:[%s8811_s14 + $0x18] sm:$0xff] }
0x1883   : > { %v3076_v54 = vmul.f32 %v3075_v53, %v3075_v53 }
0x1885   : > { %v3077_v55 = vsel %vm1818_vm3, %v3076_v54, 0.0 }
0x1886   : > { %3078 = vadd.xlane.f32.xlu1 %v3077_v55 }
0x1889   : > { %v7013_v20 = vpop.eup %7012 }
0x188a   : > { %v4022_v56 = vsel %vm3292_vm6, %v7013_v20, 0.0 }
0x188b   : > { %4023 = vadd.xlane.f32.xlu0 %v4022_v56 }
0x18a1   : > { %4027 = vrot.lane.b32.xlu0 %v8296_v40, %s8806_s12 }
0x18bb   : > { %v3933_v23 = vpop.f32.mrb[30].mxu1 }
0x18bc   : > { %v3937_v57 = vadd.f32 %v3933_v23, %v3694_v18  ;;  %v6515_v58 = vpop.f32.mrb[31].mxu1  ;;  %v6160_v23 = vld [vmem:[#allocation15] ss:$0 sm:$0xff] }
0x18bd   : > { %v6161_v58 = vld [vmem:[#allocation14] ss:$0 sm:$0xff] }
0x1913   : > { %v3079_v59 = vpop.xlane.xlu1 %3078 }
0x1914   : > { %v3080_v60 = vmul.f32 0.03125, %v3079_v59 }
0x1916   : > { %v3081_v61 = vadd.f32 1e-05, %v3080_v60 }
0x1918   : > { %7014 = vrsqrt.f32 %v3081_v61  ;;  %v4024_v62 = vpop.xlane.xlu0 %4023  ;;  %v6164_v61 = vld [vmem:[#allocation8] ss:$0 sm:$0xff] }
0x1919   : > { %7016 = vrcp.f32 %v4024_v62 }
0x191c   : > { %v4028_v63 = vpop.permute.xlu0 %4027 }
0x191d   : > { %6522 = vmatpush3.msk.msra.mxu1 %vm3310_vm7, %v4028_v63 }
0x191e   : > { %6701 = vmatprep.subr.bf16.mxu1 %v7600_v0 }
0x1922   : > { %v7015_v2 = vpop.eup %7014 }
0x1923   : > { %v7017_v4 = vpop.eup %7016  ;;  %v3083_v40 = vmul.f32 %v7015_v2, %v3075_v53  ;;  %v6705_v53 = vpack.c.bf16 %v4221_v52, %v4220_v42 }
0x1924   : > { %v4026_v5 = vmul.f32 %v7017_v4, %v7013_v20 }
0x1925   : > { %v3090_v7 = vmul.f32 %v6133_v3, %v3083_v40  ;;  %v6162_v3 = vld [vmem:[#allocation11] ss:$0 sm:$0xff] }
0x1926   : > { %6524 = vmatmul.mubr.msk.f32.vlgmr.msra.gmra.mrb[32].mxu1 %vm3306_vm8, %v4026_v5 }
0x1927   : > { %v3097_v8 = vadd.f32 %v6134_v6, %v3090_v7  ;;  %6539 = vmatprep.mubr.msk.f32.mxu1 %vm7601_vm0, %v7602_v1  ;;  %6703 = vmatpush3.bf16.msra.mxu1 %v6702_v51 }
0x1928   : > { %6704 = vmatprep.subr.bf16.mxu1 %v7600_v0 }
0x1929   : > { %v3100_v9 = vsel %vm1818_vm3, %v3097_v8, 0.0 }
0x192a   : > { %3101 = vadd.xlane.f32.xlu1 %v3100_v9 }
0x192b   : > { %6706 = vmatpush3.bf16.msra.mxu1 %v6705_v53 }
0x192c   : > { %6553 = vmatprep.subr.mxu1 %v7602_v1 }
0x19b7   : > { %v3102_v13 = vpop.xlane.xlu1 %3101 }
0x19b8   : > { %v3103_v14 = vmul.f32 0.03125, %v3102_v13 }
0x19ba   : > { %v3104_v19 = vsub.f32 %v3097_v8, %v3103_v14 }
0x19bc   : > { %v3105_v25 = vmul.f32 %v3104_v19, %v3104_v19 }
0x19be   : > { %v3106_v27 = vsel %vm1818_vm3, %v3105_v25, 0.0 }
0x19f9   : > { %v4100_v11 = vpop.f32.mrb[32].mxu1 }
0x19fa   : > { %v6525_v12 = vpop.f32.mrb[33].mxu1  ;;  %6529 = vmatmul.mubr.msk.f32.vlgmr.msra.gmra.mrb[24].mxu0 %vm1733_vm2, %v4100_v11 }
0x19fb   : > { %6550 = vmatprep.mubr.msk.f32.mxu0 %vm7601_vm0, %v7602_v1  ;;  %6709 = vmatpush3.bf16.msra.mxu0 %v6708_v31 }
0x19fc   : > { %6710 = vmatprep.subr.bf16.mxu0 %v7600_v0 }
0x19ff   : > { %6712 = vmatpush3.bf16.msra.mxu0 %v6711_v34 }
0x1a00   : > { %6558 = vmatprep.subr.mxu0 %v7602_v1 }
0x1acd   : > { %v4174_v15 = vpop.f32.mrb[24].mxu0 }
0x1ace   : > { %v4178_v17 = vadd.f32 %v4174_v15, %v3937_v57  ;;  %v6530_v18 = vpop.f32.mrb[25].mxu0 }
0x1ad0   : > { %v4186_v21 = vadd.f32 %v6159_v16, %v4178_v17 }
0x1ad2   : > { %v4187_v22 = vadd.f32 %v4186_v21, %v8281_v28 }
0x1ad4   : > { %v4191_v24 = vsel %vm4190_vm9, %v4187_v22, 0.0 }
0x1ad5   : > { %4192 = vadd.xlane.f32.xlu1 %v4191_v24 }
0x1ad9   : > { %3107 = vadd.xlane.f32.xlu1 %v3106_v27 }
0x1b62   : > { %v4193_v28 = vpop.xlane.xlu1 %4192 }
0x1b63   : > { %v4194_v35 = vmul.f32 0.03125, %v4193_v28 }
0x1b65   : > { %v4195_v26 = vsub.f32 %v4187_v22, %v4194_v35 }
0x1b66   : > { %v3108_v36 = vpop.xlane.xlu1 %3107 }
0x1b67   : > { %v3109_v37 = vmul.f32 0.03125, %v3108_v36  ;;  %v4196_v38 = vmul.f32 %v4195_v26, %v4195_v26 }
0x1b69   : > { %v3110_v39 = vadd.f32 1e-05, %v3109_v37  ;;  %v4197_v41 = vsel %vm4190_vm9, %v4196_v38, 0.0 }
0x1b6a   : > { %4198 = vadd.xlane.f32.xlu1 %v4197_v41 }
0x1b6b   : > { %7018 = vrsqrt.f32 %v3110_v39 }
0x1b75   : > { %v7019_v43 = vpop.eup %7018 }
0x1b76   : > { %v3112_v45 = vmul.f32 %v7019_v43, %v3104_v19 }
0x1b78   : > { %v3119_v47 = vmul.f32 %v6135_v44, %v3112_v45 }
0x1b7a   : > { %v3126_v48 = vadd.f32 %v6136_v46, %v3119_v47 }
0x1b7c   : > { %6551 = vmatmul.mubr.msk.f32.vlgmr.msra.gmra.mrb[26].mxu0 %vm1818_vm3, %v3126_v48 }
0x1b7d   : > { %6560 = vmatprep.mubr.msk.f32.mxu0 %vm7601_vm0, %v7602_v1 }
0x1bf7   : > { %v4199_v54 = vpop.xlane.xlu1 %4198 }
0x1bf8   : > { %v4200_v55 = vmul.f32 0.03125, %v4199_v54 }
0x1bfa   : > { %v4201_v20 = vadd.f32 1e-05, %v4200_v55 }
0x1bfc   : > { %7020 = vrsqrt.f32 %v4201_v20 }
0x1c06   : > { %v7021_v56 = vpop.eup %7020 }
0x1c07   : > { %v4203_v57 = vmul.f32 %v7021_v56, %v4195_v26 }
0x1c09   : > { %v4210_v59 = vmul.f32 %v6160_v23, %v4203_v57 }
0x1c0b   : > { %v8420_v60 = vadd.f32 %v6161_v58, %v4210_v59 }
0x1c0d   : > { %6540 = vmatmul.mubr.msk.f32.vlgmr.msra.gmra.mrb[34].mxu1 %vm1818_vm3, %v8420_v60 }
0x1c0e   : > { %6555 = vmatprep.mubr.msk.f32.mxu1 %vm7601_vm0, %v7602_v1 }
0x1c4f   : > { %v4383_v62 = vpop.f32.mrb[26].mxu0 }
0x1c50   : > { %v4384_v63 = vadd.f32 %v6164_v61, %v4383_v62  ;;  %v6552_v2 = vpop.f32.mrb[27].mxu0 }
0x1c52   : > { %4388 = vrot.lane.b32.xlu0 %v4384_v63, %s7614_s1 }
0x1cc4   : > { %v4389_v6 = vpop.permute.xlu0 %4388 }
0x1ce0   : > { %v4298_v4 = vpop.f32.mrb[34].mxu1 }
0x1ce1   : > { %v4299_v40 = vadd.f32 %v6162_v3, %v4298_v4  ;;  %v6541_v5 = vpop.f32.mrb[35].mxu1 }
0x1ce3   : > { %4302 = vst.msk [vmem:[#allocation2] sm:$0xf] %vm4190_vm9, %v4299_v40 }
0x1ce4   : > { %4392 = vst.msk [vmem:[#allocation2] sm:$0xff] %vm4391_vm10, %v4389_v6 }
0x1ceb   : > { %v8427_v7 = vld [vmem:[#allocation2] sm:$0xff] }
0x1cec   : > { %4564 = vrot.lane.b32.xlu0 %v8427_v7, %s8795_s25  ;;  %4396 = vrot.lane.b32.xlu1 %v8427_v7, %s8792_s7  ;;  %v8433_v8 = vld [vmem:[#allocation2] sm:$0xf]  ;;  %s8812_s7 = sld [smem:[#allocation41_spill]] }
0x1cf0   : > { %4562 = vrot.lane.b32.xlu0 %v8433_v8, %s8794_s23 }
0x1cf2   : > { %s8813_s23 = smov %s8812_s7  ;;  %v4727_v32 = vld [vmem:[%s8812_s7 + $0x8] sm:$0xff] }
0x1cf3   : > { %v4561_v39 = vld [vmem:[%s8813_s23] sm:$0xff]  ;;  %v5039_v3 = vld [vmem:[%s8813_s23 + $0x10] sm:$0xff] }
0x1d5e   : > { %v4397_v9 = vpop.permute.xlu1 %4396  ;;  %v4565_v10 = vpop.permute.xlu0 %4564 }
0x1d5f   : > { %6554 = vmatpush3.xpose.msk.msra.mxu1 %vm1733_vm2, %v4397_v9 }
0x1d60   : > { %6563 = vmatprep.subr.mxu1 %v7602_v1 }
0x1d62   : > { %6556 = vmatmul.mubr.msk.f32.vlgmr.msra.gmra.mrb[36].mxu1 %vm1733_vm2, %v8433_v8  ;;  %v4563_v11 = vpop.permute.xlu0 %4562 }
0x1d63   : > { %6564 = vmatpush3.xpose.msk.msra.mxu1 %vm1733_vm2, %v4565_v10  ;;  %6565 = vmatprep.mubr.msk.f32.mxu1 %vm7601_vm0, %v7602_v1 }
0x1d64   : > { %6573 = vmatprep.subr.mxu1 %v7602_v1 }
0x1d66   : > { %6566 = vmatmul.mubr.msk.f32.vlgmr.msra.gmra.mrb[38].mxu1 %vm1733_vm2, %v4563_v11 }
0x1d67   : > { %6575 = vmatprep.mubr.msk.f32.mxu1 %vm7601_vm0, %v7602_v1  ;;  %6574 = vmatpush3.msra.mxu1 %v4727_v32 }
0x1d68   : > { %6583 = vmatprep.subr.mxu1 %v7602_v1 }
0x1e35   : > { %v4469_v12 = vpop.f32.mrb[36].mxu1 }
0x1e36   : > { %v6557_v13 = vpop.f32.mrb[37].mxu1  ;;  %v4474_v14 = vsel %vm4473_vm11, %v4469_v12, -inf }
0x1e37   : > { %4475 = vmax.xlane.f32.xlu0 %v4474_v14  ;;  %v5279_v14 = vld [vmem:[%s8813_s23 + $0x18] sm:$0xff] }
0x1e39   : > { %v4636_v15 = vpop.f32.mrb[38].mxu1 }
0x1e3a   : > { %v6567_v16 = vpop.f32.mrb[39].mxu1  ;;  %v4640_v17 = vsel %vm4473_vm11, %v4636_v15, -inf }
0x1e3b   : > { %4641 = vmax.xlane.f32.xlu1 %v4640_v17 }
0x1e4c   : > { %4651 = vrot.lane.b32.xlu1 %v8427_v7, %s8798_s2  ;;  %s8559_s2 = sand.u32 1, %s7528_s10  }
0x1e4d   : > { %s5752_s7 = scalar_lea.sflag [#allocation5], %s8559_s2 }
0x1e50   : > { %4874 = vrot.lane.b32.xlu1 %v8433_v8, %s8799_s3  ;;  %s8814_s3 = sld [smem:[#allocation45_spill]] }
0x1ec4   : > { %v4476_v18 = vpop.xlane.xlu0 %4475 }
0x1ec5   : > { %v4477_v19 = vsub.f32 %v4469_v12, %v4476_v18 }
0x1ec7   : > { %v4478_v21 = vmul.f32 1.442695, %v4477_v19 }
0x1ec8   : > { %v4642_v22 = vpop.xlane.xlu1 %4641 }
0x1ec9   : > { %7022 = vpow2.f32 %v4478_v21  ;;  %v4643_v24 = vsub.f32 %v4636_v15, %v4642_v22 }
0x1ecb   : > { %v4644_v25 = vmul.f32 1.442695, %v4643_v24 }
0x1ecc   : > { %v4652_v36 = vpop.permute.xlu1 %4651 }
0x1ecd   : > { %7024 = vpow2.f32 %v4644_v25 }
0x1ed0   : > { %v4875_v47 = vpop.permute.xlu1 %4874 }
0x1ed3   : > { %v7023_v27 = vpop.eup %7022 }
0x1ed4   : > { %v4480_v29 = vsel %vm4473_vm11, %v7023_v27, 0.0 }
0x1ed5   : > { %4481 = vadd.xlane.f32.xlu0 %v4480_v29 }
0x1ed7   : > { %v7025_v30 = vpop.eup %7024 }
0x1ed8   : > { %v4646_v31 = vsel %vm4473_vm11, %v7025_v30, 0.0 }
0x1ed9   : > { %4647 = vadd.xlane.f32.xlu0 %v4646_v31 }
0x1eef   : > { %4485 = vrot.lane.b32.xlu0 %v8427_v7, %s8793_s22  ;;  %s8699_s22 = sshll.u32 %s8559_s2, 2 }
0x1ef0   : > { %s1625_s25 = scalar_lea.vmem [#allocation24], %s8699_s22 }
0x1ef1   : > { %s5773_s9 = sshll.u32 %s1625_s25, 4  ;;  %s5774_s9 = int_to_ptr.vmem [resolvable:$true] %s5773_s9 }
0x1ef3   : > { %4876 = vrot.lane.b32.xlu0 %v8427_v7, %s8800_s4  ;;  %s8818_s4 = sld [smem:[#allocation75_spill]] }
0x1f62   : > { %v4482_v33 = vpop.xlane.xlu0 %4481 }
0x1f63   : > { %7026 = vrcp.f32 %v4482_v33 }
0x1f66   : > { %v4648_v34 = vpop.xlane.xlu0 %4647 }
0x1f67   : > { %7028 = vrcp.f32 %v4648_v34 }
0x1f6a   : > { %v4486_v28 = vpop.permute.xlu0 %4485 }
0x1f6b   : > { %6559 = vmatpush3.msra.mxu0 %v4486_v28 }
0x1f6c   : > { %6568 = vmatprep.subr.mxu0 %v7602_v1 }
0x1f6d   : > { %v7027_v35 = vpop.eup %7026 }
0x1f6e   : > { %v4484_v26 = vmul.f32 %v7027_v35, %v7023_v27  ;;  %v4877_v45 = vpop.permute.xlu0 %4876  ;;  %v6182_v27 = vld [vmem:[#allocation9] ss:$0 sm:$0xff] }
0x1f70   : > { %6561 = vmatmul.mubr.msk.f32.vlgmr.msra.gmra.mrb[28].mxu0 %vm1733_vm2, %v4484_v26 }
0x1f71   : > { %v7029_v37 = vpop.eup %7028  ;;  %6569 = vmatpush3.msra.mxu0 %v4652_v36  ;;  %6570 = vmatprep.mubr.msk.f32.mxu0 %vm7601_vm0, %v7602_v1 }
0x1f72   : > { %v4650_v38 = vmul.f32 %v7029_v37, %v7025_v30  ;;  %6578 = vmatprep.subr.mxu0 %v7602_v1  ;;  %v5392_v37 = vld [vmem:[%s8814_s3] sm:$0xff] }
0x1f74   : > { %6571 = vmatmul.mubr.msk.f32.vlgmr.msra.gmra.mrb[30].mxu0 %vm1733_vm2, %v4650_v38  ;;  %v5393_v38 = vld [vmem:[%s8814_s3 + $0x8] sm:$0xff] }
0x1f75   : > { %6580 = vmatprep.mubr.msk.f32.mxu0 %vm7601_vm0, %v7602_v1  ;;  %6579 = vmatpush3.msra.mxu0 %v4561_v39  ;;  %v6714_v39 = vpack.c.bf16 %v5393_v38, %v5392_v37 }
0x1f76   : > { %6588 = vmatprep.subr.mxu0 %v7602_v1 }
0x2043   : > { %v4557_v41 = vpop.f32.mrb[28].mxu0 }
0x2044   : > { %v6562_v43 = vpop.f32.mrb[29].mxu0  ;;  %6581 = vmatmul.mubr.msk.f32.vlgmr.msra.gmra.mrb[32].mxu0 %vm1733_vm2, %v4557_v41  ;;  %v5395_v41 = vld [vmem:[%s8814_s3 + $0x18] sm:$0xff] }
0x2045   : > { %6590 = vmatprep.mubr.msk.f32.mxu0 %vm7601_vm0, %v7602_v1 }
0x2047   : > { %v4723_v44 = vpop.f32.mrb[30].mxu0 }
0x2048   : > { %v6572_v46 = vpop.f32.mrb[31].mxu0  ;;  %6576 = vmatmul.mubr.msk.f32.vlgmr.msra.gmra.mrb[40].mxu1 %vm1733_vm2, %v4723_v44 }
0x2049   : > { %6584 = vmatpush3.xpose.msk.msra.mxu1 %vm1733_vm2, %v4877_v45  ;;  %6585 = vmatprep.mubr.msk.f32.mxu1 %vm7601_vm0, %v7602_v1 }
0x204a   : > { %6593 = vmatprep.subr.mxu1 %v7602_v1 }
0x204c   : > { %6586 = vmatmul.mubr.msk.f32.vlgmr.msra.gmra.mrb[42].mxu1 %vm1733_vm2, %v4875_v47 }
0x204d   : > { %6595 = vmatprep.mubr.msk.f32.mxu1 %vm7601_vm0, %v7602_v1  ;;  %6594 = vmatpush3.msra.mxu1 %v5039_v3 }
0x204e   : > { %6603 = vmatprep.subr.mxu1 %v7602_v1 }
0x2117   : > { %v4870_v48 = vpop.f32.mrb[32].mxu0 }
0x2118   : > { %v6582_v49 = vpop.f32.mrb[33].mxu0 }
0x211b   : > { %v4797_v50 = vpop.f32.mrb[40].mxu1 }
0x211c   : > { %v4871_v51 = vadd.f32 %v4870_v48, %v4797_v50  ;;  %v6577_v42 = vpop.f32.mrb[41].mxu1 }
0x211f   : > { %v4948_v52 = vpop.f32.mrb[42].mxu1 }
0x2120   : > { %v6587_v53 = vpop.f32.mrb[43].mxu1  ;;  %v4952_v54 = vsel %vm4473_vm11, %v4948_v52, -inf }
0x2121   : > { %4953 = vmax.xlane.f32.xlu0 %v4952_v54 }
0x2137   : > { %4963 = vrot.lane.b32.xlu0 %v8427_v7, %s8801_s11  ;;  %s6197_s11 = sshll.u32 %s7893_s0, 6 }
0x2138   : > { %s8572_s1 = scalar_lea.hbm %s7865_s19, %s6197_s11 }
0x213b   : > { %5114 = vrot.lane.b32.xlu0 %v8433_v8, %s8802_s6  ;;  %s8816_s6 = sld [smem:[#allocation44_spill]] }
0x21ae   : > { %v4954_v55 = vpop.xlane.xlu0 %4953 }
0x21af   : > { %v4955_v20 = vsub.f32 %v4948_v52, %v4954_v55 }
0x21b1   : > { %v4956_v56 = vmul.f32 1.442695, %v4955_v20 }
0x21b2   : > { %v4964_v23 = vpop.permute.xlu0 %4963 }
0x21b3   : > { %7030 = vpow2.f32 %v4956_v56  ;;  %6589 = vmatpush3.msra.mxu0 %v4964_v23 }
0x21b4   : > { %6598 = vmatprep.subr.mxu0 %v7602_v1 }
0x21b6   : > { %v5115_v2 = vpop.permute.xlu0 %5114 }
0x21bd   : > { %v7031_v57 = vpop.eup %7030 }
0x21be   : > { %v4958_v58 = vsel %vm4473_vm11, %v7031_v57, 0.0 }
0x21bf   : > { %4959 = vadd.xlane.f32.xlu1 %v4958_v58 }
0x21d0   : > { %5116 = vrot.lane.b32.xlu1 %v8427_v7, %s8803_s8  ;;  %s8815_s8 = sld [smem:[#allocation46_spill]] }
0x21d6   : > { %v5477_v44 = vld [vmem:[%s8815_s8] sm:$0xff]  ;;  %v5478_v45 = vld [vmem:[%s8815_s8 + $0x8] sm:$0xff]  ;;  %v5479_v46 = vld [vmem:[%s8815_s8 + $0x10] sm:$0xff] }
0x21d7   : > { %v6720_v47 = vpack.c.bf16 %v5478_v45, %v5477_v44  ;;  %v5480_v48 = vld [vmem:[%s8815_s8 + $0x18] sm:$0xff]  ;;  %v5481_v50 = vld [vmem:[%s8815_s8 + $0x20] sm:$0xff]  ;;  %v5483_v52 = vld [vmem:[%s8815_s8 + $0x30] sm:$0xff] }
0x21d8   : > { %v6723_v49 = vpack.c.bf16 %v5480_v48, %v5479_v46  ;;  %v5484_v53 = vld [vmem:[%s8815_s8 + $0x38] sm:$0xff]  ;;  %v5485_v55 = vld [vmem:[%s8815_s8 + $0x40] sm:$0xff]  ;;  %v5486_v20 = vld [vmem:[%s8815_s8 + $0x48] sm:$0xff] }
0x21d9   : > { %v6729_v54 = vpack.c.bf16 %v5484_v53, %v5483_v52  ;;  %v6732_v56 = vpack.c.bf16 %v5486_v20, %v5485_v55 }
0x224c   : > { %v4960_v59 = vpop.xlane.xlu1 %4959 }
0x224d   : > { %7032 = vrcp.f32 %v4960_v59 }
0x2250   : > { %v5117_v63 = vpop.permute.xlu1 %5116 }
0x2257   : > { %v7033_v61 = vpop.eup %7032 }
0x2258   : > { %v4962_v62 = vmul.f32 %v7033_v61, %v7031_v57  ;;  %v6183_v61 = vld [vmem:[#allocation18] ss:$0 sm:$0xff] }
0x225a   : > { %6591 = vmatmul.mubr.msk.f32.vlgmr.msra.gmra.mrb[34].mxu0 %vm1733_vm2, %v4962_v62 }
0x225b   : > { %6599 = vmatpush3.xpose.msk.msra.mxu0 %vm1733_vm2, %v5117_v63  ;;  %6600 = vmatprep.mubr.msk.f32.mxu0 %vm7601_vm0, %v7602_v1  ;;  %v6184_v63 = vld [vmem:[#allocation17] ss:$0 sm:$0xff] }
0x225c   : > { %6608 = vmatprep.subr.mxu0 %v7602_v1 }
0x225e   : > { %6601 = vmatmul.mubr.msk.f32.vlgmr.msra.gmra.mrb[36].mxu0 %vm1733_vm2, %v5115_v2 }
0x225f   : > { %6610 = vmatprep.mubr.msk.f32.mxu0 %vm7601_vm0, %v7602_v1  ;;  %6609 = vmatpush3.msra.mxu0 %v5279_v14 }
0x2260   : > { %6719 = vmatprep.subr.bf16.mxu0 %v7600_v0 }
0x232d   : > { %v5035_v4 = vpop.f32.mrb[34].mxu0 }
0x232e   : > { %v6592_v40 = vpop.f32.mrb[35].mxu0  ;;  %6596 = vmatmul.mubr.msk.f32.vlgmr.msra.gmra.mrb[44].mxu1 %vm1733_vm2, %v5035_v4  ;;  %v5487_v4 = vld [vmem:[%s8815_s8 + $0x50] sm:$0xff] }
0x232f   : > { %6605 = vmatprep.mubr.msk.f32.mxu1 %vm7601_vm0, %v7602_v1  ;;  %v5488_v40 = vld [vmem:[%s8815_s8 + $0x58] sm:$0xff] }
0x2331   : > { %v5188_v5 = vpop.f32.mrb[36].mxu0 }
0x2332   : > { %v6602_v6 = vpop.f32.mrb[37].mxu0  ;;  %v5192_v8 = vsel %vm4473_vm11, %v5188_v5, -inf }
0x2333   : > { %5193 = vmax.xlane.f32.xlu1 %v5192_v8  ;;  %v6185_v6 = vld [vmem:[%s8816_s6] ss:$0 sm:$0xff]  ;;  %s7414_s6 = scalar_lea.vmem %s5774_s9, 64 }
0x2334   : > { %p7415_p2 = scmp.ne.s32.totalorder %s5774_s9, %s7414_s6 }
0x2336   : > { %p7416_p3 = pnand %p7415_p2, %p8819_p0 }
0x2338   : > { %p7417_p4 = pneg %p7416_p3 }
0x23c0   : > { %v5194_v9 = vpop.xlane.xlu1 %5193 }
0x23c1   : > { %v5195_v10 = vsub.f32 %v5188_v5, %v5194_v9  ;;  %v6735_v5 = vpack.c.bf16 %v5488_v40, %v5487_v4 }
0x23c3   : > { %v5196_v11 = vmul.f32 1.442695, %v5195_v10 }
0x23c5   : > { %7034 = vpow2.f32 %v5196_v11 }
0x23cf   : > { %v7035_v12 = vpop.eup %7034 }
0x23d0   : > { %v5198_v13 = vsel %vm4473_vm11, %v7035_v12, 0.0 }
0x23d1   : > { %5199 = vadd.xlane.f32.xlu0 %v5198_v13 }
0x23e7   : > { %5203 = vrot.lane.b32.xlu0 %v8427_v7, %s8806_s12  ;;  %s8817_s12 = sld [smem:[#allocation76_spill]] }
0x23ed   : > { %v5628_v38 = vld [vmem:[%s8817_s12] sm:$0xff] }
0x2401   : > { %v5109_v15 = vpop.f32.mrb[44].mxu1 }
0x2402   : > { %v5113_v16 = vadd.f32 %v5109_v15, %v4871_v51  ;;  %v6597_v17 = vpop.f32.mrb[45].mxu1  ;;  %v5482_v51 = vld [vmem:[%s8815_s8 + $0x28] sm:$0xff] }
0x2403   : > { %v6726_v42 = vpack.c.bf16 %v5482_v51, %v5481_v50 }
0x245e   : > { %v5200_v18 = vpop.xlane.xlu0 %5199 }
0x245f   : > { %7036 = vrcp.f32 %v5200_v18 }
0x2462   : > { %v5204_v19 = vpop.permute.xlu0 %5203 }
0x2463   : > { %6604 = vmatpush3.msra.mxu1 %v5204_v19 }
0x2464   : > { %6713 = vmatprep.subr.bf16.mxu1 %v7600_v0 }
0x2469   : > { %v7037_v21 = vpop.eup %7036 }
0x246a   : > { %v5202_v22 = vmul.f32 %v7037_v21, %v7035_v12  ;;  %v6187_v12 = vld [vmem:[#allocation12] ss:$0 sm:$0xff] }
0x246c   : > { %6606 = vmatmul.mubr.msk.f32.vlgmr.msra.gmra.mrb[46].mxu1 %vm1733_vm2, %v5202_v22 }
0x246d   : > { %6621 = vmatprep.mubr.msk.f32.mxu1 %vm7601_vm0, %v7602_v1  ;;  %6715 = vmatpush3.bf16.msra.mxu1 %v6714_v39  ;;  %v5629_v39 = vld [vmem:[%s8817_s12 + $0x8] sm:$0xff] }
0x246e   : > { %6716 = vmatprep.subr.bf16.mxu1 %v7600_v0 }
0x253f   : > { %v5275_v7 = vpop.f32.mrb[46].mxu1 }
0x2540   : > { %v6607_v24 = vpop.f32.mrb[47].mxu1  ;;  %6611 = vmatmul.mubr.msk.f32.vlgmr.msra.gmra.mrb[38].mxu0 %vm1733_vm2, %v5275_v7 }
0x2541   : > { %6648 = vmatprep.mubr.msk.f32.mxu0 %vm7601_vm0, %v7602_v1  ;;  %6721 = vmatpush3.bf16.msra.mxu0 %v6720_v47 }
0x2542   : > { %6722 = vmatprep.subr.bf16.mxu0 %v7600_v0 }
0x2545   : > { %6724 = vmatpush3.bf16.msra.mxu0 %v6723_v49  ;;  %v6191_v49 = vld [vmem:[#allocation6] ss:$0 sm:$0xff] }
0x2546   : > { %6725 = vmatprep.subr.bf16.mxu0 %v7600_v0 }
0x2549   : > { %6727 = vmatpush3.bf16.msra.mxu0 %v6726_v42  ;;  %v5712_v42 = vld [vmem:[%s8818_s4] sm:$0xf]  ;;  %s7615_s4 = smov [#allocation24]  }
0x254a   : > { %6728 = vmatprep.subr.bf16.mxu0 %v7600_v0 }
0x254d   : > { %6730 = vmatpush3.bf16.msra.mxu0 %v6729_v54 }
0x254e   : > { %6731 = vmatprep.subr.bf16.mxu0 %v7600_v0 }
0x2551   : > { %6733 = vmatpush3.bf16.msra.mxu0 %v6732_v56 }
0x2552   : > { %6734 = vmatprep.subr.bf16.mxu0 %v7600_v0 }
0x2555   : > { %6736 = vmatpush3.bf16.msra.mxu0 %v6735_v5 }
0x2613   : > { %v5349_v25 = vpop.f32.mrb[38].mxu0 }
0x2614   : > { %v5353_v29 = vadd.f32 %v5349_v25, %v5113_v16  ;;  %v6612_v30 = vpop.f32.mrb[39].mxu0 }
0x2616   : > { %v5361_v31 = vadd.f32 %v6182_v27, %v5353_v29  ;;  %v6189_v29 = vld [vmem:[#allocation21] ss:$0 sm:$0xff] }
0x2618   : > { %v5362_v32 = vadd.f32 %v5361_v31, %v8420_v60  ;;  %v5394_v60 = vld [vmem:[%s8814_s3 + $0x10] sm:$0xff]  ;;  %v6190_v31 = vld [vmem:[#allocation20] ss:$0 sm:$0xff]  ;;  %s7418_s3 = sshll.u32 %s7615_s4, 4  ;;  %s7419_s3 = int_to_ptr.vmem [resolvable:$false] %s7418_s3 }
0x2619   : > { %v6717_v43 = vpack.c.bf16 %v5395_v41, %v5394_v60  ;;  %v6738_v60 = vpack.c.bf16 %v5629_v39, %v5628_v38  ;;  %v5630_v41 = vld [vmem:[%s8817_s12 + $0x10] sm:$0xff]  ;;  %s7420_s22 = scalar_lea.vmem %s7419_s3, 128  ;;  %p7421_p12 = scmp.lt.s32.totalorder %s5774_s9, %s7419_s3 }
0x261a   : > { %v5365_v33 = vsel %vm4190_vm9, %v5362_v32, 0.0  ;;  %p7422_p5 = scmp.lt.s32.totalorder %s7420_s22, %s7414_s6 }
0x261b   : > { %5366 = vadd.xlane.f32.xlu1 %v5365_v33  ;;  %6718 = vmatpush3.bf16.msra.mxu1 %v6717_v43  ;;  %v5631_v43 = vld [vmem:[%s8817_s12 + $0x18] sm:$0xff] }
0x261c   : > { %6737 = vmatprep.subr.bf16.mxu1 %v7600_v0  ;;  %v6741_v44 = vpack.c.bf16 %v5631_v43, %v5630_v41  ;;  %p7423_p6 = por %p7422_p5, %p7421_p12 }
0x261e   : > { %p7424_p9 = pnand %p7423_p6, %p7417_p4 }
0x26a8   : > { %v5367_v34 = vpop.xlane.xlu1 %5366 }
0x26a9   : > { %v5368_v28 = vmul.f32 0.03125, %v5367_v34 }
0x26ab   : > { %v5369_v35 = vsub.f32 %v5362_v32, %v5368_v28 }
0x26ad   : > { %v5370_v26 = vmul.f32 %v5369_v35, %v5369_v35 }
0x26af   : > { %v5371_v36 = vsel %vm4190_vm9, %v5370_v26, 0.0 }
0x26b0   : > { %5372 = vadd.xlane.f32.xlu1 %v5371_v36 }
0x273d   : > { %v5373_v23 = vpop.xlane.xlu1 %5372 }
0x273e   : > { %v5374_v57 = vmul.f32 0.03125, %v5373_v23 }
0x2740   : > { %v5375_v58 = vadd.f32 1e-05, %v5374_v57 }
0x2742   : > { %7038 = vrsqrt.f32 %v5375_v58 }
0x274c   : > { %v7039_v59 = vpop.eup %7038 }
0x274d   : > { %v5377_v62 = vmul.f32 %v7039_v59, %v5369_v35 }
0x274f   : > { %v5384_v2 = vmul.f32 %v6183_v61, %v5377_v62 }
0x2751   : > { %v5391_v3 = vadd.f32 %v6184_v63, %v5384_v2 }
0x2753   : > { %6622 = vmatmul.mubr.msk.f32.vlgmr.msra.gmra.mrb[48].mxu1 %vm1818_vm3, %v5391_v3 }
0x2754   : > { %6659 = vmatprep.mubr.msk.f32.mxu1 %vm7601_vm0, %v7602_v1  ;;  %6739 = vmatpush3.bf16.msra.mxu1 %v6738_v60 }
0x2755   : > { %6740 = vmatprep.subr.bf16.mxu1 %v7600_v0  ;;  %v6192_v0 = vld [vmem:[#allocation3] ss:$0 sm:$0xff] }
0x2758   : > { %6742 = vmatpush3.bf16.msra.mxu1 %v6741_v44 }
0x2826   : > { %v5472_v8 = vpop.f32.mrb[48].mxu1 }
0x2827   : > { %v5473_v9 = vadd.f32 %v6185_v6, %v5472_v8  ;;  %v6623_v10 = vpop.f32.mrb[49].mxu1 }
0x2829   : > { %v5476_v11 = vmax.f32 %v5473_v9, 0.0 }
0x282b   : > { %6649 = vmatmul.mubr.msk.f32.vlgmr.msra.gmra.mrb[40].mxu0 %vm1892_vm4, %v5476_v11 }
0x28fe   : > { %v5565_v13 = vpop.f32.mrb[40].mxu0 }
0x28ff   : > { %v5566_v14 = vadd.f32 %v6187_v12, %v5565_v13  ;;  %v6650_v15 = vpop.f32.mrb[41].mxu0 }
0x2901   : > { %v5569_v16 = vadd.f32 %v5566_v14, %v5391_v3 }
0x2903   : > { %v5572_v17 = vsel %vm4190_vm9, %v5569_v16, 0.0 }
0x2904   : > { %5573 = vadd.xlane.f32.xlu1 %v5572_v17 }
0x2991   : > { %v5574_v1 = vpop.xlane.xlu1 %5573 }
0x2992   : > { %v5575_v18 = vmul.f32 0.03125, %v5574_v1 }
0x2994   : > { %v5576_v19 = vsub.f32 %v5569_v16, %v5575_v18 }
0x2996   : > { %v5577_v21 = vmul.f32 %v5576_v19, %v5576_v19 }
0x2998   : > { %v5578_v22 = vsel %vm4190_vm9, %v5577_v21, 0.0 }
0x2999   : > { %5579 = vadd.xlane.f32.xlu1 %v5578_v22 }
0x2a26   : > { %v5580_v7 = vpop.xlane.xlu1 %5579 }
0x2a27   : > { %v5581_v24 = vmul.f32 0.03125, %v5580_v7 }
0x2a29   : > { %v5582_v25 = vadd.f32 1e-05, %v5581_v24 }
0x2a2b   : > { %7040 = vrsqrt.f32 %v5582_v25 }
0x2a35   : > { %v7041_v27 = vpop.eup %7040 }
0x2a36   : > { %v5584_v30 = vmul.f32 %v7041_v27, %v5576_v19 }
0x2a38   : > { %v5591_v32 = vmul.f32 %v6189_v29, %v5584_v30 }
0x2a3a   : > { %v5598_v33 = vadd.f32 %v6190_v31, %v5591_v32 }
0x2a3c   : > { %v5601_v34 = vsel %vm4190_vm9, %v5598_v33, 0.0 }
0x2a3d   : > { %5602 = vadd.xlane.f32.xlu1 %v5601_v34 }
0x2aca   : > { %v5603_v28 = vpop.xlane.xlu1 %5602 }
0x2acb   : > { %v5604_v35 = vmul.f32 0.03125, %v5603_v28 }
0x2acd   : > { %v5605_v26 = vsub.f32 %v5598_v33, %v5604_v35 }
0x2acf   : > { %v5606_v36 = vmul.f32 %v5605_v26, %v5605_v26 }
0x2ad1   : > { %v5607_v37 = vsel %vm4190_vm9, %v5606_v36, 0.0 }
0x2ad2   : > { %5608 = vadd.xlane.f32.xlu1 %v5607_v37 }
0x2b5f   : > { %v5609_v45 = vpop.xlane.xlu1 %5608 }
0x2b60   : > { %v5610_v46 = vmul.f32 0.03125, %v5609_v45 }
0x2b62   : > { %v5611_v47 = vadd.f32 1e-05, %v5610_v46 }
0x2b64   : > { %7042 = vrsqrt.f32 %v5611_v47 }
0x2b6e   : > { %v7043_v48 = vpop.eup %7042 }
0x2b6f   : > { %v5613_v50 = vmul.f32 %v7043_v48, %v5605_v26 }
0x2b71   : > { %v5620_v51 = vmul.f32 %v6191_v49, %v5613_v50 }
0x2b73   : > { %v5627_v52 = vadd.f32 %v6192_v0, %v5620_v51 }
0x2b75   : > { %6660 = vmatmul.mubr.msk.f32.vlgmr.msra.gmra.mrb[50].mxu1 %vm1818_vm3, %v5627_v52  ;;  %v5713_v53 = vmul.f32 %v5712_v42, %v5627_v52  ;;  %5746 = vst.msk [vmem:[%s1625_s25] sm:$0xf] %vm4190_vm9, %v5627_v52 }
0x2b77   : > { %v5714_v54 = vsel %vm4190_vm9, %v5713_v53, 0.0 }
0x2b78   : > { %5715 = vadd.xlane.f32.xlu0 %v5714_v54 }
0x2b79   : > { %7427 = shalt.err (!%p7424_p9)
}
0x2b7a   : > { %s7428_s25 = scalar_lea.hbm %s8572_s1, 64  ;;  %s7432_s4 = scalar_lea.hbm %s7865_s19, 128 }
0x2b7b   : > { %p7429_p10 = scmp.ne.s32.totalorder %s8572_s1, %s7428_s25  ;;  %p7433_p11 = scmp.lt.u32.totalorder %s8572_s1, %s7865_s19 }
0x2b7c   : > { %p7434_p13 = scmp.lt.u32.totalorder %s7432_s4, %s7428_s25  ;;  %p7436_p2 = scmp.lt.u32.totalorder %s7428_s25, %s8572_s1 }
0x2b7d   : > { %p7430_p7 = pnand %p7429_p10, %p8819_p0 }
0x2b7e   : > { %p7435_p1 = por %p7434_p13, %p7433_p11 }
0x2b7f   : > { %p7431_p8 = pneg %p7430_p7 }
0x2b80   : > { %p7437_p3 = por %p7436_p2, %p7435_p1 }
0x2b82   : > { %p7438_p4 = pnand %p7437_p3, %p7431_p8 }
0x2b84   : > { %7441 = shalt.err (!%p7438_p4)
}
0x2b85   : > { %s8820_s3 = sld [smem:[#allocation73_spill]]  ;;  %vm5725_vm12 = vcmask 3072   ;;  %s8821_s22 = sld [smem:[#allocation74_spill]]  ;;  %v5735_v8 = vld [vmem:[%s7855_s5] sm:$0xf]  ;;  %vm5744_vm13 = vcmask 0  }
0x2b86   : > { %6795 = dma.vmem_to_hbm [thread:$0]  (%p8819_p0), %s5774_s9, 64, %s8572_s1, %s5752_s7  }
0x2b87   : > { %s8822_s9 = sshll.u32 %s8559_s2, 2  ;;  %s8596_s6 = scalar_lea.hbm %s7870_s29, %s6197_s11 }
0x2b88   : > { %s1632_s1 = scalar_lea.vmem [#allocation25], %s8822_s9  ;;  %s1639_s25 = scalar_lea.vmem %s7860_s21, %s8120_s16 }
0x2b89   : > { %s5786_s7 = sshll.u32 %s1632_s1, 4  ;;  %s5757_s4 = scalar_lea.sflag [#allocation26], %s8559_s2  ;;  %s8598_s7 = int_to_ptr.vmem [resolvable:$true] %s5786_s7 }
0x2b8b   : > { %v5717_v55 = vld [vmem:[%s8820_s3] sm:$0xf]  ;;  %s7442_s3 = scalar_lea.vmem %s8598_s7, 64 }
0x2b8c   : > { %v6193_v15 = vld [vmem:[%s8821_s22] ss:$0 sm:$0xff]  ;;  %p7443_p12 = scmp.ne.s32.totalorder %s8598_s7, %s7442_s3  ;;  %s7616_s22 = smov [#allocation25]  }
0x2b8d   : > { %s7446_s0 = sshll.u32 %s7616_s22, 4  ;;  %s7447_s0 = int_to_ptr.vmem [resolvable:$false] %s7446_s0 }
0x2b8e   : > { %p7444_p5 = pnand %p7443_p12, %p8819_p0  ;;  %s7448_s11 = scalar_lea.vmem %s7447_s0, 128 }
0x2b8f   : > { %p7449_p9 = scmp.lt.s32.totalorder %s8598_s7, %s7447_s0  ;;  %p7450_p10 = scmp.lt.s32.totalorder %s7448_s11, %s7442_s3 }
0x2b90   : > { %p7445_p6 = pneg %p7444_p5 }
0x2b91   : > { %p7451_p7 = por %p7450_p10, %p7449_p9 }
0x2b93   : > { %p7452_p8 = pnand %p7451_p7, %p7445_p6 }
0x2c05   : > { %v5716_v20 = vpop.xlane.xlu0 %5715 }
0x2c06   : > { %v5718_v56 = vadd.f32 %v5717_v55, %v5716_v20 }
0x2c08   : > { %v5719_v23 = vsub.f32 0.0, %v5718_v56 }
0x2c0a   : > { %v5720_v57 = vmul.f32 1.442695, %v5719_v23 }
0x2c0c   : > { %7044 = vpow2.f32 %v5720_v57 }
0x2c16   : > { %v7045_v58 = vpop.eup %7044 }
0x2c17   : > { %v5722_v59 = vadd.f32 1.0, %v7045_v58 }
0x2c19   : > { %7046 = vrcp.f32 %v5722_v59 }
0x2c23   : > { %v7047_v61 = vpop.eup %7046 }
0x2c24   : > { %v5726_v62 = vsel %vm5725_vm12, %v7047_v61, 0.0 }
0x2c25   : > { %v5727_v63 = vrot.slane %v5726_v62, 4 }
0x2c27   : > { %v5728_v2 = vadd.f32 %v5727_v63, %v5726_v62 }
0x2c29   : > { %v5729_v3 = vrot.slane %v5728_v2, 2 }
0x2c2b   : > { %v5730_v4 = vadd.f32 %v5729_v3, %v5728_v2 }
0x2c2d   : > { %v5731_v40 = vrot.slane %v5730_v4, 1 }
0x2c2f   : > { %v5732_v5 = vadd.f32 %v5731_v40, %v5730_v4 }
0x2c31   : > { %7048 = vrcp.f32 %v5732_v5 }
0x2c3b   : > { %v7049_v6 = vpop.eup %7048 }
0x2c3c   : > { %v5734_v9 = vmul.f32 %v7049_v6, %v7047_v61 }
0x2c3e   : > { %v5736_v10 = vmul.f32 %v5735_v8, %v5734_v9 }
0x2c40   : > { %v5737_v11 = vsel %vm5725_vm12, %v5736_v10, 0.0 }
0x2c41   : > { %v5738_v12 = vrot.slane %v5737_v11, 4 }
0x2c43   : > { %v5739_v13 = vadd.f32 %v5738_v12, %v5737_v11 }
0x2c45   : > { %v5740_v14 = vrot.slane %v5739_v13, 2 }
0x2c47   : > { %v5741_v16 = vadd.f32 %v5740_v14, %v5739_v13 }
0x2c48   : > { %v5708_v17 = vpop.f32.mrb[50].mxu1 }
0x2c49   : > { %v5742_v1 = vrot.slane %v5741_v16, 1  ;;  %v5709_v18 = vadd.f32 %v6193_v15, %v5708_v17  ;;  %v6661_v19 = vpop.f32.mrb[51].mxu1 }
0x2c4b   : > { %v5743_v21 = vadd.f32 %v5742_v1, %v5741_v16  ;;  %5747 = vst.msk [vmem:[%s1632_s1] sm:$0xf] %vm3292_vm6, %v5709_v18 }
0x2c4c   : > { %7455 = shalt.err (!%p7452_p8)
}
0x2c4d   : > { %s7456_s2 = scalar_lea.hbm %s8596_s6, 64  ;;  %s7460_s9 = scalar_lea.hbm %s7870_s29, 128 }
0x2c4e   : > { %p7457_p11 = scmp.ne.s32.totalorder %s8596_s6, %s7456_s2  ;;  %p7461_p2 = scmp.lt.u32.totalorder %s8596_s6, %s7870_s29 }
0x2c4f   : > { %p7462_p3 = scmp.lt.u32.totalorder %s7460_s9, %s7456_s2  ;;  %p7464_p12 = scmp.lt.u32.totalorder %s7456_s2, %s8596_s6 }
0x2c50   : > { %p7458_p13 = pnand %p7457_p11, %p8819_p0 }
0x2c51   : > { %p7463_p4 = por %p7462_p3, %p7461_p2 }
0x2c52   : > { %p7459_p1 = pneg %p7458_p13 }
0x2c53   : > { %p7465_p5 = por %p7464_p12, %p7463_p4 }
0x2c55   : > { %p7466_p6 = pnand %p7465_p5, %p7459_p1 }
0x2c57   : > { %7469 = shalt.err (!%p7466_p6)
}
0x2c58   : > { %6796 = dma.vmem_to_hbm [thread:$0]  (%p8819_p0), %s8598_s7, 64, %s8596_s6, %s5757_s4   ;;  %5745 = vst.msk [vmem:[%s1639_s25] sm:$0x1] %vm5744_vm13, %v5743_v21 }
0x2c59 PF: > { %s8823_s1 = sld [smem:[#allocation77_spill]]  ;;  %s8824_s3 = sld [smem:[#allocation81_spill]] }
0x2c5a   : > { %p6872_p9 = scmp.ge.s32.totalorder %s7536_s15, 2 }
0x2c5f   : > { %s5804_s22 = sand.u32 1, %s8823_s1   ;;  %p8825_p10 = scmp.ne.s32.totalorder %s8824_s3, 0 }
0x2c60   : > { %s5805_s0 = scalar_lea.sflag [#allocation5], %s5804_s22 }
0x2c61   : > { %p6840_p7 = pnand %p6872_p9, %p8825_p10 }
0x2c63   : > { %7515 = dma.done.wait (!%p6840_p7), %s5805_s0, 64  }
0x2c64   : > { %7517 = vsyncadd (!%p6840_p7), %s5805_s0, 4294967232  ;;  %s5814_s28 = scalar_lea.sflag [#allocation26], %s5804_s22 }
0x2c65   : > { %7519 = dma.done.wait (!%p6840_p7), %s5814_s28, 64  }
0x2c66   : > { %7521 = vsyncadd (!%p6840_p7), %s5814_s28, 4294967232  ;;  %s8826_s15 = sld [smem:[#allocation79_spill]]  ;;  %s8827_s6 = sld [smem:[#allocation78_spill]] }
0x2c67   : > { %s8828_s11 = sld [smem:[#allocation80_spill]]  ;;  %s8829_s7 = smov %s7528_s10 }
0x2c6c   : > { %p120_p0 = scmp.ge.s32.totalorder %s8826_s15, 4   ;;  %s8830_s10 = smov %s8827_s6 }
0x2c6e   :  { %122 = sbr.rel (!%p120_p0) target bundleno = 104 (0x68), region = 374 }
0x2c75   :  { %5819 = vsyncpa [#allocation4], 1 }
0x2c76   :  { %5821 = vsyncpa [#allocation4 + $0x1], 1 }
0x2c77   :  { %5822 = vsyncpa [#allocation7], 1 }
0x2c78   :  { %5823 = vsyncpa [#allocation10], 1 }
0x2c79   :  { %5824 = vsyncpa [#allocation13], 1 }
0x2c7a   :  { %5825 = vsyncpa [#allocation16], 1 }
0x2c7b   :  { %5826 = vsyncpa [#allocation19], 1 }
0x2c7c   :  { %5827 = vsyncpa [#allocation22], 1 }
0x2c7d   :  { %5828 = vsyncpa [#allocation5], 1 }
0x2c7e   :  { %5830 = vsyncpa [#allocation5 + $0x1], 1 }
0x2c7f   :  { %5831 = vsyncpa [#allocation26], 1 }
0x2c80   :  { %5833 = vsyncpa [#allocation26 + $0x1], 1 }

</bundles_post_ra>
